<compile_context>
chip_gen: v5e
topology: v5e:2x2
jax: 0.10.0
libtpu: 0.0.40
codegen_flags: <defaults>
</compile_context>

<pallas_src>
import math

import jax
import jax.numpy as jnp
from jax.experimental import pallas as pl
from jax.experimental.pallas import tpu as pltpu

PAD = 0

# ---------------- small configuration consistent with the module ----------------
NUM_TYPES = 5
D_MODEL = 32
D_INNER = 32
N_LAYERS = 2
N_HEAD = 4
D_K = 8
D_V = 8            # NOTE: packing of qkv weights assumes D_K == D_V
BATCH = 2
SEQ = 8
KOUT = 1 + 2 * NUM_TYPES     # packed decode output width: [time | type(K) | hid(K)]
EPS_ATTN = 1e-6    # LayerNorm eps inside MHA / FFN (THP uses eps=1e-6)
EPS_PRED = 1e-5    # nn.LayerNorm default eps (predictors)

# lane offsets inside the fused [D, 3*H*d_k] QKV weight / activation
_QOFF = 0
_KOFF = N_HEAD * D_K
_VOFF = 2 * N_HEAD * D_K


# ------------- math helpers (usable both inside Pallas kernels and in the ref) -------------
def _erf(x):
    # Abramowitz & Stegun 7.1.26 polynomial, |err| < 1.5e-7 (erf-GELU equivalent).
    a1, a2, a3, a4, a5 = 0.254829592, -0.284496736, 1.421413741, -1.453152027, 1.061405429
    p = 0.3275911
    s = jnp.where(x >= 0.0, 1.0, -1.0)
    ax = jnp.abs(x)
    t = 1.0 / (1.0 + p * ax)
    poly = ((((a5 * t + a4) * t + a3) * t + a2) * t + a1) * t
    return s * (1.0 - poly * jnp.exp(-ax * ax))


def _gelu(x):
    # matches torch.nn.functional.gelu (erf-based, approximate='none')
    return 0.5 * x * (1.0 + _erf(x * (1.0 / math.sqrt(2.0))))


def _layer_norm(x, gamma, beta, eps):
    mu = jnp.mean(x, axis=-1, keepdims=True)
    var = jnp.mean(jnp.square(x - mu), axis=-1, keepdims=True)
    return (x - mu) * jax.lax.rsqrt(var + eps) * gamma + beta


def _relu6(x):
    return jnp.clip(x, 0.0, 6.0)


# ---------------------------- fused Pallas kernel ----------------------------
def thp_fused_kernel(x_ref, tem_ref, npad_ref, bias_ref,
                     wqkv_ref, wfc_ref, wffn_ref, encvec_ref,
                     decw1_ref, decvec_ref, wbig_ref,
                     out_ref):
    R = x_ref.shape[0]            # rows per grid step = (sequences per step) * SEQ
    tem = tem_ref[...]            # [R, D]
    npad = npad_ref[...]          # [R, 1]   1.0 on non-pad tokens
    attn_bias = bias_ref[0]       # [R, R]   block-diag causal + key-padding additive bias

    enc = x_ref[...]              # [R, D]
    for l in range(N_LAYERS):
        lv = encvec_ref[l]        # [7, D]: bfc, ln1_g, ln1_b, b1, b2, ln2_g, ln2_b
        bfc, g1, b1ln, bff1, bff2, g2, b2ln = (lv[i:i + 1, :] for i in range(7))

        x = enc + tem                                            # enc_output += tem_enc

        # ---- multi-head self-attention: one fused QKV matmul, batch-folded per head ----
        qkv = jnp.dot(x, wqkv_ref[l],
                      preferred_element_type=jnp.float32)        # [R, 3*H*d_k]
        heads = []
        for h in range(N_HEAD):
            q = qkv[:, _QOFF + h * D_K:_QOFF + (h + 1) * D_K]    # [R, d_k] (scale folded)
            k = qkv[:, _KOFF + h * D_K:_KOFF + (h + 1) * D_K]
            v = qkv[:, _VOFF + h * D_V:_VOFF + (h + 1) * D_V]
            s = jax.lax.dot_general(q, k, (((1,), (1,)), ((), ())),
                                    preferred_element_type=jnp.float32)   # [R, R]
            s = s + attn_bias
            s = s - jnp.max(s, axis=-1, keepdims=True)
            p = jnp.exp(s)
            p = p / jnp.sum(p, axis=-1, keepdims=True)           # exact softmax
            heads.append(jnp.dot(p, v, preferred_element_type=jnp.float32))  # [R, d_v]
        ho = jnp.concatenate(heads, axis=-1)                     # [R, H*d_v], (h, d_v) order

        attn = jnp.dot(ho, wfc_ref[l],
                       preferred_element_type=jnp.float32) + bfc + x    # fc + bias + residual
        attn = _layer_norm(attn, g1, b1ln, EPS_ATTN) * npad             # LN + non_pad mask

        # ---- position-wise feed forward ----
        hdn = _gelu(jnp.dot(attn, wffn_ref[2 * l + 0],
                            preferred_element_type=jnp.float32) + bff1)
        ffn = jnp.dot(hdn, wffn_ref[2 * l + 1],
                      preferred_element_type=jnp.float32) + bff2
        enc = _layer_norm(ffn + attn, g2, b2ln, EPS_ATTN) * npad

    # ---- fused decode heads ----
    dv = decvec_ref[...]          # [7, D]: bt1, gt, btn, bc1, gc, bcn, packed-output-bias
    bt1, gt, btn, bc1, gc, bcn = (dv[i:i + 1, :] for i in range(6))
    bout = dv[6:7, 0:KOUT]        # [1, KOUT]

    t = _relu6(jnp.dot(enc, decw1_ref[0], preferred_element_type=jnp.float32) + bt1)
    t = _layer_norm(t, gt, btn, EPS_PRED)
    c = _relu6(jnp.dot(enc, decw1_ref[1], preferred_element_type=jnp.float32) + bc1)
    c = _layer_norm(c, gc, bcn, EPS_PRED)

    # Block-diagonal second stage: one matmul produces [time | type | hid] lane-dense.
    lhs = jnp.concatenate([t, c, enc], axis=-1)                  # [R, 3*D]
    dec = jnp.dot(lhs, wbig_ref[...], preferred_element_type=jnp.float32) + bout  # [R, KOUT]
    colid = jax.lax.broadcasted_iota(jnp.int32, (R, KOUT), 1)
    dec = jnp.where(colid == 0, jnp.maximum(dec, 0.0), dec)      # ReLU on the time column
    dec = jnp.where(colid < 1 + NUM_TYPES, dec * npad, dec)      # mask time+type by non-pad

    # Single lane-packed output slab: [enc | time | type | hid], written once.
    out_ref[...] = jnp.concatenate([enc, dec], axis=-1)          # [R, D + KOUT]


# ---------------------------- pallas_call wrapper ----------------------------
def _wspec(arr):
    nd = arr.ndim
    return pl.BlockSpec(arr.shape, lambda g, _nd=nd: (0,) * _nd)


def transformer_hawkes_forward(params, kparams, event_type, event_time, *, seqs_per_step=None):
    non_pad = get_non_pad_mask(event_type)                      # [B, S, 1]
    tem = temporal_enc(event_time, non_pad, params['position_vec'])
    emb = params['event_emb'][event_type]                       # embedding gather (glue)
    B, S, D = emb.shape

    # Fold batch into the kernel body.  One grid step processes `seqs_per_step` sequences;
    # default = all of them (lowest per-step overhead on v5e/v6e).  On v7x, pass
    # seqs_per_step = B // 2 to keep both TensorCores busy via the "parallel" grid axis.
    if seqs_per_step is None:
        seqs_per_step = B
    G = B // seqs_per_step
    R = seqs_per_step * S                                        # rows per grid step

    x2 = emb.reshape(B * S, D)
    tem2 = tem.reshape(B * S, D)
    npad2 = non_pad.reshape(B * S, 1)

    # Additive attention bias per group: block-diagonal (no cross-sequence attention after
    # batch folding) + causal + key padding.  Tiny (R*R f32) and precomputed once (glue).
    keypad = (event_type == PAD).reshape(G, 1, R)                # [G, 1, R]
    idx = jnp.arange(R)
    seq_id = idx // S
    cross = seq_id[:, None] != seq_id[None, :]                   # [R, R]
    causal = idx[None, :] > idx[:, None]                         # col > row
    masked = jnp.logical_or(jnp.logical_or(cross, causal)[None], keypad)   # [G, R, R]
    attn_bias = jnp.where(masked, -1e9, 0.0).astype(jnp.float32)

    spec_act = pl.BlockSpec((R, D), lambda g: (g, 0))
    spec_np = pl.BlockSpec((R, 1), lambda g: (g, 0))
    spec_bias = pl.BlockSpec((1, R, R), lambda g: (g, 0, 0))
    spec_out = pl.BlockSpec((R, D + KOUT), lambda g: (g, 0))

    weights = [kparams['wqkv'], kparams['wfc'], kparams['wffn'], kparams['enc_vecs'],
               kparams['decw1'], kparams['dec_vecs'], kparams['wbig']]

    packed = pl.pallas_call(
        thp_fused_kernel,
        out_shape=jax.ShapeDtypeStruct((B * S, D + KOUT), jnp.float32),
        grid=(G,),
        in_specs=[spec_act, spec_act, spec_np, spec_bias] + [_wspec(w) for w in weights],
        out_specs=spec_out,
        compiler_params=pltpu.CompilerParams(dimension_semantics=("parallel",)),
    )(x2, tem2, npad2, attn_bias, *weights)

    packed = packed.reshape(B, S, D + KOUT)
    enc = packed[..., :D]
    time_pred = packed[..., D:D + 1]
    type_pred = packed[..., D + 1:D + 1 + NUM_TYPES]
    all_hid = packed[..., D + 1 + NUM_TYPES:]
    return enc, type_pred, time_pred, all_hid


# ---------------------------- plain-JAX glue ----------------------------
def get_non_pad_mask(event_type):
    return (event_type != PAD).astype(jnp.float32)[:, :, None]            # [B, S, 1]


def get_attn_mask_float(event_type):
    # used only by the pure-JAX reference
    B, S = event_type.shape
    keypad = (event_type == PAD)[:, None, :]                               # [B, 1, S]
    subseq = jnp.triu(jnp.ones((S, S), dtype=bool), k=1)[None]             # [1, S, S]
    return jnp.logical_or(keypad, subseq).astype(jnp.float32)              # [B, S, S]


def temporal_enc(event_time, non_pad_mask, position_vec):
    result = event_time[:, :, None] / position_vec                         # [B, S, D]
    result = result.at[:, :, 0::2].set(jnp.sin(result[:, :, 0::2]))
    result = result.at[:, :, 1::2].set(jnp.cos(result[:, :, 1::2]))
    return result * non_pad_mask


# ---------------------------- parameter packing for the kernel ----------------------------
def build_kernel_params(params):
    """Pack per-layer / decoder params into the dense arrays the fused kernel consumes."""
    inv_temp = 1.0 / math.sqrt(D_K)

    wqkv, wfc, wffn, enc_vecs = [], [], [], []
    for lp in params['layers']:
        # fused QKV weight, lane-dense [D, 3*H*d_k]; fold 1/sqrt(d_k) into the Q block
        wqkv.append(jnp.concatenate([lp['wq'] * inv_temp, lp['wk'], lp['wv']], axis=1))
        wfc.append(lp['wfc'])                                    # keep original [H*d_v, D]
        wffn.append(lp['w1'])
        wffn.append(lp['w2'])
        enc_vecs.append(jnp.concatenate(
            [lp['bfc'], lp['ln1_g'], lp['ln1_b'], lp['b1'], lp['b2'],
             lp['ln2_g'], lp['ln2_b']], axis=0))                 # [7, D]

    d = params['dec']
    bout = jnp.zeros((1, D_MODEL), jnp.float32)
    bout = bout.at[0, 0].set(d['bt2'][0, 0])
    bout = bout.at[0, 1:1 + NUM_TYPES].set(d['bc2'][0])
    bout = bout.at[0, 1 + NUM_TYPES:1 + 2 * NUM_TYPES].set(d['bl'][0])
    dec_vecs = jnp.concatenate([d['bt1'], d['gt'], d['bt'],
                                d['bc1'], d['gc'], d['bc'], bout], axis=0)   # [7, D]

    # block-diagonal second-stage decode weight: rows [t | c | enc], cols [time | type | hid]
    wbig = jnp.zeros((3 * D_MODEL, KOUT), jnp.float32)
    wbig = wbig.at[0:D_MODEL, 0:1].set(d['wt2'])
    wbig = wbig.at[D_MODEL:2 * D_MODEL, 1:1 + NUM_TYPES].set(d['wc2'])
    wbig = wbig.at[2 * D_MODEL:, 1 + NUM_TYPES:].set(d['wl'])

    return dict(
        wqkv=jnp.stack(wqkv),               # [L, D, 3*H*d_k]
        wfc=jnp.stack(wfc),                 # [L, H*d_v, D]
        wffn=jnp.stack(wffn),               # [2*L, D, D]
        enc_vecs=jnp.stack(enc_vecs),       # [L, 7, D]
        decw1=jnp.stack([d['wt1'], d['wc1']]),   # [2, D, D]
        dec_vecs=dec_vecs,                  # [7, D]
        wbig=wbig,                          # [3*D, KOUT]
    )


# ---------------------------- pure-JAX reference (unpacked params) ----------------------------
def reference_forward(params, event_type, event_time):
    non_pad = get_non_pad_mask(event_type)
    mask_f = get_attn_mask_float(event_type)
    tem = temporal_enc(event_time, non_pad, params['position_vec'])
    enc = params['event_emb'][event_type]
    B, S, _ = enc.shape
    for lp in params['layers']:
        x = enc + tem
        q = (x @ lp['wq']).reshape(B, S, N_HEAD, D_K).transpose(0, 2, 1, 3)
        k = (x @ lp['wk']).reshape(B, S, N_HEAD, D_K).transpose(0, 2, 1, 3)
        v = (x @ lp['wv']).reshape(B, S, N_HEAD, D_V).transpose(0, 2, 1, 3)
        scores = jnp.einsum('bhqd,bhkd->bhqk', q / math.sqrt(D_K), k)
        scores = jnp.where(mask_f[:, None] > 0.0, -1e9, scores)
        p = jax.nn.softmax(scores, axis=-1)
        o = jnp.einsum('bhqk,bhkd->bhqd', p, v).transpose(0, 2, 1, 3).reshape(B, S, -1)
        o = o @ lp['wfc'] + lp['bfc'] + x
        o = _layer_norm(o, lp['ln1_g'], lp['ln1_b'], EPS_ATTN) * non_pad
        h = _gelu(o @ lp['w1'] + lp['b1'])
        f = h @ lp['w2'] + lp['b2']
        enc = _layer_norm(f + o, lp['ln2_g'], lp['ln2_b'], EPS_ATTN) * non_pad
    d = params['dec']
    t = _relu6(enc @ d['wt1'] + d['bt1'])
    t = _layer_norm(t, d['gt'], d['bt'], EPS_PRED)
    t = jnp.maximum(t @ d['wt2'] + d['bt2'], 0.0)
    c = _relu6(enc @ d['wc1'] + d['bc1'])
    c = _layer_norm(c, d['gc'], d['bc'], EPS_PRED)
    c = c @ d['wc2'] + d['bc2']
    hid = enc @ d['wl'] + d['bl']
    return enc, c * non_pad, t * non_pad, hid


# ---------------------------- deterministic parameter init ----------------------------
def init_params(key):
    keys = jax.random.split(key, 64)
    kit = iter(list(keys))

    def w(shape, scale=0.05):
        return (scale * jax.random.normal(next(kit), shape)).astype(jnp.float32)

    params = {}
    emb = w((NUM_TYPES + 1, D_MODEL), 0.1)
    params['event_emb'] = emb.at[PAD].set(0.0)        # nn.Embedding padding_idx=0
    params['position_vec'] = jnp.asarray(
        [math.pow(10000.0, 2.0 * (i // 2) / D_MODEL) for i in range(D_MODEL)],
        dtype=jnp.float32)

    layers = []
    for _ in range(N_LAYERS):
        layers.append(dict(
            wq=w((D_MODEL, N_HEAD * D_K)), wk=w((D_MODEL, N_HEAD * D_K)),
            wv=w((D_MODEL, N_HEAD * D_V)),
            wfc=w((N_HEAD * D_V, D_MODEL)), bfc=w((1, D_MODEL), 0.02),
            ln1_g=jnp.ones((1, D_MODEL), jnp.float32),
            ln1_b=jnp.zeros((1, D_MODEL), jnp.float32),
            w1=w((D_MODEL, D_INNER)), b1=w((1, D_INNER), 0.02),
            w2=w((D_INNER, D_MODEL)), b2=w((1, D_MODEL), 0.02),
            ln2_g=jnp.ones((1, D_MODEL), jnp.float32),
            ln2_b=jnp.zeros((1, D_MODEL), jnp.float32),
        ))
    params['layers'] = layers

    params['dec'] = dict(
        wt1=w((D_MODEL, D_MODEL)), bt1=w((1, D_MODEL), 0.02),
        gt=jnp.ones((1, D_MODEL), jnp.float32), bt=jnp.zeros((1, D_MODEL), jnp.float32),
        wt2=w((D_MODEL, 1)), bt2=w((1, 1), 0.02),
        wc1=w((D_MODEL, D_MODEL)), bc1=w((1, D_MODEL), 0.02),
        gc=jnp.ones((1, D_MODEL), jnp.float32), bc=jnp.zeros((1, D_MODEL), jnp.float32),
        wc2=w((D_MODEL, NUM_TYPES)), bc2=w((1, NUM_TYPES), 0.02),
        wl=w((D_MODEL, NUM_TYPES)), bl=w((1, NUM_TYPES), 0.02),
    )
    # TODO(synk): self.alpha / self.beta parameters are unused in forward(), omitted.
    return params


if __name__ == "__main__":
    root = jax.random.PRNGKey(0)
    k_par, k_type, k_time = jax.random.split(root, 3)

    params = init_params(k_par)
    kparams = build_kernel_params(params)     # one-time packing for the fused kernel

    # event types in [1, NUM_TYPES]; 0 is padding.  Pad the tail of each sequence.
    event_type = jax.random.randint(k_type, (BATCH, SEQ), 1, NUM_TYPES + 1, dtype=jnp.int32)
    event_type = event_type.at[0, -2:].set(PAD)
    event_type = event_type.at[1, -1:].set(PAD)
    # strictly increasing event times; zero out padded positions.
    dt = jax.random.uniform(k_time, (BATCH, SEQ), minval=0.1, maxval=1.0)
    event_time = jnp.cumsum(dt, axis=1).astype(jnp.float32)
    event_time = event_time * (event_type != PAD).astype(jnp.float32)

    fwd = jax.jit(transformer_hawkes_forward)
    outs = fwd(params, kparams, event_type, event_time)
    outs = jax.block_until_ready(outs)

    refs = reference_forward(params, event_type, event_time)
    names = ["enc_output", "type_prediction", "time_prediction", "all_hid"]
    # Exact softmax division (no approx reciprocal) -> differences are only f32 rounding /
    # the A&S erf polynomial (~1.5e-7); 1e-3 leaves a wide safety margin.
    for name, o, r in zip(names, outs, refs):
        assert o.shape == r.shape, (name, o.shape, r.shape)
        assert jnp.allclose(o, r, atol=1e-3, rtol=1e-3), f"mismatch in {name}"

    print("KERNEL_OK")
</pallas_src>

<mosaic_0001>
module attributes {stable_mosaic.version = 11 : i64} {
  func.func @thp_fused_kernel(%arg0: i32, %arg1: memref<16x32xf32, #tpu.memory_space<vmem>>, %arg2: memref<16x32xf32, #tpu.memory_space<vmem>>, %arg3: memref<16x1xf32, #tpu.memory_space<vmem>>, %arg4: memref<1x16x16xf32, #tpu.memory_space<vmem>>, %arg5: memref<2x32x96xf32, #tpu.memory_space<vmem>>, %arg6: memref<2x32x32xf32, #tpu.memory_space<vmem>>, %arg7: memref<4x32x32xf32, #tpu.memory_space<vmem>>, %arg8: memref<2x7x32xf32, #tpu.memory_space<vmem>>, %arg9: memref<2x32x32xf32, #tpu.memory_space<vmem>>, %arg10: memref<7x32xf32, #tpu.memory_space<vmem>>, %arg11: memref<96x11xf32, #tpu.memory_space<vmem>>, %arg12: memref<16x43xf32, #tpu.memory_space<vmem>>) attributes {dimension_semantics = [#tpu.dimension_semantics<parallel>], iteration_bounds = array<i64: 1>, scalar_prefetch = 0 : i64, scratch_operands = 0 : i64, tpu.core_type = #tpu.core_type<tc>, window_params = [{transform_indices = @transform_0, window_bounds = array<i64: 16, 32>}, {transform_indices = @transform_1, window_bounds = array<i64: 16, 32>}, {transform_indices = @transform_2, window_bounds = array<i64: 16, 1>}, {transform_indices = @transform_3, window_bounds = array<i64: 1, 16, 16>}, {pipeline_mode = #tpu.pipeline_mode<synchronous>, transform_indices = @transform_4, window_bounds = array<i64: 2, 32, 96>}, {pipeline_mode = #tpu.pipeline_mode<synchronous>, transform_indices = @transform_5, window_bounds = array<i64: 2, 32, 32>}, {pipeline_mode = #tpu.pipeline_mode<synchronous>, transform_indices = @transform_6, window_bounds = array<i64: 4, 32, 32>}, {pipeline_mode = #tpu.pipeline_mode<synchronous>, transform_indices = @transform_7, window_bounds = array<i64: 2, 7, 32>}, {pipeline_mode = #tpu.pipeline_mode<synchronous>, transform_indices = @transform_8, window_bounds = array<i64: 2, 32, 32>}, {pipeline_mode = #tpu.pipeline_mode<synchronous>, transform_indices = @transform_9, window_bounds = array<i64: 7, 32>}, {pipeline_mode = #tpu.pipeline_mode<synchronous>, transform_indices = @transform_10, window_bounds = array<i64: 96, 11>}, {transform_indices = @transform_11, window_bounds = array<i64: 16, 43>}]} {
    %c0 = arith.constant 0 : index
    %c0_0 = arith.constant 0 : index
    %0 = vector.load %arg2[%c0, %c0_0] : memref<16x32xf32, #tpu.memory_space<vmem>>, vector<16x32xf32>
    %c0_1 = arith.constant 0 : index
    %c0_2 = arith.constant 0 : index
    %1 = vector.load %arg3[%c0_1, %c0_2] : memref<16x1xf32, #tpu.memory_space<vmem>>, vector<16x1xf32>
    %c0_3 = arith.constant 0 : index
    %c0_4 = arith.constant 0 : index
    %c0_5 = arith.constant 0 : index
    %2 = vector.load %arg4[%c0_3, %c0_4, %c0_5] : memref<1x16x16xf32, #tpu.memory_space<vmem>>, vector<1x16x16xf32>
    %3 = vector.shape_cast %2 : vector<1x16x16xf32> to vector<16x16xf32>
    %c0_6 = arith.constant 0 : index
    %c0_7 = arith.constant 0 : index
    %4 = vector.load %arg1[%c0_6, %c0_7] : memref<16x32xf32, #tpu.memory_space<vmem>>, vector<16x32xf32>
    %c0_8 = arith.constant 0 : index
    %c0_9 = arith.constant 0 : index
    %c0_10 = arith.constant 0 : index
    %5 = vector.load %arg8[%c0_8, %c0_9, %c0_10] : memref<2x7x32xf32, #tpu.memory_space<vmem>>, vector<1x7x32xf32>
    %6 = vector.shape_cast %5 : vector<1x7x32xf32> to vector<7x32xf32>
    %7 = vector.extract_strided_slice %6 {offsets = [0, 0], sizes = [1, 32], strides = [1, 1]} : vector<7x32xf32> to vector<1x32xf32>
    %8 = vector.extract_strided_slice %6 {offsets = [1, 0], sizes = [1, 32], strides = [1, 1]} : vector<7x32xf32> to vector<1x32xf32>
    %9 = vector.extract_strided_slice %6 {offsets = [2, 0], sizes = [1, 32], strides = [1, 1]} : vector<7x32xf32> to vector<1x32xf32>
    %10 = vector.extract_strided_slice %6 {offsets = [3, 0], sizes = [1, 32], strides = [1, 1]} : vector<7x32xf32> to vector<1x32xf32>
    %11 = vector.extract_strided_slice %6 {offsets = [4, 0], sizes = [1, 32], strides = [1, 1]} : vector<7x32xf32> to vector<1x32xf32>
    %12 = vector.extract_strided_slice %6 {offsets = [5, 0], sizes = [1, 32], strides = [1, 1]} : vector<7x32xf32> to vector<1x32xf32>
    %13 = vector.extract_strided_slice %6 {offsets = [6, 0], sizes = [1, 32], strides = [1, 1]} : vector<7x32xf32> to vector<1x32xf32>
    %14 = arith.addf %4, %0 : vector<16x32xf32>
    %c0_11 = arith.constant 0 : index
    %c0_12 = arith.constant 0 : index
    %c0_13 = arith.constant 0 : index
    %15 = vector.load %arg5[%c0_11, %c0_12, %c0_13] : memref<2x32x96xf32, #tpu.memory_space<vmem>>, vector<1x32x96xf32>
    %16 = vector.shape_cast %15 : vector<1x32x96xf32> to vector<32x96xf32>
    %cst = arith.constant dense<0.000000e+00> : vector<16x96xf32>
    %17 = tpu.matmul %14, %16, %cst {dimension_numbers = #tpu.dot_dimension_numbers<[1], [0], [0], [1], [0, 0, 1, 1], [], []>} : vector<16x32xf32>, vector<32x96xf32>, vector<16x96xf32> -> vector<16x96xf32>
    %18 = vector.extract_strided_slice %17 {offsets = [0, 0], sizes = [16, 8], strides = [1, 1]} : vector<16x96xf32> to vector<16x8xf32>
    %19 = vector.extract_strided_slice %17 {offsets = [0, 32], sizes = [16, 8], strides = [1, 1]} : vector<16x96xf32> to vector<16x8xf32>
    %20 = vector.extract_strided_slice %17 {offsets = [0, 64], sizes = [16, 8], strides = [1, 1]} : vector<16x96xf32> to vector<16x8xf32>
    %cst_14 = arith.constant dense<0.000000e+00> : vector<16x16xf32>
    %21 = tpu.matmul %18, %19, %cst_14 {dimension_numbers = #tpu.dot_dimension_numbers<[1], [1], [0], [0], [0, 0, 1, 0], [], []>} : vector<16x8xf32>, vector<16x8xf32>, vector<16x16xf32> -> vector<16x16xf32>
    %22 = arith.addf %21, %3 : vector<16x16xf32>
    %cst_15 = arith.constant dense<0xFF800000> : vector<16xf32>
    %23 = vector.multi_reduction <maximumf>, %22, %cst_15 [1] : vector<16x16xf32> to vector<16xf32>
    %24 = vector.shape_cast %23 : vector<16xf32> to vector<16x1xf32>
    %25 = vector.broadcast %24 : vector<16x1xf32> to vector<16x16xf32>
    %26 = arith.subf %22, %25 : vector<16x16xf32>
    %27 = math.exp %26 : vector<16x16xf32>
    %cst_16 = arith.constant dense<0.000000e+00> : vector<16xf32>
    %28 = vector.multi_reduction <add>, %27, %cst_16 [1] : vector<16x16xf32> to vector<16xf32>
    %29 = vector.shape_cast %28 : vector<16xf32> to vector<16x1xf32>
    %30 = vector.broadcast %29 : vector<16x1xf32> to vector<16x16xf32>
    %31 = arith.divf %27, %30 : vector<16x16xf32>
    %cst_17 = arith.constant dense<0.000000e+00> : vector<16x8xf32>
    %32 = tpu.matmul %31, %20, %cst_17 {dimension_numbers = #tpu.dot_dimension_numbers<[1], [0], [0], [1], [0, 0, 1, 1], [], []>} : vector<16x16xf32>, vector<16x8xf32>, vector<16x8xf32> -> vector<16x8xf32>
    %33 = vector.extract_strided_slice %17 {offsets = [0, 8], sizes = [16, 8], strides = [1, 1]} : vector<16x96xf32> to vector<16x8xf32>
    %34 = vector.extract_strided_slice %17 {offsets = [0, 40], sizes = [16, 8], strides = [1, 1]} : vector<16x96xf32> to vector<16x8xf32>
    %35 = vector.extract_strided_slice %17 {offsets = [0, 72], sizes = [16, 8], strides = [1, 1]} : vector<16x96xf32> to vector<16x8xf32>
    %cst_18 = arith.constant dense<0.000000e+00> : vector<16x16xf32>
    %36 = tpu.matmul %33, %34, %cst_18 {dimension_numbers = #tpu.dot_dimension_numbers<[1], [1], [0], [0], [0, 0, 1, 0], [], []>} : vector<16x8xf32>, vector<16x8xf32>, vector<16x16xf32> -> vector<16x16xf32>
    %37 = arith.addf %36, %3 : vector<16x16xf32>
    %cst_19 = arith.constant dense<0xFF800000> : vector<16xf32>
    %38 = vector.multi_reduction <maximumf>, %37, %cst_19 [1] : vector<16x16xf32> to vector<16xf32>
    %39 = vector.shape_cast %38 : vector<16xf32> to vector<16x1xf32>
    %40 = vector.broadcast %39 : vector<16x1xf32> to vector<16x16xf32>
    %41 = arith.subf %37, %40 : vector<16x16xf32>
    %42 = math.exp %41 : vector<16x16xf32>
    %cst_20 = arith.constant dense<0.000000e+00> : vector<16xf32>
    %43 = vector.multi_reduction <add>, %42, %cst_20 [1] : vector<16x16xf32> to vector<16xf32>
    %44 = vector.shape_cast %43 : vector<16xf32> to vector<16x1xf32>
    %45 = vector.broadcast %44 : vector<16x1xf32> to vector<16x16xf32>
    %46 = arith.divf %42, %45 : vector<16x16xf32>
    %cst_21 = arith.constant dense<0.000000e+00> : vector<16x8xf32>
    %47 = tpu.matmul %46, %35, %cst_21 {dimension_numbers = #tpu.dot_dimension_numbers<[1], [0], [0], [1], [0, 0, 1, 1], [], []>} : vector<16x16xf32>, vector<16x8xf32>, vector<16x8xf32> -> vector<16x8xf32>
    %48 = vector.extract_strided_slice %17 {offsets = [0, 16], sizes = [16, 8], strides = [1, 1]} : vector<16x96xf32> to vector<16x8xf32>
    %49 = vector.extract_strided_slice %17 {offsets = [0, 48], sizes = [16, 8], strides = [1, 1]} : vector<16x96xf32> to vector<16x8xf32>
    %50 = vector.extract_strided_slice %17 {offsets = [0, 80], sizes = [16, 8], strides = [1, 1]} : vector<16x96xf32> to vector<16x8xf32>
    %cst_22 = arith.constant dense<0.000000e+00> : vector<16x16xf32>
    %51 = tpu.matmul %48, %49, %cst_22 {dimension_numbers = #tpu.dot_dimension_numbers<[1], [1], [0], [0], [0, 0, 1, 0], [], []>} : vector<16x8xf32>, vector<16x8xf32>, vector<16x16xf32> -> vector<16x16xf32>
    %52 = arith.addf %51, %3 : vector<16x16xf32>
    %cst_23 = arith.constant dense<0xFF800000> : vector<16xf32>
    %53 = vector.multi_reduction <maximumf>, %52, %cst_23 [1] : vector<16x16xf32> to vector<16xf32>
    %54 = vector.shape_cast %53 : vector<16xf32> to vector<16x1xf32>
    %55 = vector.broadcast %54 : vector<16x1xf32> to vector<16x16xf32>
    %56 = arith.subf %52, %55 : vector<16x16xf32>
    %57 = math.exp %56 : vector<16x16xf32>
    %cst_24 = arith.constant dense<0.000000e+00> : vector<16xf32>
    %58 = vector.multi_reduction <add>, %57, %cst_24 [1] : vector<16x16xf32> to vector<16xf32>
    %59 = vector.shape_cast %58 : vector<16xf32> to vector<16x1xf32>
    %60 = vector.broadcast %59 : vector<16x1xf32> to vector<16x16xf32>
    %61 = arith.divf %57, %60 : vector<16x16xf32>
    %cst_25 = arith.constant dense<0.000000e+00> : vector<16x8xf32>
    %62 = tpu.matmul %61, %50, %cst_25 {dimension_numbers = #tpu.dot_dimension_numbers<[1], [0], [0], [1], [0, 0, 1, 1], [], []>} : vector<16x16xf32>, vector<16x8xf32>, vector<16x8xf32> -> vector<16x8xf32>
    %63 = vector.extract_strided_slice %17 {offsets = [0, 24], sizes = [16, 8], strides = [1, 1]} : vector<16x96xf32> to vector<16x8xf32>
    %64 = vector.extract_strided_slice %17 {offsets = [0, 56], sizes = [16, 8], strides = [1, 1]} : vector<16x96xf32> to vector<16x8xf32>
    %65 = vector.extract_strided_slice %17 {offsets = [0, 88], sizes = [16, 8], strides = [1, 1]} : vector<16x96xf32> to vector<16x8xf32>
    %cst_26 = arith.constant dense<0.000000e+00> : vector<16x16xf32>
    %66 = tpu.matmul %63, %64, %cst_26 {dimension_numbers = #tpu.dot_dimension_numbers<[1], [1], [0], [0], [0, 0, 1, 0], [], []>} : vector<16x8xf32>, vector<16x8xf32>, vector<16x16xf32> -> vector<16x16xf32>
    %67 = arith.addf %66, %3 : vector<16x16xf32>
    %cst_27 = arith.constant dense<0xFF800000> : vector<16xf32>
    %68 = vector.multi_reduction <maximumf>, %67, %cst_27 [1] : vector<16x16xf32> to vector<16xf32>
    %69 = vector.shape_cast %68 : vector<16xf32> to vector<16x1xf32>
    %70 = vector.broadcast %69 : vector<16x1xf32> to vector<16x16xf32>
    %71 = arith.subf %67, %70 : vector<16x16xf32>
    %72 = math.exp %71 : vector<16x16xf32>
    %cst_28 = arith.constant dense<0.000000e+00> : vector<16xf32>
    %73 = vector.multi_reduction <add>, %72, %cst_28 [1] : vector<16x16xf32> to vector<16xf32>
    %74 = vector.shape_cast %73 : vector<16xf32> to vector<16x1xf32>
    %75 = vector.broadcast %74 : vector<16x1xf32> to vector<16x16xf32>
    %76 = arith.divf %72, %75 : vector<16x16xf32>
    %cst_29 = arith.constant dense<0.000000e+00> : vector<16x8xf32>
    %77 = tpu.matmul %76, %65, %cst_29 {dimension_numbers = #tpu.dot_dimension_numbers<[1], [0], [0], [1], [0, 0, 1, 1], [], []>} : vector<16x16xf32>, vector<16x8xf32>, vector<16x8xf32> -> vector<16x8xf32>
    %78 = tpu.concatenate %32, %47, %62, %77 in 1 : vector<16x8xf32>, vector<16x8xf32>, vector<16x8xf32>, vector<16x8xf32> -> vector<16x32xf32>
    %c0_30 = arith.constant 0 : index
    %c0_31 = arith.constant 0 : index
    %c0_32 = arith.constant 0 : index
    %79 = vector.load %arg6[%c0_30, %c0_31, %c0_32] : memref<2x32x32xf32, #tpu.memory_space<vmem>>, vector<1x32x32xf32>
    %80 = vector.shape_cast %79 : vector<1x32x32xf32> to vector<32x32xf32>
    %cst_33 = arith.constant dense<0.000000e+00> : vector<16x32xf32>
    %81 = tpu.matmul %78, %80, %cst_33 {dimension_numbers = #tpu.dot_dimension_numbers<[1], [0], [0], [1], [0, 0, 1, 1], [], []>} : vector<16x32xf32>, vector<32x32xf32>, vector<16x32xf32> -> vector<16x32xf32>
    %82 = vector.broadcast %7 : vector<1x32xf32> to vector<16x32xf32>
    %83 = arith.addf %81, %82 : vector<16x32xf32>
    %84 = arith.addf %83, %14 : vector<16x32xf32>
    %cst_34 = arith.constant dense<0.000000e+00> : vector<16xf32>
    %85 = vector.multi_reduction <add>, %84, %cst_34 [1] : vector<16x32xf32> to vector<16xf32>
    %86 = vector.shape_cast %85 : vector<16xf32> to vector<16x1xf32>
    %cst_35 = arith.constant 3.200000e+01 : f32
    %87 = vector.broadcast %cst_35 : f32 to vector<16x1xf32>
    %88 = arith.divf %86, %87 : vector<16x1xf32>
    %89 = vector.broadcast %88 : vector<16x1xf32> to vector<16x32xf32>
    %90 = arith.subf %84, %89 : vector<16x32xf32>
    %91 = arith.mulf %90, %90 : vector<16x32xf32>
    %cst_36 = arith.constant dense<0.000000e+00> : vector<16xf32>
    %92 = vector.multi_reduction <add>, %91, %cst_36 [1] : vector<16x32xf32> to vector<16xf32>
    %93 = vector.shape_cast %92 : vector<16xf32> to vector<16x1xf32>
    %cst_37 = arith.constant 3.200000e+01 : f32
    %94 = vector.broadcast %cst_37 : f32 to vector<16x1xf32>
    %95 = arith.divf %93, %94 : vector<16x1xf32>
    %96 = vector.broadcast %88 : vector<16x1xf32> to vector<16x32xf32>
    %97 = arith.subf %84, %96 : vector<16x32xf32>
    %cst_38 = arith.constant 9.99999997E-7 : f32
    %98 = vector.broadcast %cst_38 : f32 to vector<16x1xf32>
    %99 = arith.addf %95, %98 : vector<16x1xf32>
    %100 = math.rsqrt %99 : vector<16x1xf32>
    %101 = vector.broadcast %100 : vector<16x1xf32> to vector<16x32xf32>
    %102 = arith.mulf %97, %101 : vector<16x32xf32>
    %103 = vector.broadcast %8 : vector<1x32xf32> to vector<16x32xf32>
    %104 = arith.mulf %102, %103 : vector<16x32xf32>
    %105 = vector.broadcast %9 : vector<1x32xf32> to vector<16x32xf32>
    %106 = arith.addf %104, %105 : vector<16x32xf32>
    %107 = vector.broadcast %1 : vector<16x1xf32> to vector<16x32xf32>
    %108 = arith.mulf %106, %107 : vector<16x32xf32>
    %c0_39 = arith.constant 0 : index
    %c0_40 = arith.constant 0 : index
    %c0_41 = arith.constant 0 : index
    %109 = vector.load %arg7[%c0_39, %c0_40, %c0_41] : memref<4x32x32xf32, #tpu.memory_space<vmem>>, vector<1x32x32xf32>
    %110 = vector.shape_cast %109 : vector<1x32x32xf32> to vector<32x32xf32>
    %cst_42 = arith.constant dense<0.000000e+00> : vector<16x32xf32>
    %111 = tpu.matmul %108, %110, %cst_42 {dimension_numbers = #tpu.dot_dimension_numbers<[1], [0], [0], [1], [0, 0, 1, 1], [], []>} : vector<16x32xf32>, vector<32x32xf32>, vector<16x32xf32> -> vector<16x32xf32>
    %112 = vector.broadcast %10 : vector<1x32xf32> to vector<16x32xf32>
    %113 = arith.addf %111, %112 : vector<16x32xf32>
    %cst_43 = arith.constant 5.000000e-01 : f32
    %114 = vector.broadcast %cst_43 : f32 to vector<16x32xf32>
    %115 = arith.mulf %114, %113 : vector<16x32xf32>
    %cst_44 = arith.constant 0.707106769 : f32
    %116 = vector.broadcast %cst_44 : f32 to vector<16x32xf32>
    %117 = arith.mulf %113, %116 : vector<16x32xf32>
    %cst_45 = arith.constant 0.000000e+00 : f32
    %118 = vector.broadcast %cst_45 : f32 to vector<16x32xf32>
    %119 = arith.cmpf oge, %117, %118 : vector<16x32xf32>
    %cst_46 = arith.constant 1.000000e+00 : f32
    %cst_47 = arith.constant -1.000000e+00 : f32
    %120 = vector.broadcast %cst_46 : f32 to vector<16x32xf32>
    %121 = vector.broadcast %cst_47 : f32 to vector<16x32xf32>
    %122 = arith.select %119, %120, %121 : vector<16x32xi1>, vector<16x32xf32>
    %123 = math.absf %117 : vector<16x32xf32>
    %cst_48 = arith.constant 0.327591091 : f32
    %124 = vector.broadcast %cst_48 : f32 to vector<16x32xf32>
    %125 = arith.mulf %124, %123 : vector<16x32xf32>
    %cst_49 = arith.constant 1.000000e+00 : f32
    %126 = vector.broadcast %cst_49 : f32 to vector<16x32xf32>
    %127 = arith.addf %126, %125 : vector<16x32xf32>
    %cst_50 = arith.constant 1.000000e+00 : f32
    %128 = vector.broadcast %cst_50 : f32 to vector<16x32xf32>
    %129 = arith.divf %128, %127 : vector<16x32xf32>
    %cst_51 = arith.constant 1.06140542 : f32
    %130 = vector.broadcast %cst_51 : f32 to vector<16x32xf32>
    %131 = arith.mulf %130, %129 : vector<16x32xf32>
    %cst_52 = arith.constant -1.45315206 : f32
    %132 = vector.broadcast %cst_52 : f32 to vector<16x32xf32>
    %133 = arith.addf %131, %132 : vector<16x32xf32>
    %134 = arith.mulf %133, %129 : vector<16x32xf32>
    %cst_53 = arith.constant 1.42141378 : f32
    %135 = vector.broadcast %cst_53 : f32 to vector<16x32xf32>
    %136 = arith.addf %134, %135 : vector<16x32xf32>
    %137 = arith.mulf %136, %129 : vector<16x32xf32>
    %cst_54 = arith.constant -0.284496725 : f32
    %138 = vector.broadcast %cst_54 : f32 to vector<16x32xf32>
    %139 = arith.addf %137, %138 : vector<16x32xf32>
    %140 = arith.mulf %139, %129 : vector<16x32xf32>
    %cst_55 = arith.constant 0.254829586 : f32
    %141 = vector.broadcast %cst_55 : f32 to vector<16x32xf32>
    %142 = arith.addf %140, %141 : vector<16x32xf32>
    %143 = arith.mulf %142, %129 : vector<16x32xf32>
    %cst_56 = arith.constant 0.000000e+00 : f32
    %144 = vector.broadcast %cst_56 : f32 to vector<16x32xf32>
    %145 = arith.subf %144, %123 : vector<16x32xf32>
    %146 = arith.mulf %145, %123 : vector<16x32xf32>
    %147 = math.exp %146 : vector<16x32xf32>
    %148 = arith.mulf %143, %147 : vector<16x32xf32>
    %cst_57 = arith.constant 1.000000e+00 : f32
    %149 = vector.broadcast %cst_57 : f32 to vector<16x32xf32>
    %150 = arith.subf %149, %148 : vector<16x32xf32>
    %151 = arith.mulf %122, %150 : vector<16x32xf32>
    %cst_58 = arith.constant 1.000000e+00 : f32
    %152 = vector.broadcast %cst_58 : f32 to vector<16x32xf32>
    %153 = arith.addf %152, %151 : vector<16x32xf32>
    %154 = arith.mulf %115, %153 : vector<16x32xf32>
    %c1 = arith.constant 1 : index
    %c0_59 = arith.constant 0 : index
    %c0_60 = arith.constant 0 : index
    %155 = vector.load %arg7[%c1, %c0_59, %c0_60] : memref<4x32x32xf32, #tpu.memory_space<vmem>>, vector<1x32x32xf32>
    %156 = vector.shape_cast %155 : vector<1x32x32xf32> to vector<32x32xf32>
    %cst_61 = arith.constant dense<0.000000e+00> : vector<16x32xf32>
    %157 = tpu.matmul %154, %156, %cst_61 {dimension_numbers = #tpu.dot_dimension_numbers<[1], [0], [0], [1], [0, 0, 1, 1], [], []>} : vector<16x32xf32>, vector<32x32xf32>, vector<16x32xf32> -> vector<16x32xf32>
    %158 = vector.broadcast %11 : vector<1x32xf32> to vector<16x32xf32>
    %159 = arith.addf %157, %158 : vector<16x32xf32>
    %160 = arith.addf %159, %108 : vector<16x32xf32>
    %cst_62 = arith.constant dense<0.000000e+00> : vector<16xf32>
    %161 = vector.multi_reduction <add>, %160, %cst_62 [1] : vector<16x32xf32> to vector<16xf32>
    %162 = vector.shape_cast %161 : vector<16xf32> to vector<16x1xf32>
    %cst_63 = arith.constant 3.200000e+01 : f32
    %163 = vector.broadcast %cst_63 : f32 to vector<16x1xf32>
    %164 = arith.divf %162, %163 : vector<16x1xf32>
    %165 = vector.broadcast %164 : vector<16x1xf32> to vector<16x32xf32>
    %166 = arith.subf %160, %165 : vector<16x32xf32>
    %167 = arith.mulf %166, %166 : vector<16x32xf32>
    %cst_64 = arith.constant dense<0.000000e+00> : vector<16xf32>
    %168 = vector.multi_reduction <add>, %167, %cst_64 [1] : vector<16x32xf32> to vector<16xf32>
    %169 = vector.shape_cast %168 : vector<16xf32> to vector<16x1xf32>
    %cst_65 = arith.constant 3.200000e+01 : f32
    %170 = vector.broadcast %cst_65 : f32 to vector<16x1xf32>
    %171 = arith.divf %169, %170 : vector<16x1xf32>
    %172 = vector.broadcast %164 : vector<16x1xf32> to vector<16x32xf32>
    %173 = arith.subf %160, %172 : vector<16x32xf32>
    %cst_66 = arith.constant 9.99999997E-7 : f32
    %174 = vector.broadcast %cst_66 : f32 to vector<16x1xf32>
    %175 = arith.addf %171, %174 : vector<16x1xf32>
    %176 = math.rsqrt %175 : vector<16x1xf32>
    %177 = vector.broadcast %176 : vector<16x1xf32> to vector<16x32xf32>
    %178 = arith.mulf %173, %177 : vector<16x32xf32>
    %179 = vector.broadcast %12 : vector<1x32xf32> to vector<16x32xf32>
    %180 = arith.mulf %178, %179 : vector<16x32xf32>
    %181 = vector.broadcast %13 : vector<1x32xf32> to vector<16x32xf32>
    %182 = arith.addf %180, %181 : vector<16x32xf32>
    %183 = vector.broadcast %1 : vector<16x1xf32> to vector<16x32xf32>
    %184 = arith.mulf %182, %183 : vector<16x32xf32>
    %c1_67 = arith.constant 1 : index
    %c0_68 = arith.constant 0 : index
    %c0_69 = arith.constant 0 : index
    %185 = vector.load %arg8[%c1_67, %c0_68, %c0_69] : memref<2x7x32xf32, #tpu.memory_space<vmem>>, vector<1x7x32xf32>
    %186 = vector.shape_cast %185 : vector<1x7x32xf32> to vector<7x32xf32>
    %187 = vector.extract_strided_slice %186 {offsets = [0, 0], sizes = [1, 32], strides = [1, 1]} : vector<7x32xf32> to vector<1x32xf32>
    %188 = vector.extract_strided_slice %186 {offsets = [1, 0], sizes = [1, 32], strides = [1, 1]} : vector<7x32xf32> to vector<1x32xf32>
    %189 = vector.extract_strided_slice %186 {offsets = [2, 0], sizes = [1, 32], strides = [1, 1]} : vector<7x32xf32> to vector<1x32xf32>
    %190 = vector.extract_strided_slice %186 {offsets = [3, 0], sizes = [1, 32], strides = [1, 1]} : vector<7x32xf32> to vector<1x32xf32>
    %191 = vector.extract_strided_slice %186 {offsets = [4, 0], sizes = [1, 32], strides = [1, 1]} : vector<7x32xf32> to vector<1x32xf32>
    %192 = vector.extract_strided_slice %186 {offsets = [5, 0], sizes = [1, 32], strides = [1, 1]} : vector<7x32xf32> to vector<1x32xf32>
    %193 = vector.extract_strided_slice %186 {offsets = [6, 0], sizes = [1, 32], strides = [1, 1]} : vector<7x32xf32> to vector<1x32xf32>
    %194 = arith.addf %184, %0 : vector<16x32xf32>
    %c1_70 = arith.constant 1 : index
    %c0_71 = arith.constant 0 : index
    %c0_72 = arith.constant 0 : index
    %195 = vector.load %arg5[%c1_70, %c0_71, %c0_72] : memref<2x32x96xf32, #tpu.memory_space<vmem>>, vector<1x32x96xf32>
    %196 = vector.shape_cast %195 : vector<1x32x96xf32> to vector<32x96xf32>
    %cst_73 = arith.constant dense<0.000000e+00> : vector<16x96xf32>
    %197 = tpu.matmul %194, %196, %cst_73 {dimension_numbers = #tpu.dot_dimension_numbers<[1], [0], [0], [1], [0, 0, 1, 1], [], []>} : vector<16x32xf32>, vector<32x96xf32>, vector<16x96xf32> -> vector<16x96xf32>
    %198 = vector.extract_strided_slice %197 {offsets = [0, 0], sizes = [16, 8], strides = [1, 1]} : vector<16x96xf32> to vector<16x8xf32>
    %199 = vector.extract_strided_slice %197 {offsets = [0, 32], sizes = [16, 8], strides = [1, 1]} : vector<16x96xf32> to vector<16x8xf32>
    %200 = vector.extract_strided_slice %197 {offsets = [0, 64], sizes = [16, 8], strides = [1, 1]} : vector<16x96xf32> to vector<16x8xf32>
    %cst_74 = arith.constant dense<0.000000e+00> : vector<16x16xf32>
    %201 = tpu.matmul %198, %199, %cst_74 {dimension_numbers = #tpu.dot_dimension_numbers<[1], [1], [0], [0], [0, 0, 1, 0], [], []>} : vector<16x8xf32>, vector<16x8xf32>, vector<16x16xf32> -> vector<16x16xf32>
    %202 = arith.addf %201, %3 : vector<16x16xf32>
    %cst_75 = arith.constant dense<0xFF800000> : vector<16xf32>
    %203 = vector.multi_reduction <maximumf>, %202, %cst_75 [1] : vector<16x16xf32> to vector<16xf32>
    %204 = vector.shape_cast %203 : vector<16xf32> to vector<16x1xf32>
    %205 = vector.broadcast %204 : vector<16x1xf32> to vector<16x16xf32>
    %206 = arith.subf %202, %205 : vector<16x16xf32>
    %207 = math.exp %206 : vector<16x16xf32>
    %cst_76 = arith.constant dense<0.000000e+00> : vector<16xf32>
    %208 = vector.multi_reduction <add>, %207, %cst_76 [1] : vector<16x16xf32> to vector<16xf32>
    %209 = vector.shape_cast %208 : vector<16xf32> to vector<16x1xf32>
    %210 = vector.broadcast %209 : vector<16x1xf32> to vector<16x16xf32>
    %211 = arith.divf %207, %210 : vector<16x16xf32>
    %cst_77 = arith.constant dense<0.000000e+00> : vector<16x8xf32>
    %212 = tpu.matmul %211, %200, %cst_77 {dimension_numbers = #tpu.dot_dimension_numbers<[1], [0], [0], [1], [0, 0, 1, 1], [], []>} : vector<16x16xf32>, vector<16x8xf32>, vector<16x8xf32> -> vector<16x8xf32>
    %213 = vector.extract_strided_slice %197 {offsets = [0, 8], sizes = [16, 8], strides = [1, 1]} : vector<16x96xf32> to vector<16x8xf32>
    %214 = vector.extract_strided_slice %197 {offsets = [0, 40], sizes = [16, 8], strides = [1, 1]} : vector<16x96xf32> to vector<16x8xf32>
    %215 = vector.extract_strided_slice %197 {offsets = [0, 72], sizes = [16, 8], strides = [1, 1]} : vector<16x96xf32> to vector<16x8xf32>
    %cst_78 = arith.constant dense<0.000000e+00> : vector<16x16xf32>
    %216 = tpu.matmul %213, %214, %cst_78 {dimension_numbers = #tpu.dot_dimension_numbers<[1], [1], [0], [0], [0, 0, 1, 0], [], []>} : vector<16x8xf32>, vector<16x8xf32>, vector<16x16xf32> -> vector<16x16xf32>
    %217 = arith.addf %216, %3 : vector<16x16xf32>
    %cst_79 = arith.constant dense<0xFF800000> : vector<16xf32>
    %218 = vector.multi_reduction <maximumf>, %217, %cst_79 [1] : vector<16x16xf32> to vector<16xf32>
    %219 = vector.shape_cast %218 : vector<16xf32> to vector<16x1xf32>
    %220 = vector.broadcast %219 : vector<16x1xf32> to vector<16x16xf32>
    %221 = arith.subf %217, %220 : vector<16x16xf32>
    %222 = math.exp %221 : vector<16x16xf32>
    %cst_80 = arith.constant dense<0.000000e+00> : vector<16xf32>
    %223 = vector.multi_reduction <add>, %222, %cst_80 [1] : vector<16x16xf32> to vector<16xf32>
    %224 = vector.shape_cast %223 : vector<16xf32> to vector<16x1xf32>
    %225 = vector.broadcast %224 : vector<16x1xf32> to vector<16x16xf32>
    %226 = arith.divf %222, %225 : vector<16x16xf32>
    %cst_81 = arith.constant dense<0.000000e+00> : vector<16x8xf32>
    %227 = tpu.matmul %226, %215, %cst_81 {dimension_numbers = #tpu.dot_dimension_numbers<[1], [0], [0], [1], [0, 0, 1, 1], [], []>} : vector<16x16xf32>, vector<16x8xf32>, vector<16x8xf32> -> vector<16x8xf32>
    %228 = vector.extract_strided_slice %197 {offsets = [0, 16], sizes = [16, 8], strides = [1, 1]} : vector<16x96xf32> to vector<16x8xf32>
    %229 = vector.extract_strided_slice %197 {offsets = [0, 48], sizes = [16, 8], strides = [1, 1]} : vector<16x96xf32> to vector<16x8xf32>
    %230 = vector.extract_strided_slice %197 {offsets = [0, 80], sizes = [16, 8], strides = [1, 1]} : vector<16x96xf32> to vector<16x8xf32>
    %cst_82 = arith.constant dense<0.000000e+00> : vector<16x16xf32>
    %231 = tpu.matmul %228, %229, %cst_82 {dimension_numbers = #tpu.dot_dimension_numbers<[1], [1], [0], [0], [0, 0, 1, 0], [], []>} : vector<16x8xf32>, vector<16x8xf32>, vector<16x16xf32> -> vector<16x16xf32>
    %232 = arith.addf %231, %3 : vector<16x16xf32>
    %cst_83 = arith.constant dense<0xFF800000> : vector<16xf32>
    %233 = vector.multi_reduction <maximumf>, %232, %cst_83 [1] : vector<16x16xf32> to vector<16xf32>
    %234 = vector.shape_cast %233 : vector<16xf32> to vector<16x1xf32>
    %235 = vector.broadcast %234 : vector<16x1xf32> to vector<16x16xf32>
    %236 = arith.subf %232, %235 : vector<16x16xf32>
    %237 = math.exp %236 : vector<16x16xf32>
    %cst_84 = arith.constant dense<0.000000e+00> : vector<16xf32>
    %238 = vector.multi_reduction <add>, %237, %cst_84 [1] : vector<16x16xf32> to vector<16xf32>
    %239 = vector.shape_cast %238 : vector<16xf32> to vector<16x1xf32>
    %240 = vector.broadcast %239 : vector<16x1xf32> to vector<16x16xf32>
    %241 = arith.divf %237, %240 : vector<16x16xf32>
    %cst_85 = arith.constant dense<0.000000e+00> : vector<16x8xf32>
    %242 = tpu.matmul %241, %230, %cst_85 {dimension_numbers = #tpu.dot_dimension_numbers<[1], [0], [0], [1], [0, 0, 1, 1], [], []>} : vector<16x16xf32>, vector<16x8xf32>, vector<16x8xf32> -> vector<16x8xf32>
    %243 = vector.extract_strided_slice %197 {offsets = [0, 24], sizes = [16, 8], strides = [1, 1]} : vector<16x96xf32> to vector<16x8xf32>
    %244 = vector.extract_strided_slice %197 {offsets = [0, 56], sizes = [16, 8], strides = [1, 1]} : vector<16x96xf32> to vector<16x8xf32>
    %245 = vector.extract_strided_slice %197 {offsets = [0, 88], sizes = [16, 8], strides = [1, 1]} : vector<16x96xf32> to vector<16x8xf32>
    %cst_86 = arith.constant dense<0.000000e+00> : vector<16x16xf32>
    %246 = tpu.matmul %243, %244, %cst_86 {dimension_numbers = #tpu.dot_dimension_numbers<[1], [1], [0], [0], [0, 0, 1, 0], [], []>} : vector<16x8xf32>, vector<16x8xf32>, vector<16x16xf32> -> vector<16x16xf32>
    %247 = arith.addf %246, %3 : vector<16x16xf32>
    %cst_87 = arith.constant dense<0xFF800000> : vector<16xf32>
    %248 = vector.multi_reduction <maximumf>, %247, %cst_87 [1] : vector<16x16xf32> to vector<16xf32>
    %249 = vector.shape_cast %248 : vector<16xf32> to vector<16x1xf32>
    %250 = vector.broadcast %249 : vector<16x1xf32> to vector<16x16xf32>
    %251 = arith.subf %247, %250 : vector<16x16xf32>
    %252 = math.exp %251 : vector<16x16xf32>
    %cst_88 = arith.constant dense<0.000000e+00> : vector<16xf32>
    %253 = vector.multi_reduction <add>, %252, %cst_88 [1] : vector<16x16xf32> to vector<16xf32>
    %254 = vector.shape_cast %253 : vector<16xf32> to vector<16x1xf32>
    %255 = vector.broadcast %254 : vector<16x1xf32> to vector<16x16xf32>
    %256 = arith.divf %252, %255 : vector<16x16xf32>
    %cst_89 = arith.constant dense<0.000000e+00> : vector<16x8xf32>
    %257 = tpu.matmul %256, %245, %cst_89 {dimension_numbers = #tpu.dot_dimension_numbers<[1], [0], [0], [1], [0, 0, 1, 1], [], []>} : vector<16x16xf32>, vector<16x8xf32>, vector<16x8xf32> -> vector<16x8xf32>
    %258 = tpu.concatenate %212, %227, %242, %257 in 1 : vector<16x8xf32>, vector<16x8xf32>, vector<16x8xf32>, vector<16x8xf32> -> vector<16x32xf32>
    %c1_90 = arith.constant 1 : index
    %c0_91 = arith.constant 0 : index
    %c0_92 = arith.constant 0 : index
    %259 = vector.load %arg6[%c1_90, %c0_91, %c0_92] : memref<2x32x32xf32, #tpu.memory_space<vmem>>, vector<1x32x32xf32>
    %260 = vector.shape_cast %259 : vector<1x32x32xf32> to vector<32x32xf32>
    %cst_93 = arith.constant dense<0.000000e+00> : vector<16x32xf32>
    %261 = tpu.matmul %258, %260, %cst_93 {dimension_numbers = #tpu.dot_dimension_numbers<[1], [0], [0], [1], [0, 0, 1, 1], [], []>} : vector<16x32xf32>, vector<32x32xf32>, vector<16x32xf32> -> vector<16x32xf32>
    %262 = vector.broadcast %187 : vector<1x32xf32> to vector<16x32xf32>
    %263 = arith.addf %261, %262 : vector<16x32xf32>
    %264 = arith.addf %263, %194 : vector<16x32xf32>
    %cst_94 = arith.constant dense<0.000000e+00> : vector<16xf32>
    %265 = vector.multi_reduction <add>, %264, %cst_94 [1] : vector<16x32xf32> to vector<16xf32>
    %266 = vector.shape_cast %265 : vector<16xf32> to vector<16x1xf32>
    %cst_95 = arith.constant 3.200000e+01 : f32
    %267 = vector.broadcast %cst_95 : f32 to vector<16x1xf32>
    %268 = arith.divf %266, %267 : vector<16x1xf32>
    %269 = vector.broadcast %268 : vector<16x1xf32> to vector<16x32xf32>
    %270 = arith.subf %264, %269 : vector<16x32xf32>
    %271 = arith.mulf %270, %270 : vector<16x32xf32>
    %cst_96 = arith.constant dense<0.000000e+00> : vector<16xf32>
    %272 = vector.multi_reduction <add>, %271, %cst_96 [1] : vector<16x32xf32> to vector<16xf32>
    %273 = vector.shape_cast %272 : vector<16xf32> to vector<16x1xf32>
    %cst_97 = arith.constant 3.200000e+01 : f32
    %274 = vector.broadcast %cst_97 : f32 to vector<16x1xf32>
    %275 = arith.divf %273, %274 : vector<16x1xf32>
    %276 = vector.broadcast %268 : vector<16x1xf32> to vector<16x32xf32>
    %277 = arith.subf %264, %276 : vector<16x32xf32>
    %cst_98 = arith.constant 9.99999997E-7 : f32
    %278 = vector.broadcast %cst_98 : f32 to vector<16x1xf32>
    %279 = arith.addf %275, %278 : vector<16x1xf32>
    %280 = math.rsqrt %279 : vector<16x1xf32>
    %281 = vector.broadcast %280 : vector<16x1xf32> to vector<16x32xf32>
    %282 = arith.mulf %277, %281 : vector<16x32xf32>
    %283 = vector.broadcast %188 : vector<1x32xf32> to vector<16x32xf32>
    %284 = arith.mulf %282, %283 : vector<16x32xf32>
    %285 = vector.broadcast %189 : vector<1x32xf32> to vector<16x32xf32>
    %286 = arith.addf %284, %285 : vector<16x32xf32>
    %287 = vector.broadcast %1 : vector<16x1xf32> to vector<16x32xf32>
    %288 = arith.mulf %286, %287 : vector<16x32xf32>
    %c2 = arith.constant 2 : index
    %c0_99 = arith.constant 0 : index
    %c0_100 = arith.constant 0 : index
    %289 = vector.load %arg7[%c2, %c0_99, %c0_100] : memref<4x32x32xf32, #tpu.memory_space<vmem>>, vector<1x32x32xf32>
    %290 = vector.shape_cast %289 : vector<1x32x32xf32> to vector<32x32xf32>
    %cst_101 = arith.constant dense<0.000000e+00> : vector<16x32xf32>
    %291 = tpu.matmul %288, %290, %cst_101 {dimension_numbers = #tpu.dot_dimension_numbers<[1], [0], [0], [1], [0, 0, 1, 1], [], []>} : vector<16x32xf32>, vector<32x32xf32>, vector<16x32xf32> -> vector<16x32xf32>
    %292 = vector.broadcast %190 : vector<1x32xf32> to vector<16x32xf32>
    %293 = arith.addf %291, %292 : vector<16x32xf32>
    %cst_102 = arith.constant 5.000000e-01 : f32
    %294 = vector.broadcast %cst_102 : f32 to vector<16x32xf32>
    %295 = arith.mulf %294, %293 : vector<16x32xf32>
    %cst_103 = arith.constant 0.707106769 : f32
    %296 = vector.broadcast %cst_103 : f32 to vector<16x32xf32>
    %297 = arith.mulf %293, %296 : vector<16x32xf32>
    %cst_104 = arith.constant 0.000000e+00 : f32
    %298 = vector.broadcast %cst_104 : f32 to vector<16x32xf32>
    %299 = arith.cmpf oge, %297, %298 : vector<16x32xf32>
    %cst_105 = arith.constant 1.000000e+00 : f32
    %cst_106 = arith.constant -1.000000e+00 : f32
    %300 = vector.broadcast %cst_105 : f32 to vector<16x32xf32>
    %301 = vector.broadcast %cst_106 : f32 to vector<16x32xf32>
    %302 = arith.select %299, %300, %301 : vector<16x32xi1>, vector<16x32xf32>
    %303 = math.absf %297 : vector<16x32xf32>
    %cst_107 = arith.constant 0.327591091 : f32
    %304 = vector.broadcast %cst_107 : f32 to vector<16x32xf32>
    %305 = arith.mulf %304, %303 : vector<16x32xf32>
    %cst_108 = arith.constant 1.000000e+00 : f32
    %306 = vector.broadcast %cst_108 : f32 to vector<16x32xf32>
    %307 = arith.addf %306, %305 : vector<16x32xf32>
    %cst_109 = arith.constant 1.000000e+00 : f32
    %308 = vector.broadcast %cst_109 : f32 to vector<16x32xf32>
    %309 = arith.divf %308, %307 : vector<16x32xf32>
    %cst_110 = arith.constant 1.06140542 : f32
    %310 = vector.broadcast %cst_110 : f32 to vector<16x32xf32>
    %311 = arith.mulf %310, %309 : vector<16x32xf32>
    %cst_111 = arith.constant -1.45315206 : f32
    %312 = vector.broadcast %cst_111 : f32 to vector<16x32xf32>
    %313 = arith.addf %311, %312 : vector<16x32xf32>
    %314 = arith.mulf %313, %309 : vector<16x32xf32>
    %cst_112 = arith.constant 1.42141378 : f32
    %315 = vector.broadcast %cst_112 : f32 to vector<16x32xf32>
    %316 = arith.addf %314, %315 : vector<16x32xf32>
    %317 = arith.mulf %316, %309 : vector<16x32xf32>
    %cst_113 = arith.constant -0.284496725 : f32
    %318 = vector.broadcast %cst_113 : f32 to vector<16x32xf32>
    %319 = arith.addf %317, %318 : vector<16x32xf32>
    %320 = arith.mulf %319, %309 : vector<16x32xf32>
    %cst_114 = arith.constant 0.254829586 : f32
    %321 = vector.broadcast %cst_114 : f32 to vector<16x32xf32>
    %322 = arith.addf %320, %321 : vector<16x32xf32>
    %323 = arith.mulf %322, %309 : vector<16x32xf32>
    %cst_115 = arith.constant 0.000000e+00 : f32
    %324 = vector.broadcast %cst_115 : f32 to vector<16x32xf32>
    %325 = arith.subf %324, %303 : vector<16x32xf32>
    %326 = arith.mulf %325, %303 : vector<16x32xf32>
    %327 = math.exp %326 : vector<16x32xf32>
    %328 = arith.mulf %323, %327 : vector<16x32xf32>
    %cst_116 = arith.constant 1.000000e+00 : f32
    %329 = vector.broadcast %cst_116 : f32 to vector<16x32xf32>
    %330 = arith.subf %329, %328 : vector<16x32xf32>
    %331 = arith.mulf %302, %330 : vector<16x32xf32>
    %cst_117 = arith.constant 1.000000e+00 : f32
    %332 = vector.broadcast %cst_117 : f32 to vector<16x32xf32>
    %333 = arith.addf %332, %331 : vector<16x32xf32>
    %334 = arith.mulf %295, %333 : vector<16x32xf32>
    %c3 = arith.constant 3 : index
    %c0_118 = arith.constant 0 : index
    %c0_119 = arith.constant 0 : index
    %335 = vector.load %arg7[%c3, %c0_118, %c0_119] : memref<4x32x32xf32, #tpu.memory_space<vmem>>, vector<1x32x32xf32>
    %336 = vector.shape_cast %335 : vector<1x32x32xf32> to vector<32x32xf32>
    %cst_120 = arith.constant dense<0.000000e+00> : vector<16x32xf32>
    %337 = tpu.matmul %334, %336, %cst_120 {dimension_numbers = #tpu.dot_dimension_numbers<[1], [0], [0], [1], [0, 0, 1, 1], [], []>} : vector<16x32xf32>, vector<32x32xf32>, vector<16x32xf32> -> vector<16x32xf32>
    %338 = vector.broadcast %191 : vector<1x32xf32> to vector<16x32xf32>
    %339 = arith.addf %337, %338 : vector<16x32xf32>
    %340 = arith.addf %339, %288 : vector<16x32xf32>
    %cst_121 = arith.constant dense<0.000000e+00> : vector<16xf32>
    %341 = vector.multi_reduction <add>, %340, %cst_121 [1] : vector<16x32xf32> to vector<16xf32>
    %342 = vector.shape_cast %341 : vector<16xf32> to vector<16x1xf32>
    %cst_122 = arith.constant 3.200000e+01 : f32
    %343 = vector.broadcast %cst_122 : f32 to vector<16x1xf32>
    %344 = arith.divf %342, %343 : vector<16x1xf32>
    %345 = vector.broadcast %344 : vector<16x1xf32> to vector<16x32xf32>
    %346 = arith.subf %340, %345 : vector<16x32xf32>
    %347 = arith.mulf %346, %346 : vector<16x32xf32>
    %cst_123 = arith.constant dense<0.000000e+00> : vector<16xf32>
    %348 = vector.multi_reduction <add>, %347, %cst_123 [1] : vector<16x32xf32> to vector<16xf32>
    %349 = vector.shape_cast %348 : vector<16xf32> to vector<16x1xf32>
    %cst_124 = arith.constant 3.200000e+01 : f32
    %350 = vector.broadcast %cst_124 : f32 to vector<16x1xf32>
    %351 = arith.divf %349, %350 : vector<16x1xf32>
    %352 = vector.broadcast %344 : vector<16x1xf32> to vector<16x32xf32>
    %353 = arith.subf %340, %352 : vector<16x32xf32>
    %cst_125 = arith.constant 9.99999997E-7 : f32
    %354 = vector.broadcast %cst_125 : f32 to vector<16x1xf32>
    %355 = arith.addf %351, %354 : vector<16x1xf32>
    %356 = math.rsqrt %355 : vector<16x1xf32>
    %357 = vector.broadcast %356 : vector<16x1xf32> to vector<16x32xf32>
    %358 = arith.mulf %353, %357 : vector<16x32xf32>
    %359 = vector.broadcast %192 : vector<1x32xf32> to vector<16x32xf32>
    %360 = arith.mulf %358, %359 : vector<16x32xf32>
    %361 = vector.broadcast %193 : vector<1x32xf32> to vector<16x32xf32>
    %362 = arith.addf %360, %361 : vector<16x32xf32>
    %363 = vector.broadcast %1 : vector<16x1xf32> to vector<16x32xf32>
    %364 = arith.mulf %362, %363 : vector<16x32xf32>
    %c0_126 = arith.constant 0 : index
    %c0_127 = arith.constant 0 : index
    %365 = vector.load %arg10[%c0_126, %c0_127] : memref<7x32xf32, #tpu.memory_space<vmem>>, vector<7x32xf32>
    %366 = vector.extract_strided_slice %365 {offsets = [0, 0], sizes = [1, 32], strides = [1, 1]} : vector<7x32xf32> to vector<1x32xf32>
    %367 = vector.extract_strided_slice %365 {offsets = [1, 0], sizes = [1, 32], strides = [1, 1]} : vector<7x32xf32> to vector<1x32xf32>
    %368 = vector.extract_strided_slice %365 {offsets = [2, 0], sizes = [1, 32], strides = [1, 1]} : vector<7x32xf32> to vector<1x32xf32>
    %369 = vector.extract_strided_slice %365 {offsets = [3, 0], sizes = [1, 32], strides = [1, 1]} : vector<7x32xf32> to vector<1x32xf32>
    %370 = vector.extract_strided_slice %365 {offsets = [4, 0], sizes = [1, 32], strides = [1, 1]} : vector<7x32xf32> to vector<1x32xf32>
    %371 = vector.extract_strided_slice %365 {offsets = [5, 0], sizes = [1, 32], strides = [1, 1]} : vector<7x32xf32> to vector<1x32xf32>
    %372 = vector.extract_strided_slice %365 {offsets = [6, 0], sizes = [1, 11], strides = [1, 1]} : vector<7x32xf32> to vector<1x11xf32>
    %c0_128 = arith.constant 0 : index
    %c0_129 = arith.constant 0 : index
    %c0_130 = arith.constant 0 : index
    %373 = vector.load %arg9[%c0_128, %c0_129, %c0_130] : memref<2x32x32xf32, #tpu.memory_space<vmem>>, vector<1x32x32xf32>
    %374 = vector.shape_cast %373 : vector<1x32x32xf32> to vector<32x32xf32>
    %cst_131 = arith.constant dense<0.000000e+00> : vector<16x32xf32>
    %375 = tpu.matmul %364, %374, %cst_131 {dimension_numbers = #tpu.dot_dimension_numbers<[1], [0], [0], [1], [0, 0, 1, 1], [], []>} : vector<16x32xf32>, vector<32x32xf32>, vector<16x32xf32> -> vector<16x32xf32>
    %376 = vector.broadcast %366 : vector<1x32xf32> to vector<16x32xf32>
    %377 = arith.addf %375, %376 : vector<16x32xf32>
    %cst_132 = arith.constant 0.000000e+00 : f32
    %cst_133 = arith.constant 6.000000e+00 : f32
    %378 = vector.broadcast %cst_132 : f32 to vector<16x32xf32>
    %379 = arith.maximumf %378, %377 : vector<16x32xf32>
    %380 = vector.broadcast %cst_133 : f32 to vector<16x32xf32>
    %381 = arith.minimumf %380, %379 : vector<16x32xf32>
    %cst_134 = arith.constant dense<0.000000e+00> : vector<16xf32>
    %382 = vector.multi_reduction <add>, %381, %cst_134 [1] : vector<16x32xf32> to vector<16xf32>
    %383 = vector.shape_cast %382 : vector<16xf32> to vector<16x1xf32>
    %cst_135 = arith.constant 3.200000e+01 : f32
    %384 = vector.broadcast %cst_135 : f32 to vector<16x1xf32>
    %385 = arith.divf %383, %384 : vector<16x1xf32>
    %386 = vector.broadcast %385 : vector<16x1xf32> to vector<16x32xf32>
    %387 = arith.subf %381, %386 : vector<16x32xf32>
    %388 = arith.mulf %387, %387 : vector<16x32xf32>
    %cst_136 = arith.constant dense<0.000000e+00> : vector<16xf32>
    %389 = vector.multi_reduction <add>, %388, %cst_136 [1] : vector<16x32xf32> to vector<16xf32>
    %390 = vector.shape_cast %389 : vector<16xf32> to vector<16x1xf32>
    %cst_137 = arith.constant 3.200000e+01 : f32
    %391 = vector.broadcast %cst_137 : f32 to vector<16x1xf32>
    %392 = arith.divf %390, %391 : vector<16x1xf32>
    %393 = vector.broadcast %385 : vector<16x1xf32> to vector<16x32xf32>
    %394 = arith.subf %381, %393 : vector<16x32xf32>
    %cst_138 = arith.constant 9.99999974E-6 : f32
    %395 = vector.broadcast %cst_138 : f32 to vector<16x1xf32>
    %396 = arith.addf %392, %395 : vector<16x1xf32>
    %397 = math.rsqrt %396 : vector<16x1xf32>
    %398 = vector.broadcast %397 : vector<16x1xf32> to vector<16x32xf32>
    %399 = arith.mulf %394, %398 : vector<16x32xf32>
    %400 = vector.broadcast %367 : vector<1x32xf32> to vector<16x32xf32>
    %401 = arith.mulf %399, %400 : vector<16x32xf32>
    %402 = vector.broadcast %368 : vector<1x32xf32> to vector<16x32xf32>
    %403 = arith.addf %401, %402 : vector<16x32xf32>
    %c1_139 = arith.constant 1 : index
    %c0_140 = arith.constant 0 : index
    %c0_141 = arith.constant 0 : index
    %404 = vector.load %arg9[%c1_139, %c0_140, %c0_141] : memref<2x32x32xf32, #tpu.memory_space<vmem>>, vector<1x32x32xf32>
    %405 = vector.shape_cast %404 : vector<1x32x32xf32> to vector<32x32xf32>
    %cst_142 = arith.constant dense<0.000000e+00> : vector<16x32xf32>
    %406 = tpu.matmul %364, %405, %cst_142 {dimension_numbers = #tpu.dot_dimension_numbers<[1], [0], [0], [1], [0, 0, 1, 1], [], []>} : vector<16x32xf32>, vector<32x32xf32>, vector<16x32xf32> -> vector<16x32xf32>
    %407 = vector.broadcast %369 : vector<1x32xf32> to vector<16x32xf32>
    %408 = arith.addf %406, %407 : vector<16x32xf32>
    %cst_143 = arith.constant 0.000000e+00 : f32
    %cst_144 = arith.constant 6.000000e+00 : f32
    %409 = vector.broadcast %cst_143 : f32 to vector<16x32xf32>
    %410 = arith.maximumf %409, %408 : vector<16x32xf32>
    %411 = vector.broadcast %cst_144 : f32 to vector<16x32xf32>
    %412 = arith.minimumf %411, %410 : vector<16x32xf32>
    %cst_145 = arith.constant dense<0.000000e+00> : vector<16xf32>
    %413 = vector.multi_reduction <add>, %412, %cst_145 [1] : vector<16x32xf32> to vector<16xf32>
    %414 = vector.shape_cast %413 : vector<16xf32> to vector<16x1xf32>
    %cst_146 = arith.constant 3.200000e+01 : f32
    %415 = vector.broadcast %cst_146 : f32 to vector<16x1xf32>
    %416 = arith.divf %414, %415 : vector<16x1xf32>
    %417 = vector.broadcast %416 : vector<16x1xf32> to vector<16x32xf32>
    %418 = arith.subf %412, %417 : vector<16x32xf32>
    %419 = arith.mulf %418, %418 : vector<16x32xf32>
    %cst_147 = arith.constant dense<0.000000e+00> : vector<16xf32>
    %420 = vector.multi_reduction <add>, %419, %cst_147 [1] : vector<16x32xf32> to vector<16xf32>
    %421 = vector.shape_cast %420 : vector<16xf32> to vector<16x1xf32>
    %cst_148 = arith.constant 3.200000e+01 : f32
    %422 = vector.broadcast %cst_148 : f32 to vector<16x1xf32>
    %423 = arith.divf %421, %422 : vector<16x1xf32>
    %424 = vector.broadcast %416 : vector<16x1xf32> to vector<16x32xf32>
    %425 = arith.subf %412, %424 : vector<16x32xf32>
    %cst_149 = arith.constant 9.99999974E-6 : f32
    %426 = vector.broadcast %cst_149 : f32 to vector<16x1xf32>
    %427 = arith.addf %423, %426 : vector<16x1xf32>
    %428 = math.rsqrt %427 : vector<16x1xf32>
    %429 = vector.broadcast %428 : vector<16x1xf32> to vector<16x32xf32>
    %430 = arith.mulf %425, %429 : vector<16x32xf32>
    %431 = vector.broadcast %370 : vector<1x32xf32> to vector<16x32xf32>
    %432 = arith.mulf %430, %431 : vector<16x32xf32>
    %433 = vector.broadcast %371 : vector<1x32xf32> to vector<16x32xf32>
    %434 = arith.addf %432, %433 : vector<16x32xf32>
    %435 = tpu.concatenate %403, %434, %364 in 1 : vector<16x32xf32>, vector<16x32xf32>, vector<16x32xf32> -> vector<16x96xf32>
    %c0_150 = arith.constant 0 : index
    %c0_151 = arith.constant 0 : index
    %436 = vector.load %arg11[%c0_150, %c0_151] : memref<96x11xf32, #tpu.memory_space<vmem>>, vector<96x11xf32>
    %cst_152 = arith.constant dense<0.000000e+00> : vector<16x11xf32>
    %437 = tpu.matmul %435, %436, %cst_152 {dimension_numbers = #tpu.dot_dimension_numbers<[1], [0], [0], [1], [0, 0, 1, 1], [], []>} : vector<16x96xf32>, vector<96x11xf32>, vector<16x11xf32> -> vector<16x11xf32>
    %438 = vector.broadcast %372 : vector<1x11xf32> to vector<16x11xf32>
    %439 = arith.addf %437, %438 : vector<16x11xf32>
    %440 = tpu.iota {dimensions = array<i32: 1>} : vector<16x11xi32>
    %c0_i32 = arith.constant 0 : i32
    %441 = vector.broadcast %c0_i32 : i32 to vector<16x11xi32>
    %442 = arith.cmpi eq, %440, %441 : vector<16x11xi32>
    %cst_153 = arith.constant 0.000000e+00 : f32
    %443 = vector.broadcast %cst_153 : f32 to vector<16x11xf32>
    %444 = arith.maximumf %439, %443 : vector<16x11xf32>
    %445 = arith.select %442, %444, %439 : vector<16x11xi1>, vector<16x11xf32>
    %c6_i32 = arith.constant 6 : i32
    %446 = vector.broadcast %c6_i32 : i32 to vector<16x11xi32>
    %447 = arith.cmpi slt, %440, %446 : vector<16x11xi32>
    %448 = vector.broadcast %1 : vector<16x1xf32> to vector<16x11xf32>
    %449 = arith.mulf %445, %448 : vector<16x11xf32>
    %450 = arith.select %447, %449, %445 : vector<16x11xi1>, vector<16x11xf32>
    %451 = tpu.concatenate %364, %450 in 1 : vector<16x32xf32>, vector<16x11xf32> -> vector<16x43xf32>
    %c0_154 = arith.constant 0 : index
    %c0_155 = arith.constant 0 : index
    %452 = vector.load %arg12[%c0_154, %c0_155] : memref<16x43xf32, #tpu.memory_space<vmem>>, vector<16x43xf32>
    tpu.vector_store %arg12[%c0_154, %c0_155], %451 {strides = array<i32>} : memref<16x43xf32, #tpu.memory_space<vmem>>, vector<16x43xf32>,
    return
  }
  func.func @transform_0(%arg0: i32) -> (i32, i32) {
    %c0_i32 = arith.constant 0 : i32
    %c0_i32_0 = arith.constant 0 : i32
    return %arg0, %c0_i32 : i32, i32
  }
  func.func @transform_1(%arg0: i32) -> (i32, i32) {
    %c0_i32 = arith.constant 0 : i32
    %c0_i32_0 = arith.constant 0 : i32
    return %arg0, %c0_i32 : i32, i32
  }
  func.func @transform_2(%arg0: i32) -> (i32, i32) {
    %c0_i32 = arith.constant 0 : i32
    %c0_i32_0 = arith.constant 0 : i32
    return %arg0, %c0_i32 : i32, i32
  }
  func.func @transform_3(%arg0: i32) -> (i32, i32, i32) {
    %c0_i32 = arith.constant 0 : i32
    %c0_i32_0 = arith.constant 0 : i32
    %c0_i32_1 = arith.constant 0 : i32
    return %arg0, %c0_i32, %c0_i32_0 : i32, i32, i32
  }
  func.func @transform_4(%arg0: i32) -> (i32, i32, i32) {
    %c0_i32 = arith.constant 0 : i32
    %c0_i32_0 = arith.constant 0 : i32
    %c0_i32_1 = arith.constant 0 : i32
    %c0_i32_2 = arith.constant 0 : i32
    return %c0_i32, %c0_i32_0, %c0_i32_1 : i32, i32, i32
  }
  func.func @transform_5(%arg0: i32) -> (i32, i32, i32) {
    %c0_i32 = arith.constant 0 : i32
    %c0_i32_0 = arith.constant 0 : i32
    %c0_i32_1 = arith.constant 0 : i32
    %c0_i32_2 = arith.constant 0 : i32
    return %c0_i32, %c0_i32_0, %c0_i32_1 : i32, i32, i32
  }
  func.func @transform_6(%arg0: i32) -> (i32, i32, i32) {
    %c0_i32 = arith.constant 0 : i32
    %c0_i32_0 = arith.constant 0 : i32
    %c0_i32_1 = arith.constant 0 : i32
    %c0_i32_2 = arith.constant 0 : i32
    return %c0_i32, %c0_i32_0, %c0_i32_1 : i32, i32, i32
  }
  func.func @transform_7(%arg0: i32) -> (i32, i32, i32) {
    %c0_i32 = arith.constant 0 : i32
    %c0_i32_0 = arith.constant 0 : i32
    %c0_i32_1 = arith.constant 0 : i32
    %c0_i32_2 = arith.constant 0 : i32
    return %c0_i32, %c0_i32_0, %c0_i32_1 : i32, i32, i32
  }
  func.func @transform_8(%arg0: i32) -> (i32, i32, i32) {
    %c0_i32 = arith.constant 0 : i32
    %c0_i32_0 = arith.constant 0 : i32
    %c0_i32_1 = arith.constant 0 : i32
    %c0_i32_2 = arith.constant 0 : i32
    return %c0_i32, %c0_i32_0, %c0_i32_1 : i32, i32, i32
  }
  func.func @transform_9(%arg0: i32) -> (i32, i32) {
    %c0_i32 = arith.constant 0 : i32
    %c0_i32_0 = arith.constant 0 : i32
    %c0_i32_1 = arith.constant 0 : i32
    return %c0_i32, %c0_i32_0 : i32, i32
  }
  func.func @transform_10(%arg0: i32) -> (i32, i32) {
    %c0_i32 = arith.constant 0 : i32
    %c0_i32_0 = arith.constant 0 : i32
    %c0_i32_1 = arith.constant 0 : i32
    return %c0_i32, %c0_i32_0 : i32, i32
  }
  func.func @transform_11(%arg0: i32) -> (i32, i32) {
    %c0_i32 = arith.constant 0 : i32
    %c0_i32_0 = arith.constant 0 : i32
    return %arg0, %c0_i32 : i32, i32
  }
}

</mosaic_0001>

<bundles_post_ra>
// kernel: transformer_hawkes_forward.1
= control target key start
LH: loop header
LB: loop body
LE: loop exit
PB: predicated region body
PF: predicated region fallthrough
CT: control target
= control target key end

     0   :  { %vm53_vm0 = vcmask 261120   ;;  %s2290_s14 = smov 120   ;;  %s2291_s15 = smov 88   ;;  %vm89_vm1 = vcmask 64512   ;;  %vm121_vm2 = vcmask 130048   ;;  %s3105_s4 = inlined_call_operand.vmem [shape: f32[2,32,96], index: 4, kind: input, shape index: {}]   ;;  %s3106_s0 = inlined_call_operand.vmem [shape: f32[16,32], index: 0, kind: input, shape index: {}]   ;;  %s3107_s1 = inlined_call_operand.vmem [shape: f32[16,32], index: 1, kind: input, shape index: {}]   ;;  %s3108_s3 = inlined_call_operand.vmem [shape: f32[1,16,16], index: 3, kind: input, shape index: {}]   ;;  %s3109_s5 = inlined_call_operand.vmem [shape: f32[2,32,32], index: 5, kind: input, shape index: {}]   ;;  %s3110_s7 = inlined_call_operand.vmem [shape: f32[2,7,32], index: 7, kind: input, shape index: {}]   ;;  %s3111_s2 = inlined_call_operand.vmem [shape: f32[16,1], index: 2, kind: input, shape index: {}]   ;;  %s3112_s6 = inlined_call_operand.vmem [shape: f32[4,32,32], index: 6, kind: input, shape index: {}]   ;;  %s3113_s8 = inlined_call_operand.vmem [shape: f32[2,32,32], index: 8, kind: input, shape index: {}]   ;;  %s3114_s9 = inlined_call_operand.vmem [shape: f32[7,32], index: 9, kind: input, shape index: {}]   ;;  %s3115_s10 = inlined_call_operand.vmem [shape: f32[96,11], index: 10, kind: input, shape index: {}]   ;;  %s3116_s11 = inlined_call_operand.vmem [shape: f32[16,43], index: 11, kind: output, shape index: {}]  }
   0x1   :  { %v52_v0 = vld [vmem:[%s3105_s4 + $0x18] sm:$0xff]  ;;  %v51_v1 = vld [vmem:[%s3105_s4 + $0x10] sm:$0xff]  ;;  %v38_v2 = vld [vmem:[%s3107_s1] sm:$0xff]  ;;  %s2293_s16 = smov 104   ;;  %s2294_s17 = smov 72  }
   0x2   :  { %72 = vmatpush.msra.mxu0 %v52_v0  ;;  %v44_v3 = vld [vmem:[%s3106_s0] sm:$0xff]  ;;  %v50_v4 = vld [vmem:[%s3105_s4 + $0x8] sm:$0xff]  ;;  %s2295_s18 = smov 80   ;;  %s2296_s19 = smov 112  }
   0x3   :  { %v49_v5 = vld [vmem:[%s3105_s4] sm:$0xff]  ;;  %v2386_v6 = vadd.f32 %v44_v3, %v38_v2  ;;  %v39_v7 = vld [vmem:[%s3107_s1 + $0x8] sm:$0xff]  ;;  %s2297_s24 = smov 56   ;;  %s2298_s25 = smov 64  }
   0x4   :  { %73 = vmatpush.msra.mxu0 %v51_v1  ;;  %v45_v8 = vld [vmem:[%s3106_s0 + $0x8] sm:$0xff]  ;;  %s2292_s0 = smov 96   ;;  %v42_v26 = vld [vmem:[%s3108_s3] sm:$0xff]  ;;  %s3123_s26 = smov 48  }
   0x5   :  { %v2396_v9 = vadd.f32 %v45_v8, %v39_v7  ;;  %v43_v30 = vld [vmem:[%s3108_s3 + $0x8] sm:$0xff]  ;;  %s2300_s27 = smov 40   ;;  %s3117_s28 = smov 16  }
   0x6   :  { %74 = vmatpush.msra.mxu0 %v50_v4  ;;  %s3121_s29 = smov 24   ;;  %s3119_s30 = smov 8  }
   0x7   :  { %s2307_s21 = smov 32  }
   0x8   :  { %75 = vmatpush.msra.mxu0 %v49_v5 }
   0x9   :  { %2020 = vmatmul.msk.f32.vlgmr.msra.gmra.mxu0 %vm53_vm0, %v2386_v6 }
  0x11   :  { %2021 = vmatmul.msk.f32.gmra.mxu0 %vm53_vm0, %v2396_v9 }
  0x86   :  { %v2400_v10 = vpop.f32.mrf.mxu0 }
  0x87   :  { %205 = vrot.lane.b32.xlu2 %v2400_v10, %s2290_s14 }
  0x8e   :  { %v2404_v11 = vpop.f32.mrf.mxu0 }
  0x8f   :  { %207 = vrot.lane.b32.xlu2 %v2404_v11, %s2290_s14  ;;  %211 = vrot.lane.b32.xlu1 %v2404_v11, %s2291_s15  ;;  %v2466_v52 = vpack.i.bf16 %v2400_v10, %v2404_v11 }
  0x90   :  { %87 = vrot.lane.b32.xlu0 %v2404_v11, %s2292_s0 }
  0x97   :  { %449 = vrot.lane.b32.xlu2 %v2400_v10, %s2293_s16  ;;  %209 = vrot.lane.b32.xlu1 %v2400_v10, %s2291_s15 }
  0x98   :  { %85 = vrot.lane.b32.xlu0 %v2400_v10, %s2292_s0 }
  0x9f   :  { %451 = vrot.lane.b32.xlu2 %v2404_v11, %s2293_s16  ;;  %453 = vrot.lane.b32.xlu1 %v2400_v10, %s2294_s17 }
  0xa0   :  { %455 = vrot.lane.b32.xlu0 %v2404_v11, %s2294_s17 }
  0xa7   :  { %331 = vrot.lane.b32.xlu1 %v2400_v10, %s2295_s18 }
  0xa8   :  { %333 = vrot.lane.b32.xlu0 %v2404_v11, %s2295_s18 }
  0xaf   :  { %329 = vrot.lane.b32.xlu1 %v2404_v11, %s2296_s19 }
  0xb0   :  { %327 = vrot.lane.b32.xlu0 %v2400_v10, %s2296_s19 }
  0xe1   :  { %v206_v18 = vpop.permute.xlu2 %205 }
  0xe9   :  { %v208_v21 = vpop.permute.xlu2 %207 }
  0xf1   :  { %v450_v24 = vpop.permute.xlu2 %449 }
  0xf9   :  { %v452_v25 = vpop.permute.xlu2 %451 }
 0x101   :  { %v212_v12 = vpop.permute.xlu1 %211 }
 0x102   :  { %v88_v13 = vpop.permute.xlu0 %87 }
 0x103   :  { %2022 = vmatpush.xpose.msk.msra.mxu3 %vm89_vm1, %v88_v13 }
 0x109   :  { %v210_v14 = vpop.permute.xlu1 %209 }
 0x10a   :  { %v86_v15 = vpop.permute.xlu0 %85 }
 0x10b   :  { %2023 = vmatpush.xpose.msk.msra.mxu3 %vm89_vm1, %v86_v15 }
 0x10e   :  { %2024 = vmatmul.msk.f32.vlgmr.msra.gmra.mxu3 %vm89_vm1, %v2400_v10 }
 0x10f   :  { %2028 = vmatpush.xpose.msk.msrb.mxu3 %vm89_vm1, %v212_v12 }
 0x111   :  { %v454_v17 = vpop.permute.xlu1 %453 }
 0x112   :  { %v456_v16 = vpop.permute.xlu0 %455 }
 0x113   :  { %2029 = vmatpush.xpose.msk.msrb.mxu3 %vm89_vm1, %v210_v14 }
 0x116   :  { %2025 = vmatmul.msk.f32.gmra.mxu3 %vm89_vm1, %v2404_v11 }
 0x117   :  { %2040 = vmatpush.xpose.msk.msra.mxu3 %vm89_vm1, %v456_v16 }
 0x119   :  { %v332_v20 = vpop.permute.xlu1 %331 }
 0x11a   :  { %v334_v19 = vpop.permute.xlu0 %333 }
 0x11b   :  { %2041 = vmatpush.xpose.msk.msra.mxu3 %vm89_vm1, %v454_v17  ;;  %2034 = vmatpush.xpose.msk.msrb.mxu0 %vm89_vm1, %v334_v19 }
 0x11e   :  { %2030 = vmatmul.msk.f32.vlgmr.msrb.gmra.mxu3 %vm89_vm1, %v206_v18 }
 0x11f   :  { %2035 = vmatpush.xpose.msk.msrb.mxu0 %vm89_vm1, %v332_v20 }
 0x121   :  { %v330_v23 = vpop.permute.xlu1 %329 }
 0x122   :  { %v328_v22 = vpop.permute.xlu0 %327 }
 0x123   :  { %2036 = vmatmul.msk.f32.vlgmr.msrb.gmra.mxu0 %vm89_vm1, %v328_v22 }
 0x126   :  { %2031 = vmatmul.msk.f32.gmra.mxu3 %vm89_vm1, %v208_v21 }
 0x12b   :  { %2037 = vmatmul.msk.f32.gmra.mxu0 %vm89_vm1, %v330_v23 }
 0x12e   :  { %2042 = vmatmul.msk.f32.vlgmr.msra.gmra.mxu3 %vm89_vm1, %v450_v24 }
 0x136   :  { %2043 = vmatmul.msk.f32.gmra.mxu3 %vm89_vm1, %v452_v25 }
 0x191   :  { %v115_v27 = vpop.f32.mrf.mxu3 }
 0x192   :  { %v116_v28 = vadd.f32 %v115_v27, %v42_v26 }
 0x194   :  { %v122_v29 = vsel %vm121_vm2, %v116_v28, -inf }
 0x195   :  { %123 = vmax.xlane.f32.xlu2 %v122_v29 }
 0x199   :  { %v118_v31 = vpop.f32.mrf.mxu3 }
 0x19a   :  { %v119_v32 = vadd.f32 %v118_v31, %v43_v30 }
 0x19c   :  { %v125_v33 = vsel %vm121_vm2, %v119_v32, -inf }
 0x19d   :  { %126 = vmax.xlane.f32.xlu0 %v125_v33 }
 0x1a0   :  { %v360_v34 = vpop.f32.mrf.mxu0 }
 0x1a1   :  { %v361_v35 = vadd.f32 %v360_v34, %v42_v26  ;;  %v238_v36 = vpop.f32.mrf.mxu3 }
 0x1a2   :  { %v239_v37 = vadd.f32 %v238_v36, %v42_v26 }
 0x1a3   :  { %v366_v38 = vsel %vm121_vm2, %v361_v35, -inf }
 0x1a4   :  { %v244_v39 = vsel %vm121_vm2, %v239_v37, -inf }
 0x1a5   :  { %245 = vmax.xlane.f32.xlu1 %v244_v39  ;;  %367 = vmax.xlane.f32.xlu0 %v366_v38 }
 0x1a8   :  { %v363_v40 = vpop.f32.mrf.mxu0 }
 0x1a9   :  { %v364_v41 = vadd.f32 %v363_v40, %v43_v30  ;;  %v241_v42 = vpop.f32.mrf.mxu3 }
 0x1aa   :  { %v242_v44 = vadd.f32 %v241_v42, %v43_v30 }
 0x1ab   :  { %v369_v43 = vsel %vm121_vm2, %v364_v41, -inf }
 0x1ac   :  { %370 = vmax.xlane.f32.xlu2 %v369_v43  ;;  %v247_v46 = vsel %vm121_vm2, %v242_v44, -inf }
 0x1b1   :  { %v482_v45 = vpop.f32.mrf.mxu3 }
 0x1b2   :  { %v483_v47 = vadd.f32 %v482_v45, %v42_v26 }
 0x1b4   :  { %248 = vmax.xlane.f32.xlu2 %v247_v46  ;;  %v488_v50 = vsel %vm121_vm2, %v483_v47, -inf }
 0x1b9   :  { %v485_v48 = vpop.f32.mrf.mxu3 }
 0x1ba   :  { %v486_v49 = vadd.f32 %v485_v48, %v43_v30 }
 0x1bc   :  { %489 = vmax.xlane.f32.xlu2 %v488_v50  ;;  %v491_v51 = vsel %vm121_vm2, %v486_v49, -inf }
 0x1bd   :  { %492 = vmax.xlane.f32.xlu1 %v491_v51 }
 0x1d6   :  { %2143 = vrot.lane.b32.xlu1 %v2466_v52, %s2297_s24 }
 0x208   :  { %v124_v53 = vpop.xlane.xlu2 %123 }
 0x209   :  { %v128_v54 = vsub.f32 %v116_v28, %v124_v53 }
 0x20b   :  { %v130_v55 = vmul.f32 1.442695, %v128_v54 }
 0x20d   :  { %2180 = vpow2.f32 %v130_v55 }
 0x210   :  { %v127_v56 = vpop.xlane.xlu0 %126 }
 0x211   :  { %v129_v57 = vsub.f32 %v119_v32, %v127_v56 }
 0x213   :  { %v2470_v58 = vpop.eup %2180  ;;  %v132_v59 = vmul.f32 1.442695, %v129_v57 }
 0x214   :  { %v134_v60 = vsel %vm121_vm2, %v2470_v58, 0.0 }
 0x215   :  { %2182 = vpow2.f32 %v132_v59  ;;  %135 = vadd.xlane.f32.xlu0 %v134_v60 }
 0x218   :  { %v368_v61 = vpop.xlane.xlu0 %367  ;;  %v246_v62 = vpop.xlane.xlu1 %245 }
 0x219   :  { %v372_v63 = vsub.f32 %v361_v35, %v368_v61  ;;  %v250_v2 = vsub.f32 %v239_v37, %v246_v62 }
 0x21b   :  { %v2474_v0 = vpop.eup %2182  ;;  %v374_v1 = vmul.f32 1.442695, %v372_v63  ;;  %v252_v5 = vmul.f32 1.442695, %v250_v2 }
 0x21c   :  { %v137_v3 = vsel %vm121_vm2, %v2474_v0, 0.0 }
 0x21d   :  { %138 = vadd.xlane.f32.xlu1 %v137_v3  ;;  %2184 = vpow2.f32 %v374_v1 }
 0x21e   :  { %2186 = vpow2.f32 %v252_v5 }
 0x21f   :  { %v371_v4 = vpop.xlane.xlu2 %370 }
 0x220   :  { %v373_v18 = vsub.f32 %v364_v41, %v371_v4 }
 0x222   :  { %v376_v21 = vmul.f32 1.442695, %v373_v18 }
 0x223   :  { %v2478_v7 = vpop.eup %2184 }
 0x224   :  { %v378_v8 = vsel %vm121_vm2, %v2478_v7, 0.0  ;;  %v2484_v12 = vpop.eup %2186 }
 0x225   :  { %379 = vadd.xlane.f32.xlu2 %v378_v8  ;;  %v256_v14 = vsel %vm121_vm2, %v2484_v12, 0.0 }
 0x227   :  { %v249_v10 = vpop.xlane.xlu2 %248 }
 0x228   :  { %v251_v11 = vsub.f32 %v242_v44, %v249_v10 }
 0x229   :  { %2138 = vrot.lane.b32.xlu0 %v2466_v52, %s2298_s25 }
 0x22a   :  { %v254_v13 = vmul.f32 1.442695, %v251_v11 }
 0x22c   :  { %2188 = vpow2.f32 %v254_v13 }
 0x22d   :  { %257 = vadd.xlane.f32.xlu2 %v256_v14 }
 0x22f   :  { %v490_v15 = vpop.xlane.xlu2 %489 }
 0x230   :  { %v494_v16 = vsub.f32 %v483_v47, %v490_v15  ;;  %v493_v24 = vpop.xlane.xlu1 %492 }
 0x231   :  { %v495_v26 = vsub.f32 %v486_v49, %v493_v24 }
 0x232   :  { %v2488_v17 = vpop.eup %2188  ;;  %v496_v19 = vmul.f32 1.442695, %v494_v16 }
 0x233   :  { %v259_v20 = vsel %vm121_vm2, %v2488_v17, 0.0  ;;  %v498_v28 = vmul.f32 1.442695, %v495_v26 }
 0x234   :  { %2190 = vpow2.f32 %v496_v19  ;;  %260 = vadd.xlane.f32.xlu1 %v259_v20 }
 0x235   :  { %2192 = vpow2.f32 %v376_v21 }
 0x236   :  { %2194 = vpow2.f32 %v498_v28 }
 0x23a   :  { %v2492_v22 = vpop.eup %2190 }
 0x23b   :  { %v500_v23 = vsel %vm121_vm2, %v2492_v22, 0.0  ;;  %v2496_v25 = vpop.eup %2192 }
 0x23c   :  { %501 = vadd.xlane.f32.xlu2 %v500_v23  ;;  %v381_v27 = vsel %vm121_vm2, %v2496_v25, 0.0  ;;  %v2502_v29 = vpop.eup %2194 }
 0x23d   :  { %v503_v30 = vsel %vm121_vm2, %v2502_v29, 0.0 }
 0x244   :  { %382 = vadd.xlane.f32.xlu2 %v381_v27 }
 0x248   :  { %v2144_v31 = vpop.permute.xlu1 %2143 }
 0x249   :  { %v2145_v56 = vunpack.i.l.bf16 %v2144_v31  ;;  %v2146_v61 = vunpack.i.h.bf16 %v2144_v31 }
 0x24d   :  { %2153 = vrot.lane.b32.xlu1 %v2466_v52, %s3123_s26 }
 0x253   :  { %504 = vadd.xlane.f32.xlu0 %v503_v30 }
 0x25c   :  { %2148 = vrot.lane.b32.xlu2 %v2466_v52, %s2300_s27 }
 0x288   :  { %v136_v32 = vpop.xlane.xlu0 %135 }
 0x289   :  { %2196 = vrcp.f32 %v136_v32  ;;  %v151_v38 = vand.u32 2147483648, %v136_v32  ;;  %vm145_vm4 = vweird.f32 %v136_v32  ;;  %v149_v41 = vand.u32 2147483647, %v136_v32 }
 0x28b   :  { %v152_v45 = vor.u32 1.1754944e-38, %v151_v38  ;;  %vm150_vm6 = vcmp.eq.f32.partialorder %v149_v41, 8.507059e+37 }
 0x28f   :  { %v2197_v33 = vpop.eup %2196 }
 0x290   :  { %v141_v34 = vmul.f32 %v2197_v33, %v136_v32  ;;  %v139_v35 = vpop.xlane.xlu1 %138  ;;  %vm146_vm3 = vweird.f32 %v2197_v33 }
 0x291   :  { %2198 = vrcp.f32 %v139_v35  ;;  %vm147_vm5 = vmor %vm145_vm4, %vm146_vm3  ;;  %v166_v51 = vand.u32 2147483648, %v139_v35  ;;  %vm160_vm8 = vweird.f32 %v139_v35  ;;  %v164_v55 = vand.u32 2147483647, %v139_v35 }
 0x292   :  { %v142_v36 = vsub.f32 1.0, %v141_v34 }
 0x293   :  { %v167_v60 = vor.u32 1.1754944e-38, %v166_v51  ;;  %vm165_vm10 = vcmp.eq.f32.partialorder %v164_v55, 8.507059e+37 }
 0x294   :  { %v143_v37 = vmul.f32 %v2197_v33, %v142_v36 }
 0x296   :  { %v144_v39 = vadd.f32 %v2197_v33, %v143_v37 }
 0x297   :  { %v2199_v40 = vpop.eup %2198 }
 0x298   :  { %v156_v42 = vmul.f32 %v2199_v40, %v139_v35  ;;  %v2508_v43 = vpop.xlane.xlu2 %379  ;;  %v148_v44 = vsel %vm147_vm5, %v2197_v33, %v144_v39  ;;  %vm161_vm7 = vweird.f32 %v2199_v40 }
 0x299   :  { %v153_v50 = vsel %vm150_vm6, %v152_v45, %v148_v44  ;;  %vm162_vm9 = vmor %vm160_vm8, %vm161_vm7  ;;  %vm389_vm7 = vweird.f32 %v2508_v43  ;;  %v393_v41 = vand.u32 2147483647, %v2508_v43 }
 0x29a   :  { %v157_v46 = vsub.f32 1.0, %v156_v42  ;;  %v154_v54 = vmul.f32 %v2470_v58, %v153_v50 }
 0x29b   :  { %v2139_v47 = vpop.permute.xlu0 %2138 }
 0x29c   :  { %v158_v48 = vmul.f32 %v2199_v40, %v157_v46  ;;  %v2140_v49 = vunpack.i.l.bf16 %v2139_v47  ;;  %v2141_v52 = vunpack.i.h.bf16 %v2139_v47 }
 0x29e   :  { %196 = vmatpush.msra.mxu2 %v2140_v49  ;;  %v159_v53 = vadd.f32 %v2199_v40, %v158_v48 }
 0x2a0   :  { %197 = vmatpush.msra.mxu2 %v2141_v52  ;;  %v258_v57 = vpop.xlane.xlu2 %257  ;;  %v163_v59 = vsel %vm162_vm9, %v2199_v40, %v159_v53 }
 0x2a1   :  { %2026 = vmatmul.msk.f32.vlgmr.msra.gmra.mxu2 %vm121_vm2, %v154_v54  ;;  %2200 = vrcp.f32 %v258_v57  ;;  %v168_v62 = vsel %vm165_vm10, %v167_v60, %v163_v59  ;;  %v273_v8 = vand.u32 2147483648, %v258_v57  ;;  %v271_v11 = vand.u32 2147483647, %v258_v57 }
 0x2a2   :  { %318 = vmatpush.msrb.mxu2 %v2145_v56  ;;  %2202 = vrcp.f32 %v2508_v43  ;;  %v169_v58 = vmul.f32 %v2474_v0, %v168_v62  ;;  %vm267_vm12 = vweird.f32 %v258_v57 }
 0x2a3   :  { %v274_v18 = vor.u32 1.1754944e-38, %v273_v8  ;;  %vm272_vm14 = vcmp.eq.f32.partialorder %v271_v11, 8.507059e+37 }
 0x2a4   :  { %319 = vmatpush.msrb.mxu2 %v2146_v61 }
 0x2a7   :  { %v261_v63 = vpop.xlane.xlu1 %260  ;;  %v2201_v1 = vpop.eup %2200 }
 0x2a8   :  { %2204 = vrcp.f32 %v261_v63  ;;  %v2514_v2 = vpop.eup %2202  ;;  %v263_v3 = vmul.f32 %v2201_v1, %v258_v57  ;;  %vm268_vm11 = vweird.f32 %v2201_v1  ;;  %v288_v21 = vand.u32 2147483648, %v261_v63 }
 0x2a9   :  { %2027 = vmatmul.msk.f32.gmra.mxu2 %vm121_vm2, %v169_v58  ;;  %v385_v5 = vmul.f32 %v2514_v2, %v2508_v43  ;;  %vm269_vm13 = vmor %vm267_vm12, %vm268_vm11  ;;  %v286_v27 = vand.u32 2147483647, %v261_v63  ;;  %vm282_vm3 = vweird.f32 %v261_v63  ;;  %vm390_vm6 = vweird.f32 %v2514_v2 }
 0x2aa   :  { %v264_v4 = vsub.f32 1.0, %v263_v3  ;;  %v289_v32 = vor.u32 1.1754944e-38, %v288_v21  ;;  %vm2528_vm9 = vmor %vm389_vm7, %vm390_vm6  ;;  %vm394_vm12 = vcmp.eq.f32.partialorder %v393_v41, 8.507059e+37 }
 0x2ab   :  { %v386_v16 = vsub.f32 1.0, %v385_v5  ;;  %vm287_vm5 = vcmp.eq.f32.partialorder %v286_v27, 8.507059e+37 }
 0x2ac   :  { %v265_v10 = vmul.f32 %v2201_v1, %v264_v4 }
 0x2ad   :  { %v387_v28 = vmul.f32 %v2514_v2, %v386_v16 }
 0x2ae   :  { %v2205_v13 = vpop.eup %2204  ;;  %v266_v14 = vadd.f32 %v2201_v1, %v265_v10 }
 0x2af   :  { %v278_v15 = vmul.f32 %v2205_v13, %v261_v63  ;;  %v502_v0 = vpop.xlane.xlu2 %501  ;;  %vm283_vm15 = vweird.f32 %v2205_v13  ;;  %v388_v37 = vadd.f32 %v2514_v2, %v387_v28 }
 0x2b0   :  { %2206 = vrcp.f32 %v502_v0  ;;  %v270_v20 = vsel %vm269_vm13, %v2201_v1, %v266_v14  ;;  %vm284_vm4 = vmor %vm282_vm3, %vm283_vm15  ;;  %v517_v40 = vand.u32 2147483648, %v502_v0  ;;  %v515_v44 = vand.u32 2147483647, %v502_v0 }
 0x2b1   :  { %v279_v19 = vsub.f32 1.0, %v278_v15  ;;  %v275_v23 = vsel %vm272_vm14, %v274_v18, %v270_v20  ;;  %v392_v46 = vsel %vm2528_vm9, %v2514_v2, %v388_v37  ;;  %vm511_vm10 = vweird.f32 %v502_v0 }
 0x2b2   :  { %v276_v26 = vmul.f32 %v2484_v12, %v275_v23  ;;  %v395_v12 = vand.u32 2147483648, %v2508_v43  ;;  %v518_v49 = vor.u32 1.1754944e-38, %v517_v40  ;;  %vm516_vm13 = vcmp.eq.f32.partialorder %v515_v44, 8.507059e+37 }
 0x2b3   :  { %v280_v24 = vmul.f32 %v2205_v13, %v279_v19  ;;  %vm599_vm9 = vcmask 195584  }
 0x2b4   :  { %2032 = vmatmul.msk.f32.vlgmr.msrb.gmra.mxu2 %vm121_vm2, %v276_v26  ;;  %v396_v47 = vor.u32 1.1754944e-38, %v395_v12 }
 0x2b5   :  { %v281_v30 = vadd.f32 %v2205_v13, %v280_v24 }
 0x2b6   :  { %v2207_v31 = vpop.eup %2206  ;;  %v397_v53 = vsel %vm394_vm12, %v396_v47, %v392_v46  ;;  %v2573_v46 = vld [vmem:[%s3110_s7] sm:$0x7f] }
 0x2b7   :  { %v507_v33 = vmul.f32 %v2207_v31, %v502_v0  ;;  %v383_v34 = vpop.xlane.xlu2 %382  ;;  %v285_v35 = vsel %vm284_vm4, %v2205_v13, %v281_v30  ;;  %vm512_vm8 = vweird.f32 %v2207_v31  ;;  %v398_v62 = vmul.f32 %v2478_v7, %v397_v53  ;;  %v605_v30 = vld [vmem:[%s3109_s5 + $0x18] sm:$0xff] }
 0x2b8   :  { %2208 = vrcp.f32 %v383_v34  ;;  %v290_v36 = vsel %vm287_vm5, %v289_v32, %v285_v35  ;;  %vm513_vm11 = vmor %vm511_vm10, %vm512_vm8  ;;  %v410_v59 = vand.u32 2147483648, %v383_v34  ;;  %v408_v1 = vand.u32 2147483647, %v383_v34  ;;  %625 = vmatpush.msra.mxu0 %v605_v30  ;;  %v603_v32 = vld [vmem:[%s3109_s5 + $0x8] sm:$0xff] }
 0x2b9   :  { %v508_v38 = vsub.f32 1.0, %v507_v33  ;;  %v291_v39 = vmul.f32 %v2488_v17, %v290_v36  ;;  %vm404_vm15 = vweird.f32 %v383_v34  ;;  %v602_v33 = vld [vmem:[%s3109_s5] sm:$0xff]  ;;  %v606_v47 = vperm.slane %v2573_v46, 0 }
 0x2ba   :  { %v411_v3 = vor.u32 1.1754944e-38, %v410_v59  ;;  %vm409_vm4 = vcmp.eq.f32.partialorder %v408_v1, 8.507059e+37 }
 0x2bb   :  { %v509_v42 = vmul.f32 %v2207_v31, %v508_v38 }
 0x2bc   :  { %2033 = vmatmul.msk.f32.gmra.mxu2 %vm121_vm2, %v291_v39 }
 0x2bd   :  { %v510_v48 = vadd.f32 %v2207_v31, %v509_v42 }
 0x2be   :  { %v2209_v17 = vpop.eup %2208 }
 0x2bf   :  { %v514_v43 = vsel %vm513_vm11, %v2207_v31, %v510_v48  ;;  %v400_v50 = vmul.f32 %v2209_v17, %v383_v34  ;;  %v2154_v51 = vpop.permute.xlu1 %2153  ;;  %v2149_v52 = vpop.permute.xlu2 %2148  ;;  %vm405_vm14 = vweird.f32 %v2209_v17  ;;  %v604_v31 = vld [vmem:[%s3109_s5 + $0x10] sm:$0xff] }
 0x2c0   :  { %v519_v54 = vsel %vm516_vm13, %v518_v49, %v514_v43  ;;  %v2150_v55 = vunpack.i.l.bf16 %v2149_v52  ;;  %v2155_v56 = vunpack.i.l.bf16 %v2154_v51  ;;  %v2151_v60 = vunpack.i.h.bf16 %v2149_v52  ;;  %vm406_vm3 = vmor %vm404_vm15, %vm405_vm14  ;;  %626 = vmatpush.msra.mxu0 %v604_v31 }
 0x2c1   :  { %v401_v57 = vsub.f32 1.0, %v400_v50  ;;  %v2156_v61 = vunpack.i.h.bf16 %v2154_v51  ;;  %v520_v58 = vmul.f32 %v2492_v22, %v519_v54  ;;  %v2304_v54 = vmov 32.0  }
 0x2c2   :  { %440 = vmatpush.msra.mxu1 %v2155_v56  ;;  %562 = vmatpush.msra.mxu2 %v2150_v55 }
 0x2c3   :  { %v402_v63 = vmul.f32 %v2209_v17, %v401_v57  ;;  %627 = vmatpush.msra.mxu0 %v603_v32  ;;  %v2305_v57 = vmov 0  }
 0x2c4   :  { %441 = vmatpush.msra.mxu1 %v2156_v61  ;;  %563 = vmatpush.msra.mxu2 %v2151_v60 }
 0x2c5   :  { %2038 = vmatmul.msk.f32.vlgmr.msra.gmra.mxu1 %vm121_vm2, %v398_v62  ;;  %2044 = vmatmul.msk.f32.vlgmr.msra.gmra.mxu2 %vm121_vm2, %v520_v58  ;;  %v403_v2 = vadd.f32 %v2209_v17, %v402_v63 }
 0x2c6   :  { %v505_v4 = vpop.xlane.xlu0 %504  ;;  %2115 = vmatpush.msrb.mxu1 %v605_v30  ;;  %628 = vmatpush.msra.mxu0 %v602_v33  ;;  %v689_v30 = vperm.slane %v2573_v46, 1 }
 0x2c7   :  { %2210 = vrcp.f32 %v505_v4  ;;  %v407_v5 = vsel %vm406_vm3, %v2209_v17, %v403_v2  ;;  %v532_v13 = vand.u32 2147483648, %v505_v4  ;;  %v530_v15 = vand.u32 2147483647, %v505_v4  ;;  %2158 = vset.pattern.permute.xlu1 %v2305_v57  ;;  %2157 = vset.pattern.permute.xlu2 %v2305_v57 }
 0x2c8   :  { %v412_v7 = vsel %vm409_vm4, %v411_v3, %v407_v5  ;;  %vm526_vm6 = vweird.f32 %v505_v4  ;;  %2116 = vmatpush.msrb.mxu1 %v604_v31  ;;  %2212 = vrcp.f32 %v2304_v54  ;;  %2179 = vset.pattern.permute.xlu0 %v2305_v57 }
 0x2c9   :  { %v413_v8 = vmul.f32 %v2496_v25, %v412_v7  ;;  %v533_v16 = vor.u32 1.1754944e-38, %v532_v13  ;;  %vm531_vm8 = vcmp.eq.f32.partialorder %v530_v15, 8.507059e+37  ;;  %v708_v13 = vld [vmem:[%s3112_s6 + $0x8] sm:$0xff] }
 0x2ca   :  { %2117 = vmatpush.msrb.mxu1 %v603_v32 }
 0x2cc   :  { %2118 = vmatpush.msrb.mxu1 %v602_v33 }
 0x2cd   :  { %v2211_v22 = vpop.eup %2210  ;;  %2039 = vmatmul.msk.f32.gmra.mxu1 %vm121_vm2, %v413_v8 }
 0x2ce   :  { %v522_v10 = vmul.f32 %v2211_v22, %v505_v4  ;;  %vm527_vm5 = vweird.f32 %v2211_v22  ;;  %v2213_v55 = vpop.eup %2212  ;;  %v40_v4 = vld [vmem:[%s3111_s2] sm:$0xff] }
 0x2cf   :  { %vm528_vm7 = vmor %vm526_vm6, %vm527_vm5  ;;  %v645_v56 = vmul.f32 32.0, %v2213_v55  ;;  %vm649_vm10 = vweird.f32 %v2213_v55 }
 0x2d0   :  { %v523_v11 = vsub.f32 1.0, %v522_v10  ;;  %v710_v10 = vld [vmem:[%s3112_s6 + $0x18] sm:$0xff] }
 0x2d1   :  { %v646_v59 = vsub.f32 1.0, %v645_v56  ;;  %730 = vmatpush.msra.mxu1 %v710_v10 }
 0x2d2   :  { %v524_v14 = vmul.f32 %v2211_v22, %v523_v11  ;;  %v709_v11 = vld [vmem:[%s3112_s6 + $0x10] sm:$0xff] }
 0x2d3   :  { %731 = vmatpush.msra.mxu1 %v709_v11 }
 0x2d4   :  { %v525_v0 = vadd.f32 %v2211_v22, %v524_v14  ;;  %v707_v14 = vld [vmem:[%s3112_s6] sm:$0xff] }
 0x2d5   :  { %732 = vmatpush.msra.mxu1 %v708_v13 }
 0x2d6   :  { %v529_v18 = vsel %vm528_vm7, %v2211_v22, %v525_v0  ;;  %v41_v22 = vld [vmem:[%s3111_s2 + $0x8] sm:$0xff] }
 0x2d7   :  { %v534_v19 = vsel %vm531_vm8, %v533_v16, %v529_v18  ;;  %733 = vmatpush.msra.mxu1 %v707_v14 }
 0x2d8   :  { %v535_v20 = vmul.f32 %v2502_v29, %v534_v19 }
 0x2da   :  { %2045 = vmatmul.msk.f32.gmra.mxu2 %vm121_vm2, %v535_v20 }
 0x324   :  { %v199_v25 = vpop.f32.mrf.mxu2 }
 0x32c   :  { %v202_v21 = vpop.f32.mrf.mxu2 }
 0x337   :  { %v321_v23 = vpop.f32.mrf.mxu2 }
 0x33f   :  { %v324_v24 = vpop.f32.mrf.mxu2 }
 0x342   :  { %v443_v26 = vpop.f32.mrf.mxu1 }
 0x343   :  { %581 = vrot.lane.b32.xlu1 %v443_v26, %s3117_s28 }
 0x348   :  { %v565_v27 = vpop.f32.mrf.mxu2 }
 0x349   :  { %589 = vrot.lane.b32.xlu2 %v565_v27, %s3121_s29 }
 0x34a   :  { %v446_v28 = vpop.f32.mrf.mxu1 }
 0x34b   :  { %583 = vrot.lane.b32.xlu0 %v446_v28, %s3117_s28  ;;  %573 = vrot.lane.b32.xlu1 %v321_v23, %s3119_s30 }
 0x353   :  { %575 = vrot.lane.b32.xlu1 %v324_v24, %s3119_s30 }
 0x35d   :  { %v568_v29 = vpop.f32.mrf.mxu2 }
 0x35e   :  { %591 = vrot.lane.b32.xlu2 %v568_v29, %s3121_s29 }
 0x3a3   :  { %v590_v37 = vpop.permute.xlu2 %589 }
 0x3b5   :  { %v582_v34 = vpop.permute.xlu1 %581 }
 0x3b8   :  { %v592_v42 = vpop.permute.xlu2 %591 }
 0x3bd   :  { %v574_v35 = vpop.permute.xlu1 %573  ;;  %v584_v40 = vpop.permute.xlu0 %583 }
 0x3be   :  { %v595_v36 = vsel %vm89_vm1, %v199_v25, %v574_v35 }
 0x3bf   :  { %v597_v12 = vsel %vm121_vm2, %v595_v36, %v582_v34  ;;  %v692_v34 = vperm.slane %v2573_v46, 2 }
 0x3c0   :  { %v600_v38 = vsel %vm599_vm9, %v597_v12, %v590_v37 }
 0x3c1   :  { %2046 = vmatmul.msk.f32.vlgmr.msra.gmra.mxu0 %vm53_vm0, %v600_v38 }
 0x3c5   :  { %v576_v39 = vpop.permute.xlu1 %575 }
 0x3c6   :  { %v596_v41 = vsel %vm89_vm1, %v202_v21, %v576_v39 }
 0x3c7   :  { %v598_v44 = vsel %vm121_vm2, %v596_v41, %v584_v40 }
 0x3c8   :  { %v601_v45 = vsel %vm599_vm9, %v598_v44, %v592_v42 }
 0x3c9   :  { %2047 = vmatmul.msk.f32.vlgmr.msrb.gmra.mxu1 %vm53_vm0, %v601_v45 }
 0x43e   :  { %v630_v48 = vpop.f32.mrf.mxu0 }
 0x43f   :  { %v631_v17 = vadd.f32 %v630_v48, %v606_v47 }
 0x441   :  { %v636_v49 = vadd.f32 %v631_v17, %v2386_v6  ;;  %v647_v6 = vmul.f32 %v2213_v55, %v646_v59  ;;  %v711_v17 = vperm.slane %v2573_v46, 3 }
 0x443   :  { %v638_v43 = vsel %vm53_vm0, %v636_v49, 0.0  ;;  %v648_v60 = vadd.f32 %v2213_v55, %v647_v6 }
 0x444   :  { %639 = vadd.xlane.f32.xlu1 %v638_v43 }
 0x445   :  { %v2580_v61 = vsel %vm649_vm10, %v2213_v55, %v648_v60 }
 0x446   :  { %v633_v50 = vpop.f32.mrf.mxu1 }
 0x447   :  { %v634_v51 = vadd.f32 %v633_v50, %v606_v47 }
 0x449   :  { %v637_v52 = vadd.f32 %v634_v51, %v2396_v9 }
 0x44b   :  { %v641_v53 = vsel %vm53_vm0, %v637_v52, 0.0 }
 0x44c   :  { %642 = vadd.xlane.f32.xlu2 %v641_v53 }
 0x464   :  { %697 = vperm.xlu2 %2157, %v40_v4   ;;  %v2051_v4 = vld [vmem:[%s3112_s6 + $0x28] sm:$0xff] }
 0x4b7   :  { %v640_v62 = vpop.xlane.xlu1 %639 }
 0x4b8   :  { %v651_v9 = vmul.f32 %v2580_v61, %v640_v62 }
 0x4ba   :  { %v653_v63 = vsub.f32 %v636_v49, %v651_v9  ;;  %v2053_v9 = vld [vmem:[%s3112_s6 + $0x38] sm:$0xff] }
 0x4bb   :  { %845 = vmatpush.msrb.mxu3 %v2053_v9 }
 0x4bc   :  { %v655_v58 = vmul.f32 %v653_v63, %v653_v63 }
 0x4be   :  { %v657_v1 = vsel %vm53_vm0, %v655_v58, 0.0  ;;  %v2052_v58 = vld [vmem:[%s3112_s6 + $0x30] sm:$0xff] }
 0x4bf   :  { %658 = vadd.xlane.f32.xlu0 %v657_v1  ;;  %v643_v2 = vpop.xlane.xlu2 %642  ;;  %846 = vmatpush.msrb.mxu3 %v2052_v58 }
 0x4c0   :  { %v652_v3 = vmul.f32 %v2580_v61, %v643_v2 }
 0x4c1   :  { %847 = vmatpush.msrb.mxu3 %v2051_v4 }
 0x4c2   :  { %v654_v5 = vsub.f32 %v637_v52, %v652_v3 }
 0x4c4   :  { %v656_v7 = vmul.f32 %v654_v5, %v654_v5 }
 0x4c6   :  { %v660_v8 = vsel %vm53_vm0, %v656_v7, 0.0 }
 0x4c7   :  { %661 = vadd.xlane.f32.xlu1 %v660_v8  ;;  %v2608_v12 = vpop.permute.xlu2 %697 }
 0x4e0   :  { %702 = vperm.xlu1 %2158, %v41_v22  }
 0x532   :  { %v659_v15 = vpop.xlane.xlu0 %658 }
 0x533   :  { %v663_v0 = vmul.f32 %v659_v15, %v2580_v61 }
 0x535   :  { %v665_v16 = vadd.f32 1e-06, %v663_v0 }
 0x537   :  { %2214 = vrsqrt.f32 %v665_v16  ;;  %vm673_vm12 = vweird.f32 %v665_v16 }
 0x53a   :  { %v662_v18 = vpop.xlane.xlu1 %661 }
 0x53b   :  { %v664_v19 = vmul.f32 %v662_v18, %v2580_v61 }
 0x53d   :  { %v2215_v20 = vpop.eup %2214  ;;  %v666_v25 = vadd.f32 1e-06, %v664_v19 }
 0x53e   :  { %v668_v21 = vmul.f32 %v2215_v20, %v665_v16  ;;  %vm674_vm11 = vweird.f32 %v2215_v20 }
 0x53f   :  { %2216 = vrsqrt.f32 %v666_v25  ;;  %vm675_vm13 = vmor %vm673_vm12, %vm674_vm11  ;;  %vm683_vm15 = vweird.f32 %v666_v25 }
 0x540   :  { %v669_v23 = vmul.f32 %v2215_v20, %v668_v21 }
 0x542   :  { %v670_v24 = vmul.f32 0.5, %v669_v23 }
 0x544   :  { %v671_v26 = vsub.f32 1.5, %v670_v24 }
 0x545   :  { %v2217_v27 = vpop.eup %2216 }
 0x546   :  { %v672_v28 = vmul.f32 %v2215_v20, %v671_v26  ;;  %v678_v29 = vmul.f32 %v2217_v27, %v666_v25  ;;  %vm684_vm14 = vweird.f32 %v2217_v27 }
 0x547   :  { %vm685_vm3 = vmor %vm683_vm15, %vm684_vm14 }
 0x548   :  { %v676_v31 = vsel %vm675_vm13, %v2215_v20, %v672_v28  ;;  %v679_v32 = vmul.f32 %v2217_v27, %v678_v29 }
 0x549   :  { %v687_v33 = vmul.f32 %v676_v31, %v653_v63 }
 0x54a   :  { %v680_v35 = vmul.f32 0.5, %v679_v32 }
 0x54b   :  { %v690_v36 = vmul.f32 %v689_v30, %v687_v33 }
 0x54c   :  { %v681_v37 = vsub.f32 1.5, %v680_v35 }
 0x54d   :  { %v693_v38 = vadd.f32 %v692_v34, %v690_v36 }
 0x54e   :  { %v682_v39 = vmul.f32 %v2217_v27, %v681_v37 }
 0x54f   :  { %v2611_v40 = vmul.f32 %v2608_v12, %v693_v38 }
 0x550   :  { %v686_v41 = vsel %vm685_vm3, %v2217_v27, %v682_v39 }
 0x551   :  { %v688_v42 = vmul.f32 %v686_v41, %v654_v5  ;;  %2048 = vmatmul.msk.f32.vlgmr.msra.gmra.mxu1 %vm53_vm0, %v2611_v40  ;;  %v2050_v5 = vld [vmem:[%s3112_s6 + $0x20] sm:$0xff] }
 0x552   :  { %v2615_v45 = vpop.permute.xlu1 %702  ;;  %848 = vmatpush.msrb.mxu3 %v2050_v5 }
 0x553   :  { %v691_v44 = vmul.f32 %v689_v30, %v688_v42 }
 0x555   :  { %v694_v47 = vadd.f32 %v692_v34, %v691_v44 }
 0x557   :  { %v2618_v48 = vmul.f32 %v2615_v45, %v694_v47 }
 0x559   :  { %2049 = vmatmul.msk.f32.gmra.mxu1 %vm53_vm0, %v2618_v48 }
 0x5ce   :  { %v735_v49 = vpop.f32.mrf.mxu1 }
 0x5cf   :  { %v2623_v43 = vadd.f32 %v735_v49, %v711_v17 }
 0x5d1   :  { %v2626_v50 = vmul.f32 0.70710677, %v2623_v43 }
 0x5d3   :  { %v749_v51 = vand.u32 2147483647, %v2626_v50  ;;  %vm745_vm13 = vcmp.ge.f32.partialorder %v2626_v50, 0.0 }
 0x5d5   :  { %v751_v52 = vmul.f32 0.3275911, %v749_v51  ;;  %v803_v13 = vsub.f32 0.0, %v749_v51 }
 0x5d6   :  { %v738_v53 = vpop.f32.mrf.mxu1 }
 0x5d7   :  { %v753_v54 = vadd.f32 1.0, %v751_v52  ;;  %v2629_v55 = vadd.f32 %v738_v53, %v711_v17  ;;  %v805_v19 = vmul.f32 %v803_v13, %v749_v51  ;;  %v2306_v52 = vmov -1.0  }
 0x5d8   :  { %v747_v53 = vsel %vm745_vm13, 1.0, %v2306_v52 }
 0x5d9   :  { %2218 = vrcp.f32 %v753_v54  ;;  %v2632_v56 = vmul.f32 0.70710677, %v2629_v55  ;;  %v766_v1 = vand.u32 2147483648, %v753_v54  ;;  %v764_v3 = vand.u32 2147483647, %v753_v54 }
 0x5da   :  { %vm760_vm5 = vweird.f32 %v753_v54  ;;  %v807_v27 = vmul.f32 1.442695, %v805_v19 }
 0x5db   :  { %v750_v57 = vand.u32 2147483647, %v2632_v56  ;;  %v767_v8 = vor.u32 1.1754944e-38, %v766_v1  ;;  %vm765_vm7 = vcmp.eq.f32.partialorder %v764_v3, 8.507059e+37  ;;  %vm746_vm14 = vcmp.ge.f32.partialorder %v2632_v56, 0.0 }
 0x5dc   :  { %v748_v1 = vsel %vm746_vm14, 1.0, %v2306_v52  ;;  %v742_v3 = vmul.f32 0.5, %v2629_v55 }
 0x5dd   :  { %v752_v59 = vmul.f32 0.3275911, %v750_v57  ;;  %v804_v30 = vsub.f32 0.0, %v750_v57 }
 0x5df   :  { %v2219_v6 = vpop.eup %2218  ;;  %v754_v62 = vadd.f32 1.0, %v752_v59  ;;  %v806_v36 = vmul.f32 %v804_v30, %v750_v57  ;;  %v741_v57 = vmul.f32 0.5, %v2623_v43  ;;  %v826_v43 = vperm.slane %v2573_v46, 4 }
 0x5e0   :  { %v756_v60 = vmul.f32 %v2219_v6, %v753_v54  ;;  %vm761_vm4 = vweird.f32 %v2219_v6 }
 0x5e1   :  { %2220 = vrcp.f32 %v754_v62  ;;  %vm762_vm6 = vmor %vm760_vm5, %vm761_vm4  ;;  %v781_v18 = vand.u32 2147483648, %v754_v62  ;;  %v779_v25 = vand.u32 2147483647, %v754_v62  ;;  %vm775_vm10 = vweird.f32 %v754_v62 }
 0x5e2   :  { %v757_v63 = vsub.f32 1.0, %v756_v60  ;;  %2222 = vpow2.f32 %v807_v27  ;;  %v809_v42 = vmul.f32 1.442695, %v806_v36  ;;  %v2057_v27 = vld [vmem:[%s3105_s4 + $0x20] sm:$0xff] }
 0x5e3   :  { %v782_v26 = vor.u32 1.1754944e-38, %v781_v18  ;;  %vm780_vm12 = vcmp.eq.f32.partialorder %v779_v25, 8.507059e+37 }
 0x5e4   :  { %v758_v2 = vmul.f32 %v2219_v6, %v757_v63  ;;  %2224 = vpow2.f32 %v809_v42 }
 0x5e6   :  { %v759_v7 = vadd.f32 %v2219_v6, %v758_v2 }
 0x5e7   :  { %v2221_v22 = vpop.eup %2220 }
 0x5e8   :  { %v763_v10 = vsel %vm762_vm6, %v2219_v6, %v759_v7  ;;  %v771_v14 = vmul.f32 %v2221_v22, %v754_v62  ;;  %vm776_vm8 = vweird.f32 %v2221_v22  ;;  %v2223_v44 = vpop.eup %2222 }
 0x5e9   :  { %v768_v11 = vsel %vm765_vm7, %v767_v8, %v763_v10  ;;  %vm777_vm11 = vmor %vm775_vm10, %vm776_vm8 }
 0x5ea   :  { %v785_v15 = vmul.f32 1.0614054, %v768_v11  ;;  %v772_v0 = vsub.f32 1.0, %v771_v14  ;;  %v2225_v9 = vpop.eup %2224 }
 0x5ec   :  { %v787_v16 = vadd.f32 -1.4531521, %v785_v15  ;;  %v773_v20 = vmul.f32 %v2221_v22, %v772_v0 }
 0x5ee   :  { %v789_v21 = vmul.f32 %v787_v16, %v768_v11  ;;  %v774_v23 = vadd.f32 %v2221_v22, %v773_v20 }
 0x5f0   :  { %v791_v24 = vadd.f32 1.4214138, %v789_v21  ;;  %v778_v28 = vsel %vm777_vm11, %v2221_v22, %v774_v23  ;;  %v2059_v23 = vld [vmem:[%s3105_s4 + $0x30] sm:$0xff] }
 0x5f1   :  { %v783_v31 = vsel %vm780_vm12, %v782_v26, %v778_v28 }
 0x5f2   :  { %v793_v29 = vmul.f32 %v791_v24, %v768_v11  ;;  %v786_v32 = vmul.f32 1.0614054, %v783_v31  ;;  %v2058_v24 = vld [vmem:[%s3105_s4 + $0x28] sm:$0xff] }
 0x5f4   :  { %v795_v33 = vadd.f32 -0.28449672, %v793_v29  ;;  %v788_v34 = vadd.f32 -1.4531521, %v786_v32 }
 0x5f6   :  { %v797_v35 = vmul.f32 %v795_v33, %v768_v11  ;;  %v790_v37 = vmul.f32 %v788_v34, %v783_v31 }
 0x5f8   :  { %v799_v38 = vadd.f32 0.2548296, %v797_v35  ;;  %v792_v39 = vadd.f32 1.4214138, %v790_v37 }
 0x5fa   :  { %v801_v41 = vmul.f32 %v799_v38, %v768_v11  ;;  %v794_v47 = vmul.f32 %v792_v39, %v783_v31 }
 0x5fc   :  { %v811_v17 = vmul.f32 %v2223_v44, %v801_v41  ;;  %v796_v49 = vadd.f32 -0.28449672, %v794_v47  ;;  %v902_v41 = vperm.slane %v2573_v46, 5  ;;  %v905_v47 = vperm.slane %v2573_v46, 6 }
 0x5fe   :  { %v813_v51 = vsub.f32 1.0, %v811_v17  ;;  %v798_v54 = vmul.f32 %v796_v49, %v783_v31 }
 0x600   :  { %v815_v59 = vmul.f32 %v813_v51, %v747_v53  ;;  %v800_v6 = vadd.f32 0.2548296, %v798_v54 }
 0x602   :  { %v817_v60 = vadd.f32 1.0, %v815_v59  ;;  %v802_v62 = vmul.f32 %v800_v6, %v783_v31 }
 0x604   :  { %v819_v63 = vmul.f32 %v817_v60, %v741_v57  ;;  %v812_v58 = vmul.f32 %v2225_v9, %v802_v62  ;;  %v2286_v62 = vld [vmem:[%s3107_s1] sm:$0xff] }
 0x606   :  { %2054 = vmatmul.msk.f32.vlgmr.msrb.gmra.mxu3 %vm53_vm0, %v819_v63  ;;  %v814_v50 = vsub.f32 1.0, %v812_v58 }
 0x608   :  { %v816_v2 = vmul.f32 %v814_v50, %v748_v1  ;;  %v2287_v1 = vld [vmem:[%s3107_s1 + $0x8] sm:$0xff] }
 0x60a   :  { %v818_v4 = vadd.f32 1.0, %v816_v2 }
 0x60c   :  { %v820_v5 = vmul.f32 %v818_v4, %v742_v3 }
 0x60e   :  { %2055 = vmatmul.msk.f32.gmra.mxu3 %vm53_vm0, %v820_v5 }
 0x689   :  { %v850_v7 = vpop.f32.mrf.mxu3 }
 0x68a   :  { %v851_v8 = vadd.f32 %v850_v7, %v826_v43 }
 0x68c   :  { %v856_v22 = vadd.f32 %v851_v8, %v2611_v40 }
 0x68e   :  { %v858_v56 = vsel %vm53_vm0, %v856_v22, 0.0 }
 0x68f   :  { %859 = vadd.xlane.f32.xlu0 %v858_v56 }
 0x691   :  { %v853_v10 = vpop.f32.mrf.mxu3 }
 0x692   :  { %v854_v11 = vadd.f32 %v853_v10, %v826_v43 }
 0x694   :  { %v857_v13 = vadd.f32 %v854_v11, %v2618_v48  ;;  %v2060_v48 = vld [vmem:[%s3105_s4 + $0x38] sm:$0xff] }
 0x695   :  { %937 = vmatpush.msrb.mxu2 %v2060_v48 }
 0x696   :  { %v861_v14 = vsel %vm53_vm0, %v857_v13, 0.0 }
 0x697   :  { %862 = vadd.xlane.f32.xlu0 %v861_v14  ;;  %938 = vmatpush.msrb.mxu2 %v2059_v23 }
 0x699   :  { %939 = vmatpush.msrb.mxu2 %v2058_v24  ;;  %v2289_v24 = vld [vmem:[%s3108_s3 + $0x8] sm:$0xff] }
 0x69b   :  { %940 = vmatpush.msrb.mxu2 %v2057_v27 }
 0x702   :  { %v860_v55 = vpop.xlane.xlu0 %859 }
 0x703   :  { %v864_v15 = vmul.f32 %v860_v55, %v2580_v61 }
 0x705   :  { %v866_v0 = vsub.f32 %v856_v22, %v864_v15 }
 0x707   :  { %v868_v16 = vmul.f32 %v866_v0, %v866_v0 }
 0x709   :  { %v870_v18 = vsel %vm53_vm0, %v868_v16, 0.0 }
 0x70a   :  { %871 = vadd.xlane.f32.xlu2 %v870_v18  ;;  %v863_v19 = vpop.xlane.xlu0 %862 }
 0x70b   :  { %v865_v40 = vmul.f32 %v863_v19, %v2580_v61  ;;  %v2288_v19 = vld [vmem:[%s3108_s3] sm:$0xff]  ;;  %s3126_s3 = smov 48  }
 0x70d   :  { %v867_v20 = vsub.f32 %v857_v13, %v865_v40 }
 0x70f   :  { %v869_v25 = vmul.f32 %v867_v20, %v867_v20 }
 0x711   :  { %v873_v21 = vsel %vm53_vm0, %v869_v25, 0.0 }
 0x712   :  { %874 = vadd.xlane.f32.xlu0 %v873_v21 }
 0x77d   :  { %v872_v26 = vpop.xlane.xlu2 %871 }
 0x77e   :  { %v876_v28 = vmul.f32 %v872_v26, %v2580_v61 }
 0x780   :  { %v878_v29 = vadd.f32 1e-06, %v876_v28 }
 0x782   :  { %2226 = vrsqrt.f32 %v878_v29  ;;  %vm886_vm3 = vweird.f32 %v878_v29 }
 0x785   :  { %v875_v30 = vpop.xlane.xlu0 %874 }
 0x786   :  { %v877_v31 = vmul.f32 %v875_v30, %v2580_v61 }
 0x788   :  { %v2227_v32 = vpop.eup %2226  ;;  %v879_v34 = vadd.f32 1e-06, %v877_v31 }
 0x789   :  { %v881_v33 = vmul.f32 %v2227_v32, %v878_v29  ;;  %vm887_vm15 = vweird.f32 %v2227_v32 }
 0x78a   :  { %2228 = vrsqrt.f32 %v879_v34  ;;  %vm888_vm4 = vmor %vm886_vm3, %vm887_vm15  ;;  %vm896_vm6 = vweird.f32 %v879_v34 }
 0x78b   :  { %v882_v35 = vmul.f32 %v2227_v32, %v881_v33 }
 0x78d   :  { %v883_v36 = vmul.f32 0.5, %v882_v35 }
 0x78f   :  { %v884_v37 = vsub.f32 1.5, %v883_v36 }
 0x790   :  { %v2229_v38 = vpop.eup %2228 }
 0x791   :  { %v885_v39 = vmul.f32 %v2227_v32, %v884_v37  ;;  %v891_v42 = vmul.f32 %v2229_v38, %v879_v34  ;;  %vm897_vm5 = vweird.f32 %v2229_v38 }
 0x792   :  { %vm898_vm7 = vmor %vm896_vm6, %vm897_vm5 }
 0x793   :  { %v889_v44 = vsel %vm888_vm4, %v2227_v32, %v885_v39  ;;  %v892_v49 = vmul.f32 %v2229_v38, %v891_v42 }
 0x794   :  { %v900_v17 = vmul.f32 %v889_v44, %v866_v0 }
 0x795   :  { %v893_v53 = vmul.f32 0.5, %v892_v49 }
 0x796   :  { %v903_v51 = vmul.f32 %v902_v41, %v900_v17 }
 0x797   :  { %v894_v59 = vsub.f32 1.5, %v893_v53 }
 0x798   :  { %v906_v54 = vadd.f32 %v905_v47, %v903_v51 }
 0x799   :  { %v895_v6 = vmul.f32 %v2229_v38, %v894_v59 }
 0x79a   :  { %v908_v57 = vmul.f32 %v906_v54, %v2608_v12 }
 0x79b   :  { %v899_v60 = vsel %vm898_vm7, %v2229_v38, %v895_v6 }
 0x79c   :  { %v2684_v9 = vadd.f32 %v2286_v62, %v908_v57  ;;  %v901_v46 = vmul.f32 %v899_v60, %v867_v20 }
 0x79e   :  { %2061 = vmatmul.msk.f32.vlgmr.msrb.gmra.mxu2 %vm53_vm0, %v2684_v9  ;;  %v904_v63 = vmul.f32 %v902_v41, %v901_v46 }
 0x7a0   :  { %v907_v58 = vadd.f32 %v905_v47, %v904_v63 }
 0x7a2   :  { %v909_v50 = vmul.f32 %v907_v58, %v2615_v45 }
 0x7a4   :  { %v2692_v2 = vadd.f32 %v2287_v1, %v909_v50 }
 0x7a6   :  { %2062 = vmatmul.msk.f32.gmra.mxu2 %vm53_vm0, %v2692_v2 }
 0x821   :  { %v2696_v3 = vpop.f32.mrf.mxu2 }
 0x822   :  { %1312 = vrot.lane.b32.xlu2 %v2696_v3, %s2293_s16  ;;  %1068 = vrot.lane.b32.xlu1 %v2696_v3, %s2290_s14 }
 0x823   :  { %1072 = vrot.lane.b32.xlu0 %v2696_v3, %s2291_s15 }
 0x829   :  { %v2704_v4 = vpop.f32.mrf.mxu2 }
 0x82a   :  { %950 = vrot.lane.b32.xlu1 %v2696_v3, %s2292_s0  ;;  %v2762_v47 = vpack.i.bf16 %v2696_v3, %v2704_v4 }
 0x82b   :  { %1070 = vrot.lane.b32.xlu0 %v2704_v4, %s2290_s14 }
 0x832   :  { %1074 = vrot.lane.b32.xlu1 %v2704_v4, %s2291_s15 }
 0x833   :  { %1316 = vrot.lane.b32.xlu0 %v2696_v3, %s2294_s17 }
 0x83a   :  { %952 = vrot.lane.b32.xlu1 %v2704_v4, %s2292_s0 }
 0x83b   :  { %1194 = vrot.lane.b32.xlu0 %v2696_v3, %s2295_s18 }
 0x842   :  { %1318 = vrot.lane.b32.xlu1 %v2704_v4, %s2294_s17  ;;  %s3130_s17 = smov 16  }
 0x843   :  { %1190 = vrot.lane.b32.xlu0 %v2696_v3, %s2296_s19 }
 0x84a   :  { %1196 = vrot.lane.b32.xlu1 %v2704_v4, %s2295_s18  ;;  %s3131_s18 = smov 24  }
 0x852   :  { %1314 = vrot.lane.b32.xlu1 %v2704_v4, %s2293_s16  ;;  %s3129_s16 = smov 8  }
 0x85a   :  { %1192 = vrot.lane.b32.xlu1 %v2704_v4, %s2296_s19 }
 0x87c   :  { %v1313_v14 = vpop.permute.xlu2 %1312 }
 0x894   :  { %v1069_v5 = vpop.permute.xlu1 %1068 }
 0x895   :  { %v1073_v43 = vpop.permute.xlu0 %1072 }
 0x89c   :  { %v951_v7 = vpop.permute.xlu1 %950 }
 0x89d   :  { %v1071_v22 = vpop.permute.xlu0 %1070 }
 0x8a4   :  { %v1075_v8 = vpop.permute.xlu1 %1074 }
 0x8a5   :  { %2069 = vmatpush.xpose.msk.msra.mxu3 %vm89_vm1, %v1075_v8  ;;  %v1317_v10 = vpop.permute.xlu0 %1316 }
 0x8a9   :  { %2070 = vmatpush.xpose.msk.msra.mxu3 %vm89_vm1, %v1073_v43 }
 0x8ac   :  { %v953_v56 = vpop.permute.xlu1 %952  ;;  %2071 = vmatmul.msk.f32.vlgmr.msra.gmra.mxu3 %vm89_vm1, %v1069_v5 }
 0x8ad   :  { %2063 = vmatpush.xpose.msk.msrb.mxu0 %vm89_vm1, %v953_v56  ;;  %v1195_v13 = vpop.permute.xlu0 %1194 }
 0x8b1   :  { %2064 = vmatpush.xpose.msk.msrb.mxu0 %vm89_vm1, %v951_v7 }
 0x8b4   :  { %2065 = vmatmul.msk.f32.vlgmr.msrb.gmra.mxu0 %vm89_vm1, %v2696_v3  ;;  %v1319_v11 = vpop.permute.xlu1 %1318  ;;  %2072 = vmatmul.msk.f32.gmra.mxu3 %vm89_vm1, %v1071_v22 }
 0x8b5   :  { %2081 = vmatpush.xpose.msk.msrb.mxu3 %vm89_vm1, %v1319_v11  ;;  %v1191_v15 = vpop.permute.xlu0 %1190 }
 0x8b9   :  { %2082 = vmatpush.xpose.msk.msrb.mxu3 %vm89_vm1, %v1317_v10 }
 0x8bc   :  { %2066 = vmatmul.msk.f32.gmra.mxu0 %vm89_vm1, %v2704_v4  ;;  %v1197_v55 = vpop.permute.xlu1 %1196  ;;  %2083 = vmatmul.msk.f32.vlgmr.msrb.gmra.mxu3 %vm89_vm1, %v1313_v14 }
 0x8bd   :  { %2075 = vmatpush.xpose.msk.msra.mxu0 %vm89_vm1, %v1197_v55 }
 0x8c1   :  { %2076 = vmatpush.xpose.msk.msra.mxu0 %vm89_vm1, %v1195_v13 }
 0x8c4   :  { %v1315_v0 = vpop.permute.xlu1 %1314  ;;  %2077 = vmatmul.msk.f32.vlgmr.msra.gmra.mxu0 %vm89_vm1, %v1191_v15 }
 0x8c5   :  { %2084 = vmatmul.msk.f32.gmra.mxu3 %vm89_vm1, %v1315_v0 }
 0x8cc   :  { %v1193_v16 = vpop.permute.xlu1 %1192 }
 0x8cd   :  { %2078 = vmatmul.msk.f32.gmra.mxu0 %vm89_vm1, %v1193_v16 }
 0x92f   :  { %v1101_v18 = vpop.f32.mrf.mxu3 }
 0x930   :  { %v1102_v40 = vadd.f32 %v2288_v19, %v1101_v18 }
 0x931   :  { %v979_v20 = vpop.f32.mrf.mxu0 }
 0x932   :  { %v980_v25 = vadd.f32 %v2288_v19, %v979_v20  ;;  %v1107_v21 = vsel %vm121_vm2, %v1102_v40, -inf }
 0x933   :  { %1108 = vmax.xlane.f32.xlu0 %v1107_v21 }
 0x934   :  { %v985_v48 = vsel %vm121_vm2, %v980_v25, -inf }
 0x935   :  { %986 = vmax.xlane.f32.xlu2 %v985_v48 }
 0x937   :  { %v1104_v23 = vpop.f32.mrf.mxu3 }
 0x938   :  { %v1105_v26 = vadd.f32 %v2289_v24, %v1104_v23 }
 0x939   :  { %v982_v27 = vpop.f32.mrf.mxu0 }
 0x93a   :  { %v983_v28 = vadd.f32 %v2289_v24, %v982_v27  ;;  %v1110_v29 = vsel %vm121_vm2, %v1105_v26, -inf }
 0x93b   :  { %1111 = vmax.xlane.f32.xlu1 %v1110_v29 }
 0x93c   :  { %v988_v30 = vsel %vm121_vm2, %v983_v28, -inf }
 0x93d   :  { %989 = vmax.xlane.f32.xlu0 %v988_v30 }
 0x93f   :  { %v1345_v31 = vpop.f32.mrf.mxu3 }
 0x940   :  { %v1346_v32 = vadd.f32 %v2288_v19, %v1345_v31 }
 0x941   :  { %v1223_v33 = vpop.f32.mrf.mxu0 }
 0x942   :  { %v1224_v34 = vadd.f32 %v2288_v19, %v1223_v33  ;;  %v1351_v35 = vsel %vm121_vm2, %v1346_v32, -inf }
 0x943   :  { %1352 = vmax.xlane.f32.xlu2 %v1351_v35 }
 0x944   :  { %v1229_v36 = vsel %vm121_vm2, %v1224_v34, -inf }
 0x945   :  { %1230 = vmax.xlane.f32.xlu1 %v1229_v36 }
 0x948   :  { %v1348_v37 = vpop.f32.mrf.mxu3 }
 0x949   :  { %v1349_v38 = vadd.f32 %v2289_v24, %v1348_v37 }
 0x94a   :  { %v1226_v39 = vpop.f32.mrf.mxu0 }
 0x94b   :  { %v1227_v41 = vadd.f32 %v2289_v24, %v1226_v39  ;;  %v1354_v42 = vsel %vm121_vm2, %v1349_v38, -inf }
 0x94c   :  { %1355 = vmax.xlane.f32.xlu0 %v1354_v42 }
 0x94d   :  { %v1232_v44 = vsel %vm121_vm2, %v1227_v41, -inf }
 0x94e   :  { %1233 = vmax.xlane.f32.xlu2 %v1232_v44 }
 0x960   :  { %2165 = vrot.lane.b32.xlu0 %v2762_v47, %s2298_s25 }
 0x966   :  { %2160 = vrot.lane.b32.xlu2 %v2762_v47, %s2297_s24 }
 0x9a6   :  { %v1109_v17 = vpop.xlane.xlu0 %1108 }
 0x9a7   :  { %v1113_v49 = vsub.f32 %v1102_v40, %v1109_v17 }
 0x9a8   :  { %v987_v51 = vpop.xlane.xlu2 %986 }
 0x9a9   :  { %v1115_v53 = vmul.f32 1.442695, %v1113_v49  ;;  %v991_v54 = vsub.f32 %v980_v25, %v987_v51 }
 0x9ab   :  { %2230 = vpow2.f32 %v1115_v53  ;;  %v993_v59 = vmul.f32 1.442695, %v991_v54 }
 0x9ad   :  { %2232 = vpow2.f32 %v993_v59 }
 0x9ae   :  { %v1112_v6 = vpop.xlane.xlu1 %1111 }
 0x9af   :  { %v1114_v57 = vsub.f32 %v1105_v26, %v1112_v6 }
 0x9b0   :  { %v990_v60 = vpop.xlane.xlu0 %989 }
 0x9b1   :  { %v2768_v62 = vpop.eup %2230  ;;  %v1117_v46 = vmul.f32 1.442695, %v1114_v57  ;;  %v992_v63 = vsub.f32 %v983_v28, %v990_v60 }
 0x9b2   :  { %v1119_v58 = vsel %vm121_vm2, %v2768_v62, 0.0 }
 0x9b3   :  { %v2772_v50 = vpop.eup %2232  ;;  %2234 = vpow2.f32 %v1117_v46  ;;  %v995_v1 = vmul.f32 1.442695, %v992_v63  ;;  %1120 = vadd.xlane.f32.xlu1 %v1119_v58 }
 0x9b4   :  { %v997_v3 = vsel %vm121_vm2, %v2772_v50, 0.0 }
 0x9b5   :  { %2236 = vpow2.f32 %v995_v1  ;;  %998 = vadd.xlane.f32.xlu0 %v997_v3 }
 0x9b6   :  { %v1353_v4 = vpop.xlane.xlu2 %1352 }
 0x9b7   :  { %v1357_v5 = vsub.f32 %v1346_v32, %v1353_v4 }
 0x9b8   :  { %v1231_v43 = vpop.xlane.xlu1 %1230 }
 0x9b9   :  { %v2776_v7 = vpop.eup %2234  ;;  %v1359_v8 = vmul.f32 1.442695, %v1357_v5  ;;  %v1235_v22 = vsub.f32 %v1224_v34, %v1231_v43 }
 0x9ba   :  { %v1122_v56 = vsel %vm121_vm2, %v2776_v7, 0.0 }
 0x9bb   :  { %v2780_v10 = vpop.eup %2236  ;;  %2238 = vpow2.f32 %v1359_v8  ;;  %v1237_v11 = vmul.f32 1.442695, %v1235_v22  ;;  %1123 = vadd.xlane.f32.xlu2 %v1122_v56 }
 0x9bc   :  { %v1000_v13 = vsel %vm121_vm2, %v2780_v10, 0.0 }
 0x9bd   :  { %2240 = vpow2.f32 %v1237_v11  ;;  %1001 = vadd.xlane.f32.xlu1 %v1000_v13 }
 0x9bf   :  { %v1356_v14 = vpop.xlane.xlu0 %1355 }
 0x9c0   :  { %v1358_v55 = vsub.f32 %v1349_v38, %v1356_v14 }
 0x9c1   :  { %v2784_v15 = vpop.eup %2238  ;;  %v1234_v0 = vpop.xlane.xlu2 %1233 }
 0x9c2   :  { %v1361_v16 = vmul.f32 1.442695, %v1358_v55  ;;  %v1363_v18 = vsel %vm121_vm2, %v2784_v15, 0.0  ;;  %v1236_v40 = vsub.f32 %v1227_v41, %v1234_v0 }
 0x9c3   :  { %v2788_v19 = vpop.eup %2240  ;;  %1364 = vadd.xlane.f32.xlu0 %v1363_v18 }
 0x9c4   :  { %2242 = vpow2.f32 %v1361_v16  ;;  %v1241_v20 = vsel %vm121_vm2, %v2788_v19, 0.0  ;;  %v1239_v25 = vmul.f32 1.442695, %v1236_v40 }
 0x9c5   :  { %1242 = vadd.xlane.f32.xlu1 %v1241_v20 }
 0x9c6   :  { %2244 = vpow2.f32 %v1239_v25 }
 0x9c9   :  { %v2161_v21 = vpop.permute.xlu2 %2160 }
 0x9ca   :  { %v2792_v48 = vpop.eup %2242  ;;  %v2162_v23 = vunpack.i.l.bf16 %v2161_v21  ;;  %v2163_v26 = vunpack.i.h.bf16 %v2161_v21 }
 0x9cb   :  { %v1366_v24 = vsel %vm121_vm2, %v2792_v48, 0.0 }
 0x9cc   :  { %1181 = vmatpush.msra.mxu2 %v2162_v23  ;;  %v2796_v27 = vpop.eup %2244 }
 0x9cd   :  { %1367 = vadd.xlane.f32.xlu1 %v1366_v24  ;;  %v1244_v30 = vsel %vm121_vm2, %v2796_v27, 0.0 }
 0x9ce   :  { %1182 = vmatpush.msra.mxu2 %v2163_v26 }
 0x9d2   :  { %v2166_v28 = vpop.permute.xlu0 %2165 }
 0x9d3   :  { %v2167_v29 = vunpack.i.l.bf16 %v2166_v28  ;;  %2170 = vrot.lane.b32.xlu2 %v2762_v47, %s2300_s27  ;;  %v2168_v31 = vunpack.i.h.bf16 %v2166_v28 }
 0x9d5   :  { %1245 = vadd.xlane.f32.xlu1 %v1244_v30  ;;  %1059 = vmatpush.msrb.mxu1 %v2167_v29 }
 0x9d7   :  { %2175 = vrot.lane.b32.xlu0 %v2762_v47, %s3126_s3  ;;  %1060 = vmatpush.msrb.mxu1 %v2168_v31 }
 0xa26   :  { %v1121_v32 = vpop.xlane.xlu1 %1120 }
 0xa27   :  { %2246 = vrcp.f32 %v1121_v32  ;;  %v1134_v42 = vand.u32 2147483647, %v1121_v32  ;;  %v1136_v44 = vand.u32 2147483648, %v1121_v32  ;;  %vm1130_vm10 = vweird.f32 %v1121_v32 }
 0xa28   :  { %v999_v33 = vpop.xlane.xlu0 %998 }
 0xa29   :  { %2248 = vrcp.f32 %v999_v33  ;;  %v1012_v49 = vand.u32 2147483647, %v999_v33  ;;  %v1014_v51 = vand.u32 2147483648, %v999_v33  ;;  %vm1135_vm13 = vcmp.eq.f32.partialorder %v1134_v42, 8.507059e+37 }
 0xa2a   :  { %v1137_v57 = vor.u32 1.1754944e-38, %v1136_v44  ;;  %vm1008_vm14 = vweird.f32 %v999_v33 }
 0xa2b   :  { %vm1013_vm3 = vcmp.eq.f32.partialorder %v1012_v49, 8.507059e+37  ;;  %v1015_v4 = vor.u32 1.1754944e-38, %v1014_v51 }
 0xa2d   :  { %v2247_v34 = vpop.eup %2246 }
 0xa2e   :  { %v1126_v35 = vmul.f32 %v2247_v34, %v1121_v32  ;;  %v2804_v36 = vpop.xlane.xlu2 %1123  ;;  %vm1131_vm8 = vweird.f32 %v2247_v34 }
 0xa2f   :  { %v2249_v37 = vpop.eup %2248  ;;  %2250 = vrcp.f32 %v2804_v36  ;;  %vm2810_vm12 = vmor %vm1130_vm10, %vm1131_vm8  ;;  %v1151_v14 = vand.u32 2147483648, %v2804_v36  ;;  %v1149_v18 = vand.u32 2147483647, %v2804_v36  ;;  %vm1145_vm5 = vweird.f32 %v2804_v36 }
 0xa30   :  { %v1127_v38 = vsub.f32 1.0, %v1126_v35  ;;  %v1004_v39 = vmul.f32 %v2249_v37, %v999_v33  ;;  %v2807_v41 = vpop.xlane.xlu1 %1001  ;;  %vm1009_vm11 = vweird.f32 %v2249_v37 }
 0xa31   :  { %2252 = vrcp.f32 %v2807_v41  ;;  %vm1010_vm15 = vmor %vm1008_vm14, %vm1009_vm11  ;;  %v1029_v40 = vand.u32 2147483648, %v2807_v41  ;;  %v1027_v24 = vand.u32 2147483647, %v2807_v41  ;;  %v1152_v28 = vor.u32 1.1754944e-38, %v1151_v14 }
 0xa32   :  { %v1128_v47 = vmul.f32 %v2247_v34, %v1127_v38  ;;  %v1005_v17 = vsub.f32 1.0, %v1004_v39  ;;  %vm1150_vm8 = vcmp.eq.f32.partialorder %v1149_v18, 8.507059e+37  ;;  %vm1023_vm10 = vweird.f32 %v2807_v41 }
 0xa34   :  { %v1129_v53 = vadd.f32 %v2247_v34, %v1128_v47  ;;  %v1006_v54 = vmul.f32 %v2249_v37, %v1005_v17 }
 0xa35   :  { %v2251_v59 = vpop.eup %2250 }
 0xa36   :  { %v1133_v60 = vsel %vm2810_vm12, %v2247_v34, %v1129_v53  ;;  %v1007_v46 = vadd.f32 %v2249_v37, %v1006_v54  ;;  %v1141_v63 = vmul.f32 %v2251_v59, %v2804_v36  ;;  %v2171_v58 = vpop.permute.xlu2 %2170  ;;  %v2817_v1 = vpop.xlane.xlu0 %1364  ;;  %vm1146_vm4 = vweird.f32 %v2251_v59 }
 0xa37   :  { %v2253_v3 = vpop.eup %2252  ;;  %v2172_v5 = vunpack.i.l.bf16 %v2171_v58  ;;  %2254 = vrcp.f32 %v2817_v1  ;;  %v1138_v43 = vsel %vm1135_vm13, %v1137_v57, %v1133_v60  ;;  %v2173_v55 = vunpack.i.h.bf16 %v2171_v58  ;;  %vm1147_vm6 = vmor %vm1145_vm5, %vm1146_vm4 }
 0xa38   :  { %v1011_v8 = vsel %vm1010_vm15, %v2249_v37, %v1007_v46  ;;  %v1142_v22 = vsub.f32 1.0, %v1141_v63  ;;  %v1019_v56 = vmul.f32 %v2253_v3, %v2807_v41  ;;  %v2821_v11 = vpop.xlane.xlu1 %1242  ;;  %v1139_v20 = vmul.f32 %v2768_v62, %v1138_v43 }
 0xa39   :  { %v1016_v13 = vsel %vm1013_vm3, %v1015_v4, %v1011_v8  ;;  %2256 = vrcp.f32 %v2821_v11  ;;  %1425 = vmatpush.msrb.mxu2 %v2172_v5  ;;  %vm1024_vm7 = vweird.f32 %v2253_v3  ;;  %v1378_v34 = vand.u32 2147483647, %v2817_v1 }
 0xa3a   :  { %v1143_v0 = vmul.f32 %v2251_v59, %v1142_v22  ;;  %v1020_v16 = vsub.f32 1.0, %v1019_v56  ;;  %v1017_v21 = vmul.f32 %v2772_v50, %v1016_v13  ;;  %2073 = vmatmul.msk.f32.vlgmr.msra.gmra.mxu2 %vm121_vm2, %v1139_v20  ;;  %v1030_v50 = vor.u32 1.1754944e-38, %v1029_v40  ;;  %vm1025_vm11 = vmor %vm1023_vm10, %vm1024_vm7 }
 0xa3b   :  { %1426 = vmatpush.msrb.mxu2 %v2173_v55  ;;  %vm1028_vm12 = vcmp.eq.f32.partialorder %v1027_v24, 8.507059e+37  ;;  %v1380_v37 = vand.u32 2147483648, %v2817_v1  ;;  %vm1374_vm14 = vweird.f32 %v2817_v1  ;;  %v1258_v51 = vand.u32 2147483648, %v2821_v11 }
 0xa3c   :  { %v1021_v25 = vmul.f32 %v2253_v3, %v1020_v16  ;;  %v1144_v23 = vadd.f32 %v2251_v59, %v1143_v0  ;;  %2067 = vmatmul.msk.f32.vlgmr.msrb.gmra.mxu1 %vm121_vm2, %v1017_v21  ;;  %v1256_v54 = vand.u32 2147483647, %v2821_v11  ;;  %vm1379_vm4 = vcmp.eq.f32.partialorder %v1378_v34, 8.507059e+37  ;;  %v2089_v34 = vld [vmem:[%s3109_s5 + $0x30] sm:$0xff] }
 0xa3d   :  { %v2255_v26 = vpop.eup %2254  ;;  %v1381_v53 = vor.u32 1.1754944e-38, %v1380_v37  ;;  %vm1252_vm5 = vweird.f32 %v2821_v11  ;;  %v1259_v60 = vor.u32 1.1754944e-38, %v1258_v51 }
 0xa3e   :  { %v1370_v29 = vmul.f32 %v2255_v26, %v2817_v1  ;;  %v1148_v30 = vsel %vm1147_vm6, %v2251_v59, %v1144_v23  ;;  %v1022_v62 = vadd.f32 %v2253_v3, %v1021_v25  ;;  %vm1375_vm13 = vweird.f32 %v2255_v26 }
 0xa3f   :  { %v2257_v31 = vpop.eup %2256  ;;  %v1153_v32 = vsel %vm1150_vm8, %v1152_v28, %v1148_v30  ;;  %vm1376_vm3 = vmor %vm1374_vm14, %vm1375_vm13  ;;  %vm1257_vm7 = vcmp.eq.f32.partialorder %v1256_v54, 8.507059e+37 }
 0xa40   :  { %v1371_v33 = vsub.f32 1.0, %v1370_v29  ;;  %v1248_v35 = vmul.f32 %v2257_v31, %v2821_v11  ;;  %v1368_v36 = vpop.xlane.xlu1 %1367  ;;  %v1154_v38 = vmul.f32 %v2776_v7, %v1153_v32  ;;  %v1026_v39 = vsel %vm1025_vm11, %v2253_v3, %v1022_v62 }
 0xa41   :  { %2258 = vrcp.f32 %v1368_v36  ;;  %v1031_v41 = vsel %vm1028_vm12, %v1030_v50, %v1026_v39  ;;  %vm1253_vm15 = vweird.f32 %v2257_v31  ;;  %v1395_v43 = vand.u32 2147483648, %v1368_v36 }
 0xa42   :  { %v1372_v42 = vmul.f32 %v2255_v26, %v1371_v33  ;;  %v1249_v44 = vsub.f32 1.0, %v1248_v35  ;;  %v1032_v47 = vmul.f32 %v2780_v10, %v1031_v41  ;;  %2074 = vmatmul.msk.f32.gmra.mxu2 %vm121_vm2, %v1154_v38  ;;  %vm1254_vm6 = vmor %vm1252_vm5, %vm1253_vm15  ;;  %v1393_v56 = vand.u32 2147483647, %v1368_v36  ;;  %v2090_v33 = vld [vmem:[%s3109_s5 + $0x38] sm:$0xff]  ;;  %v2088_v35 = vld [vmem:[%s3109_s5 + $0x28] sm:$0xff] }
 0xa43   :  { %vm1389_vm10 = vweird.f32 %v1368_v36  ;;  %v1396_v55 = vor.u32 1.1754944e-38, %v1395_v43  ;;  %1488 = vmatpush.msrb.mxu0 %v2090_v33 }
 0xa44   :  { %v1373_v17 = vadd.f32 %v2255_v26, %v1372_v42  ;;  %v1250_v49 = vmul.f32 %v2257_v31, %v1249_v44  ;;  %2068 = vmatmul.msk.f32.gmra.mxu1 %vm121_vm2, %v1032_v47  ;;  %vm1394_vm12 = vcmp.eq.f32.partialorder %v1393_v56, 8.507059e+37 }
 0xa45   :  { %1489 = vmatpush.msrb.mxu0 %v2089_v34 }
 0xa46   :  { %v1377_v7 = vsel %vm1376_vm3, %v2255_v26, %v1373_v17  ;;  %v1251_v59 = vadd.f32 %v2257_v31, %v1250_v49 }
 0xa47   :  { %v2259_v6 = vpop.eup %2258  ;;  %v1382_v10 = vsel %vm1379_vm4, %v1381_v53, %v1377_v7  ;;  %1490 = vmatpush.msrb.mxu0 %v2088_v35  ;;  %v2883_v7 = vld [vmem:[%s3110_s7 + $0x8] sm:$0x7f] }
 0xa48   :  { %v1255_v57 = vsel %vm1254_vm6, %v2257_v31, %v1251_v59  ;;  %v1385_v46 = vmul.f32 %v2259_v6, %v1368_v36  ;;  %v1246_v63 = vpop.xlane.xlu1 %1245  ;;  %v1383_v1 = vmul.f32 %v2784_v15, %v1382_v10  ;;  %vm1390_vm8 = vweird.f32 %v2259_v6  ;;  %v2087_v36 = vld [vmem:[%s3109_s5 + $0x20] sm:$0xff] }
 0xa49   :  { %2260 = vrcp.f32 %v1246_v63  ;;  %v2176_v58 = vpop.permute.xlu0 %2175  ;;  %v1260_v3 = vsel %vm1257_vm7, %v1259_v60, %v1255_v57  ;;  %vm1391_vm11 = vmor %vm1389_vm10, %vm1390_vm8  ;;  %v1273_v20 = vand.u32 2147483648, %v1246_v63  ;;  %v1271_v21 = vand.u32 2147483647, %v1246_v63  ;;  %1491 = vmatpush.msrb.mxu0 %v2087_v36 }
 0xa4a   :  { %v1386_v4 = vsub.f32 1.0, %v1385_v46  ;;  %v2177_v5 = vunpack.i.l.bf16 %v2176_v58  ;;  %v2178_v22 = vunpack.i.h.bf16 %v2176_v58  ;;  %2085 = vmatmul.msk.f32.vlgmr.msrb.gmra.mxu2 %vm121_vm2, %v1383_v1  ;;  %v1261_v11 = vmul.f32 %v2788_v19, %v1260_v3 }
 0xa4b   :  { %vm1267_vm14 = vweird.f32 %v1246_v63  ;;  %v1274_v23 = vor.u32 1.1754944e-38, %v1273_v20  ;;  %vm1272_vm3 = vcmp.eq.f32.partialorder %v1271_v21, 8.507059e+37  ;;  %v1469_v59 = vperm.slane %v2883_v7, 0 }
 0xa4c   :  { %v1387_v8 = vmul.f32 %v2259_v6, %v1386_v4  ;;  %1303 = vmatpush.msra.mxu1 %v2177_v5 }
 0xa4e   :  { %1304 = vmatpush.msra.mxu1 %v2178_v22  ;;  %v1388_v13 = vadd.f32 %v2259_v6, %v1387_v8 }
 0xa4f   :  { %v2261_v14 = vpop.eup %2260  ;;  %2079 = vmatmul.msk.f32.vlgmr.msra.gmra.mxu1 %vm121_vm2, %v1261_v11 }
 0xa50   :  { %v1263_v15 = vmul.f32 %v2261_v14, %v1246_v63  ;;  %v1392_v0 = vsel %vm1391_vm11, %v2259_v6, %v1388_v13  ;;  %vm1268_vm13 = vweird.f32 %v2261_v14 }
 0xa51   :  { %v1397_v16 = vsel %vm1394_vm12, %v1396_v55, %v1392_v0  ;;  %vm1269_vm15 = vmor %vm1267_vm14, %vm1268_vm13  ;;  %v2094_v55 = vld [vmem:[%s3112_s6 + $0x48] sm:$0xff] }
 0xa52   :  { %v1264_v18 = vsub.f32 1.0, %v1263_v15  ;;  %v1398_v40 = vmul.f32 %v2792_v48, %v1397_v16  ;;  %v2093_v15 = vld [vmem:[%s3112_s6 + $0x40] sm:$0xff] }
 0xa54   :  { %v1265_v25 = vmul.f32 %v2261_v14, %v1264_v18  ;;  %2086 = vmatmul.msk.f32.gmra.mxu2 %vm121_vm2, %v1398_v40 }
 0xa56   :  { %v1266_v19 = vadd.f32 %v2261_v14, %v1265_v25 }
 0xa58   :  { %v1270_v24 = vsel %vm1269_vm15, %v2261_v14, %v1266_v19  ;;  %v2095_v14 = vld [vmem:[%s3112_s6 + $0x50] sm:$0xff] }
 0xa59   :  { %v1275_v26 = vsel %vm1272_vm3, %v1274_v23, %v1270_v24 }
 0xa5a   :  { %v1276_v28 = vmul.f32 %v2796_v27, %v1275_v26 }
 0xa5c   :  { %2080 = vmatmul.msk.f32.gmra.mxu1 %vm121_vm2, %v1276_v28 }
 0xab9   :  { %v1062_v29 = vpop.f32.mrf.mxu1 }
 0xabd   :  { %v1184_v30 = vpop.f32.mrf.mxu2 }
 0xabe   :  { %1436 = vrot.lane.b32.xlu1 %v1184_v30, %s3129_s16  ;;  %v1545_v30 = vperm.slane %v2883_v7, 1 }
 0xac1   :  { %v1065_v48 = vpop.f32.mrf.mxu1 }
 0xac5   :  { %v1187_v62 = vpop.f32.mrf.mxu2 }
 0xacc   :  { %v1306_v31 = vpop.f32.mrf.mxu1 }
 0xacd   :  { %1444 = vrot.lane.b32.xlu2 %v1306_v31, %s3130_s17  ;;  %v1428_v50 = vpop.f32.mrf.mxu2  ;;  %v1548_v31 = vperm.slane %v2883_v7, 2 }
 0xace   :  { %1452 = vrot.lane.b32.xlu0 %v1428_v50, %s3131_s18 }
 0xad5   :  { %1438 = vrot.lane.b32.xlu2 %v1187_v62, %s3129_s16 }
 0xad7   :  { %v1431_v27 = vpop.f32.mrf.mxu2 }
 0xad9   :  { %v1309_v32 = vpop.f32.mrf.mxu1 }
 0xada   :  { %1446 = vrot.lane.b32.xlu0 %v1309_v32, %s3130_s17 }
 0xadd   :  { %1454 = vrot.lane.b32.xlu2 %v1431_v27, %s3131_s18 }
 0xb27   :  { %v1445_v37 = vpop.permute.xlu2 %1444 }
 0xb2f   :  { %v1439_v42 = vpop.permute.xlu2 %1438 }
 0xb30   :  { %v1437_v38 = vpop.permute.xlu1 %1436  ;;  %v1459_v17 = vsel %vm89_vm1, %v1065_v48, %v1439_v42 }
 0xb31   :  { %v1458_v39 = vsel %vm89_vm1, %v1062_v29, %v1437_v38 }
 0xb32   :  { %v1460_v41 = vsel %vm121_vm2, %v1458_v39, %v1445_v37 }
 0xb37   :  { %v1455_v51 = vpop.permute.xlu2 %1454 }
 0xb40   :  { %v1453_v44 = vpop.permute.xlu0 %1452 }
 0xb41   :  { %v1462_v47 = vsel %vm599_vm9, %v1460_v41, %v1453_v44 }
 0xb42   :  { %2091 = vmatmul.msk.f32.vlgmr.msrb.gmra.mxu0 %vm53_vm0, %v1462_v47  ;;  %v1558_v47 = vperm.slane %v2883_v7, 3 }
 0xb4c   :  { %v1447_v49 = vpop.permute.xlu0 %1446 }
 0xb4d   :  { %v1461_v53 = vsel %vm121_vm2, %v1459_v17, %v1447_v49 }
 0xb4e   :  { %v1463_v54 = vsel %vm599_vm9, %v1461_v53, %v1455_v51 }
 0xb4f   :  { %2092 = vmatmul.msk.f32.gmra.mxu0 %vm53_vm0, %v1463_v54 }
 0xbbf   :  { %v1493_v6 = vpop.f32.mrf.mxu0 }
 0xbc0   :  { %v1494_v10 = vadd.f32 %v1493_v6, %v1469_v59 }
 0xbc2   :  { %v1499_v57 = vadd.f32 %v1494_v10, %v2684_v9 }
 0xbc4   :  { %v1501_v60 = vsel %vm53_vm0, %v1499_v57, 0.0 }
 0xbc5   :  { %1502 = vadd.xlane.f32.xlu0 %v1501_v60 }
 0xbcc   :  { %v1496_v46 = vpop.f32.mrf.mxu0 }
 0xbcd   :  { %v1497_v63 = vadd.f32 %v1496_v46, %v1469_v59 }
 0xbcf   :  { %v1500_v58 = vadd.f32 %v1497_v63, %v2692_v2  ;;  %v2096_v2 = vld [vmem:[%s3112_s6 + $0x58] sm:$0xff] }
 0xbd0   :  { %1577 = vmatpush.msrb.mxu1 %v2096_v2 }
 0xbd1   :  { %v1504_v1 = vsel %vm53_vm0, %v1500_v58, 0.0 }
 0xbd2   :  { %1505 = vadd.xlane.f32.xlu1 %v1504_v1  ;;  %1578 = vmatpush.msrb.mxu1 %v2095_v14  ;;  %v2102_v1 = vld [vmem:[%s3112_s6 + $0x78] sm:$0xff] }
 0xbd3   :  { %1692 = vmatpush.msra.mxu3 %v2102_v1 }
 0xbd4   :  { %1579 = vmatpush.msrb.mxu1 %v2094_v55 }
 0xbd6   :  { %1580 = vmatpush.msrb.mxu1 %v2093_v15 }
 0xc38   :  { %v1503_v3 = vpop.xlane.xlu0 %1502 }
 0xc39   :  { %v1507_v4 = vmul.f32 %v1503_v3, %v2580_v61 }
 0xc3b   :  { %v1509_v5 = vsub.f32 %v1499_v57, %v1507_v4 }
 0xc3d   :  { %v1511_v43 = vmul.f32 %v1509_v5, %v1509_v5 }
 0xc3f   :  { %v1513_v8 = vsel %vm53_vm0, %v1511_v43, 0.0 }
 0xc40   :  { %1514 = vadd.xlane.f32.xlu2 %v1513_v8 }
 0xc45   :  { %v1506_v22 = vpop.xlane.xlu1 %1505 }
 0xc46   :  { %v1508_v9 = vmul.f32 %v1506_v22, %v2580_v61 }
 0xc48   :  { %v1510_v56 = vsub.f32 %v1500_v58, %v1508_v9  ;;  %v2100_v9 = vld [vmem:[%s3112_s6 + $0x68] sm:$0xff] }
 0xc4a   :  { %v1512_v11 = vmul.f32 %v1510_v56, %v1510_v56 }
 0xc4c   :  { %v1516_v13 = vsel %vm53_vm0, %v1512_v11, 0.0 }
 0xc4d   :  { %1517 = vadd.xlane.f32.xlu0 %v1516_v13 }
 0xcb3   :  { %v1515_v0 = vpop.xlane.xlu2 %1514 }
 0xcb4   :  { %v1519_v16 = vmul.f32 %v1515_v0, %v2580_v61 }
 0xcb6   :  { %v1521_v18 = vadd.f32 1e-06, %v1519_v16 }
 0xcb8   :  { %2262 = vrsqrt.f32 %v1521_v18  ;;  %vm1529_vm2 = vweird.f32 %v1521_v18 }
 0xcbe   :  { %v2263_v20 = vpop.eup %2262 }
 0xcbf   :  { %v1524_v21 = vmul.f32 %v2263_v20, %v1521_v18  ;;  %vm1530_vm1 = vweird.f32 %v2263_v20 }
 0xcc0   :  { %v1518_v40 = vpop.xlane.xlu0 %1517  ;;  %vm1531_vm9 = vmor %vm1529_vm2, %vm1530_vm1 }
 0xcc1   :  { %v1520_v25 = vmul.f32 %v1518_v40, %v2580_v61  ;;  %v1525_v23 = vmul.f32 %v2263_v20, %v1524_v21 }
 0xcc3   :  { %v1522_v19 = vadd.f32 1e-06, %v1520_v25  ;;  %v1526_v24 = vmul.f32 0.5, %v1525_v23 }
 0xcc5   :  { %2264 = vrsqrt.f32 %v1522_v19  ;;  %v1527_v26 = vsub.f32 1.5, %v1526_v24  ;;  %vm1539_vm5 = vweird.f32 %v1522_v19 }
 0xcc7   :  { %v1528_v28 = vmul.f32 %v2263_v20, %v1527_v26 }
 0xcc9   :  { %v1532_v48 = vsel %vm1531_vm9, %v2263_v20, %v1528_v28 }
 0xcca   :  { %v1543_v50 = vmul.f32 %v1532_v48, %v1509_v5  ;;  %v2101_v5 = vld [vmem:[%s3112_s6 + $0x70] sm:$0xff] }
 0xccb   :  { %v2265_v29 = vpop.eup %2264  ;;  %1693 = vmatpush.msra.mxu3 %v2101_v5 }
 0xccc   :  { %v1534_v62 = vmul.f32 %v2265_v29, %v1522_v19  ;;  %v1546_v27 = vmul.f32 %v1545_v30, %v1543_v50  ;;  %vm1540_vm4 = vweird.f32 %v2265_v29 }
 0xccd   :  { %vm1541_vm6 = vmor %vm1539_vm5, %vm1540_vm4  ;;  %1694 = vmatpush.msra.mxu3 %v2100_v9 }
 0xcce   :  { %v1535_v32 = vmul.f32 %v2265_v29, %v1534_v62  ;;  %v1549_v34 = vadd.f32 %v1548_v31, %v1546_v27 }
 0xcd0   :  { %v1536_v33 = vmul.f32 0.5, %v1535_v32  ;;  %v2911_v36 = vmul.f32 %v1549_v34, %v2608_v12 }
 0xcd2   :  { %v1537_v35 = vsub.f32 1.5, %v1536_v33  ;;  %2097 = vmatmul.msk.f32.vlgmr.msrb.gmra.mxu1 %vm53_vm0, %v2911_v36 }
 0xcd4   :  { %v1538_v37 = vmul.f32 %v2265_v29, %v1537_v35 }
 0xcd6   :  { %v1542_v38 = vsel %vm1541_vm6, %v2265_v29, %v1538_v37 }
 0xcd7   :  { %v1544_v39 = vmul.f32 %v1542_v38, %v1510_v56  ;;  %v2099_v56 = vld [vmem:[%s3112_s6 + $0x60] sm:$0xff] }
 0xcd8   :  { %1695 = vmatpush.msra.mxu3 %v2099_v56 }
 0xcd9   :  { %v1547_v42 = vmul.f32 %v1545_v30, %v1544_v39 }
 0xcdb   :  { %v1550_v44 = vadd.f32 %v1548_v31, %v1547_v42 }
 0xcdd   :  { %v2916_v41 = vmul.f32 %v1550_v44, %v2615_v45 }
 0xcdf   :  { %2098 = vmatmul.msk.f32.gmra.mxu1 %vm53_vm0, %v2916_v41 }
 0xd4f   :  { %v1582_v17 = vpop.f32.mrf.mxu1 }
 0xd50   :  { %v2921_v49 = vadd.f32 %v1582_v17, %v1558_v47 }
 0xd52   :  { %v2924_v51 = vmul.f32 0.70710677, %v2921_v49 }
 0xd54   :  { %v1596_v53 = vand.u32 2147483647, %v2924_v51  ;;  %vm1592_vm3 = vcmp.ge.f32.partialorder %v2924_v51, 0.0 }
 0xd56   :  { %v1598_v54 = vmul.f32 0.3275911, %v1596_v53  ;;  %v1650_v55 = vsub.f32 0.0, %v1596_v53 }
 0xd58   :  { %v1600_v59 = vadd.f32 1.0, %v1598_v54  ;;  %v1652_v40 = vmul.f32 %v1650_v55, %v1596_v53  ;;  %v1594_v54 = vsel %vm1592_vm3, 1.0, %v2306_v52 }
 0xd5a   :  { %2266 = vrcp.f32 %v1600_v59  ;;  %v1613_v43 = vand.u32 2147483648, %v1600_v59  ;;  %v1611_v22 = vand.u32 2147483647, %v1600_v59  ;;  %vm1607_vm8 = vweird.f32 %v1600_v59 }
 0xd5b   :  { %v1654_v26 = vmul.f32 1.442695, %v1652_v40 }
 0xd5c   :  { %v1585_v6 = vpop.f32.mrf.mxu1  ;;  %v1614_v13 = vor.u32 1.1754944e-38, %v1613_v43  ;;  %vm1612_vm11 = vcmp.eq.f32.partialorder %v1611_v22, 8.507059e+37 }
 0xd5d   :  { %v2927_v10 = vadd.f32 %v1585_v6, %v1558_v47 }
 0xd5f   :  { %v2930_v57 = vmul.f32 0.70710677, %v2927_v10  ;;  %v1589_v22 = vmul.f32 0.5, %v2927_v10 }
 0xd60   :  { %v2267_v46 = vpop.eup %2266 }
 0xd61   :  { %v1597_v60 = vand.u32 2147483647, %v2930_v57  ;;  %v1603_v63 = vmul.f32 %v2267_v46, %v1600_v59  ;;  %vm1608_vm7 = vweird.f32 %v2267_v46  ;;  %vm1593_vm1 = vcmp.ge.f32.partialorder %v2930_v57, 0.0 }
 0xd62   :  { %vm1609_vm10 = vmor %vm1607_vm8, %vm1608_vm7  ;;  %v1595_v43 = vsel %vm1593_vm1, 1.0, %v2306_v52 }
 0xd63   :  { %v1599_v58 = vmul.f32 0.3275911, %v1597_v60  ;;  %v1604_v3 = vsub.f32 1.0, %v1603_v63  ;;  %v1651_v31 = vsub.f32 0.0, %v1597_v60  ;;  %v1588_v63 = vmul.f32 0.5, %v2921_v49 }
 0xd64   :  { %v1673_v49 = vperm.slane %v2883_v7, 4 }
 0xd65   :  { %v1601_v4 = vadd.f32 1.0, %v1599_v58  ;;  %v1605_v8 = vmul.f32 %v2267_v46, %v1604_v3  ;;  %v1653_v35 = vmul.f32 %v1651_v31, %v1597_v60 }
 0xd67   :  { %2268 = vrcp.f32 %v1601_v4  ;;  %v1606_v11 = vadd.f32 %v2267_v46, %v1605_v8  ;;  %v1628_v21 = vand.u32 2147483648, %v1601_v4  ;;  %v1626_v23 = vand.u32 2147483647, %v1601_v4 }
 0xd68   :  { %vm1622_vm13 = vweird.f32 %v1601_v4  ;;  %2270 = vpow2.f32 %v1654_v26  ;;  %v1656_v47 = vmul.f32 1.442695, %v1653_v35  ;;  %v2109_v26 = vld [vmem:[%s3113_s8 + $0x30] sm:$0xff] }
 0xd69   :  { %v1610_v2 = vsel %vm1609_vm10, %v2267_v46, %v1606_v11  ;;  %v1629_v30 = vor.u32 1.1754944e-38, %v1628_v21  ;;  %vm1627_vm15 = vcmp.eq.f32.partialorder %v1626_v23, 8.507059e+37  ;;  %v2110_v23 = vld [vmem:[%s3113_s8 + $0x38] sm:$0xff] }
 0xd6a   :  { %v1615_v14 = vsel %vm1612_vm11, %v1614_v13, %v1610_v2  ;;  %2272 = vpow2.f32 %v1656_v47  ;;  %1864 = vmatpush.msra.mxu0 %v2110_v23 }
 0xd6b   :  { %v1632_v0 = vmul.f32 1.0614054, %v1615_v14 }
 0xd6c   :  { %1865 = vmatpush.msra.mxu0 %v2109_v26 }
 0xd6d   :  { %v2269_v15 = vpop.eup %2268  ;;  %v1634_v18 = vadd.f32 -1.4531521, %v1632_v0 }
 0xd6e   :  { %v1618_v16 = vmul.f32 %v2269_v15, %v1601_v4  ;;  %vm1623_vm12 = vweird.f32 %v2269_v15  ;;  %v2271_v39 = vpop.eup %2270 }
 0xd6f   :  { %v1636_v25 = vmul.f32 %v1634_v18, %v1615_v14  ;;  %vm1624_vm14 = vmor %vm1622_vm13, %vm1623_vm12 }
 0xd70   :  { %v1619_v20 = vsub.f32 1.0, %v1618_v16  ;;  %v2273_v4 = vpop.eup %2272 }
 0xd71   :  { %v1638_v24 = vadd.f32 1.4214138, %v1636_v25 }
 0xd72   :  { %v1620_v19 = vmul.f32 %v2269_v15, %v1619_v20 }
 0xd73   :  { %v1640_v29 = vmul.f32 %v1638_v24, %v1615_v14  ;;  %v1760_v24 = vld [vmem:[%s3113_s8 + $0x10] sm:$0xff] }
 0xd74   :  { %v1621_v28 = vadd.f32 %v2269_v15, %v1620_v19 }
 0xd75   :  { %v1642_v62 = vadd.f32 -0.28449672, %v1640_v29  ;;  %v2108_v29 = vld [vmem:[%s3113_s8 + $0x28] sm:$0xff] }
 0xd76   :  { %v1625_v48 = vsel %vm1624_vm14, %v2269_v15, %v1621_v28  ;;  %v1759_v28 = vld [vmem:[%s3113_s8 + $0x8] sm:$0xff]  ;;  %1866 = vmatpush.msra.mxu0 %v2108_v29 }
 0xd77   :  { %v1630_v50 = vsel %vm1627_vm15, %v1629_v30, %v1625_v48  ;;  %v1644_v27 = vmul.f32 %v1642_v62, %v1615_v14  ;;  %v1758_v30 = vld [vmem:[%s3113_s8] sm:$0xff] }
 0xd78   :  { %v1633_v32 = vmul.f32 1.0614054, %v1630_v50  ;;  %v2107_v48 = vld [vmem:[%s3113_s8 + $0x20] sm:$0xff] }
 0xd79   :  { %v1646_v34 = vadd.f32 0.2548296, %v1644_v27  ;;  %1867 = vmatpush.msra.mxu0 %v2107_v48 }
 0xd7a   :  { %v1635_v33 = vadd.f32 -1.4531521, %v1633_v32 }
 0xd7b   :  { %v1648_v38 = vmul.f32 %v1646_v34, %v1615_v14 }
 0xd7c   :  { %v1637_v37 = vmul.f32 %v1635_v33, %v1630_v50 }
 0xd7d   :  { %v1658_v44 = vmul.f32 %v2271_v39, %v1648_v38 }
 0xd7e   :  { %v1639_v42 = vadd.f32 1.4214138, %v1637_v37 }
 0xd7f   :  { %v1660_v53 = vsub.f32 1.0, %v1658_v44  ;;  %v1749_v44 = vperm.slane %v2883_v7, 5 }
 0xd80   :  { %v1641_v17 = vmul.f32 %v1639_v42, %v1630_v50 }
 0xd81   :  { %v1662_v6 = vmul.f32 %v1660_v53, %v1594_v54  ;;  %v1752_v53 = vperm.slane %v2883_v7, 6 }
 0xd82   :  { %v1643_v59 = vadd.f32 -0.28449672, %v1641_v17 }
 0xd83   :  { %v1664_v58 = vadd.f32 1.0, %v1662_v6 }
 0xd84   :  { %v1645_v46 = vmul.f32 %v1643_v59, %v1630_v50 }
 0xd85   :  { %v1666_v1 = vmul.f32 %v1664_v58, %v1588_v63 }
 0xd86   :  { %v1647_v60 = vadd.f32 0.2548296, %v1645_v46 }
 0xd87   :  { %2103 = vmatmul.msk.f32.vlgmr.msra.gmra.mxu3 %vm53_vm0, %v1666_v1 }
 0xd88   :  { %v1649_v3 = vmul.f32 %v1647_v60, %v1630_v50 }
 0xd8a   :  { %v1659_v51 = vmul.f32 %v2273_v4, %v1649_v3 }
 0xd8c   :  { %v1661_v5 = vsub.f32 1.0, %v1659_v51 }
 0xd8e   :  { %v1663_v8 = vmul.f32 %v1661_v5, %v1595_v43 }
 0xd90   :  { %v1665_v9 = vadd.f32 1.0, %v1663_v8  ;;  %v3007_v8 = vld [vmem:[%s3114_s9] sm:$0x7f] }
 0xd92   :  { %v1667_v56 = vmul.f32 %v1665_v9, %v1589_v22  ;;  %v1851_v22 = vperm.slane %v3007_v8, 3 }
 0xd94   :  { %2104 = vmatmul.msk.f32.gmra.mxu3 %vm53_vm0, %v1667_v56 }
 0xe0a   :  { %v1697_v11 = vpop.f32.mrf.mxu3 }
 0xe0b   :  { %v1698_v13 = vadd.f32 %v1697_v11, %v1673_v49  ;;  %v1762_v11 = vperm.slane %v3007_v8, 0 }
 0xe0d   :  { %v1703_v2 = vadd.f32 %v1698_v13, %v2911_v36 }
 0xe0f   :  { %v1705_v14 = vsel %vm53_vm0, %v1703_v2, 0.0 }
 0xe10   :  { %1706 = vadd.xlane.f32.xlu1 %v1705_v14 }
 0xe17   :  { %v1700_v57 = vpop.f32.mrf.mxu3 }
 0xe18   :  { %v1701_v55 = vadd.f32 %v1700_v57, %v1673_v49 }
 0xe1a   :  { %v1704_v52 = vadd.f32 %v1701_v55, %v2916_v41  ;;  %v1761_v41 = vld [vmem:[%s3113_s8 + $0x18] sm:$0xff] }
 0xe1b   :  { %1781 = vmatpush.msra.mxu2 %v1761_v41 }
 0xe1c   :  { %v1708_v15 = vsel %vm53_vm0, %v1704_v52, 0.0 }
 0xe1d   :  { %1709 = vadd.xlane.f32.xlu2 %v1708_v15  ;;  %1782 = vmatpush.msra.mxu2 %v1760_v24 }
 0xe1f   :  { %1783 = vmatpush.msra.mxu2 %v1759_v28 }
 0xe21   :  { %1784 = vmatpush.msra.mxu2 %v1758_v30 }
 0xe83   :  { %v1707_v10 = vpop.xlane.xlu1 %1706 }
 0xe84   :  { %v1711_v0 = vmul.f32 %v1707_v10, %v2580_v61 }
 0xe86   :  { %v1713_v16 = vsub.f32 %v1703_v2, %v1711_v0 }
 0xe88   :  { %v1715_v18 = vmul.f32 %v1713_v16, %v1713_v16 }
 0xe8a   :  { %v1717_v40 = vsel %vm53_vm0, %v1715_v18, 0.0 }
 0xe8b   :  { %1718 = vadd.xlane.f32.xlu0 %v1717_v40 }
 0xe90   :  { %v1710_v20 = vpop.xlane.xlu2 %1709 }
 0xe91   :  { %v1712_v36 = vmul.f32 %v1710_v20, %v2580_v61 }
 0xe93   :  { %v1714_v25 = vsub.f32 %v1704_v52, %v1712_v36 }
 0xe95   :  { %v1716_v21 = vmul.f32 %v1714_v25, %v1714_v25 }
 0xe97   :  { %v1720_v19 = vsel %vm53_vm0, %v1716_v21, 0.0 }
 0xe98   :  { %1721 = vadd.xlane.f32.xlu1 %v1720_v19 }
 0xefe   :  { %v1719_v62 = vpop.xlane.xlu0 %1718 }
 0xeff   :  { %v1723_v31 = vmul.f32 %v1719_v62, %v2580_v61 }
 0xf01   :  { %v1725_v50 = vadd.f32 1e-06, %v1723_v31 }
 0xf03   :  { %2274 = vrsqrt.f32 %v1725_v50  ;;  %vm1733_vm9 = vweird.f32 %v1725_v50 }
 0xf09   :  { %v2275_v32 = vpop.eup %2274 }
 0xf0a   :  { %v1728_v33 = vmul.f32 %v2275_v32, %v1725_v50  ;;  %vm1734_vm2 = vweird.f32 %v2275_v32 }
 0xf0b   :  { %v1722_v27 = vpop.xlane.xlu1 %1721  ;;  %vm1735_vm4 = vmor %vm1733_vm9, %vm1734_vm2 }
 0xf0c   :  { %v1724_v34 = vmul.f32 %v1722_v27, %v2580_v61  ;;  %v1729_v35 = vmul.f32 %v2275_v32, %v1728_v33 }
 0xf0e   :  { %v1726_v37 = vadd.f32 1e-06, %v1724_v34  ;;  %v1730_v38 = vmul.f32 0.5, %v1729_v35 }
 0xf10   :  { %2276 = vrsqrt.f32 %v1726_v37  ;;  %v1731_v39 = vsub.f32 1.5, %v1730_v38  ;;  %vm1743_vm6 = vweird.f32 %v1726_v37 }
 0xf12   :  { %v1732_v42 = vmul.f32 %v2275_v32, %v1731_v39 }
 0xf14   :  { %v1736_v17 = vsel %vm1735_vm4, %v2275_v32, %v1732_v42 }
 0xf15   :  { %v1747_v54 = vmul.f32 %v1736_v17, %v1713_v16 }
 0xf16   :  { %v2277_v47 = vpop.eup %2276 }
 0xf17   :  { %v1738_v59 = vmul.f32 %v2277_v47, %v1726_v37  ;;  %v1750_v6 = vmul.f32 %v1749_v44, %v1747_v54  ;;  %vm1744_vm5 = vweird.f32 %v2277_v47  ;;  %v1958_v54 = vld [vmem:[%s3115_s10 + $0x50] sm:$0xff] }
 0xf18   :  { %vm1745_vm7 = vmor %vm1743_vm6, %vm1744_vm5  ;;  %vm1945_vm5 = vcmask 523264   ;;  %vm1961_vm6 = vcmask 785408  }
 0xf19   :  { %v1739_v46 = vmul.f32 %v2277_v47, %v1738_v59  ;;  %v1753_v63 = vadd.f32 %v1752_v53, %v1750_v6  ;;  %v1957_v59 = vld [vmem:[%s3115_s10 + $0x48] sm:$0xff] }
 0xf1b   :  { %v1740_v58 = vmul.f32 0.5, %v1739_v46  ;;  %v2991_v1 = vmul.f32 %v1753_v63, %v2608_v12 }
 0xf1d   :  { %v1741_v60 = vsub.f32 1.5, %v1740_v58  ;;  %2105 = vmatmul.msk.f32.vlgmr.msra.gmra.mxu2 %vm53_vm0, %v2991_v1  ;;  %2111 = vmatmul.msk.f32.vlgmr.msra.gmra.mxu0 %vm53_vm0, %v2991_v1 }
 0xf1f   :  { %v1742_v3 = vmul.f32 %v2277_v47, %v1741_v60  ;;  %v1956_v60 = vld [vmem:[%s3115_s10 + $0x40] sm:$0xff] }
 0xf21   :  { %v1746_v7 = vsel %vm1745_vm7, %v2277_v47, %v1742_v3 }
 0xf22   :  { %v1748_v4 = vmul.f32 %v1746_v7, %v1714_v25 }
 0xf24   :  { %v1751_v51 = vmul.f32 %v1749_v44, %v1748_v4  ;;  %v1955_v4 = vld [vmem:[%s3115_s10 + $0x38] sm:$0xff] }
 0xf26   :  { %v1754_v5 = vadd.f32 %v1752_v53, %v1751_v51  ;;  %v1959_v53 = vld [vmem:[%s3115_s10 + $0x58] sm:$0xff] }
 0xf27   :  { %1972 = vmatpush.msra.mxu1 %v1959_v53 }
 0xf28   :  { %v2998_v43 = vmul.f32 %v1754_v5, %v2615_v45  ;;  %v1954_v5 = vld [vmem:[%s3115_s10 + $0x30] sm:$0xff] }
 0xf29   :  { %1973 = vmatpush.msra.mxu1 %v1958_v54 }
 0xf2a   :  { %2106 = vmatmul.msk.f32.gmra.mxu2 %vm53_vm0, %v2998_v43  ;;  %2112 = vmatmul.msk.f32.gmra.mxu0 %vm53_vm0, %v2998_v43 }
 0xf2b   :  { %1974 = vmatpush.msra.mxu1 %v1957_v59  ;;  %v1843_v59 = vperm.slane %v3007_v8, 2 }
 0xf2d   :  { %1975 = vmatpush.msra.mxu1 %v1956_v60 }
 0xf2f   :  { %1976 = vmatpush.msra.mxu1 %v1955_v4 }
 0xf31   :  { %1977 = vmatpush.msra.mxu1 %v1954_v5 }
 0xf9a   :  { %v1869_v9 = vpop.f32.mrf.mxu0 }
 0xf9b   :  { %v1870_v56 = vadd.f32 %v1869_v9, %v1851_v22  ;;  %v1953_v9 = vld [vmem:[%s3115_s10 + $0x28] sm:$0xff] }
 0xf9c   :  { %1978 = vmatpush.msra.mxu1 %v1953_v9 }
 0xf9d   :  { %v1875_v49 = vmax.f32 %v1870_v56, 0.0 }
 0xf9f   :  { %v1877_v13 = vmin.f32 %v1875_v49, 6.0  ;;  %v1952_v49 = vld [vmem:[%s3115_s10 + $0x20] sm:$0xff] }
 0xfa0   :  { %v1786_v2 = vpop.f32.mrf.mxu2  ;;  %1979 = vmatpush.msra.mxu1 %v1952_v49  ;;  %v1960_v49 = vperm.slane %v3007_v8, 6 }
 0xfa1   :  { %v1787_v14 = vadd.f32 %v1786_v2, %v1762_v11  ;;  %v1879_v57 = vsel %vm53_vm0, %v1877_v13, 0.0 }
 0xfa2   :  { %1880 = vadd.xlane.f32.xlu2 %v1879_v57 }
 0xfa3   :  { %v1792_v55 = vmax.f32 %v1787_v14, 0.0  ;;  %v1951_v14 = vld [vmem:[%s3115_s10 + $0x18] sm:$0xff] }
 0xfa4   :  { %1980 = vmatpush.msra.mxu1 %v1951_v14 }
 0xfa5   :  { %v1794_v52 = vmin.f32 %v1792_v55, 6.0 }
 0xfa7   :  { %v1872_v15 = vpop.f32.mrf.mxu0  ;;  %v1796_v0 = vsel %vm53_vm0, %v1794_v52, 0.0 }
 0xfa8   :  { %v1873_v10 = vadd.f32 %v1872_v15, %v1851_v22  ;;  %1797 = vadd.xlane.f32.xlu1 %v1796_v0  ;;  %v1950_v15 = vld [vmem:[%s3115_s10 + $0x10] sm:$0xff] }
 0xfa9   :  { %1981 = vmatpush.msra.mxu1 %v1950_v15 }
 0xfaa   :  { %v1876_v16 = vmax.f32 %v1873_v10, 0.0 }
 0xfac   :  { %v1878_v18 = vmin.f32 %v1876_v16, 6.0  ;;  %v1949_v16 = vld [vmem:[%s3115_s10 + $0x8] sm:$0xff] }
 0xfad   :  { %v1789_v40 = vpop.f32.mrf.mxu2  ;;  %1982 = vmatpush.msra.mxu1 %v1949_v16 }
 0xfae   :  { %v1790_v20 = vadd.f32 %v1789_v40, %v1762_v11  ;;  %v1882_v36 = vsel %vm53_vm0, %v1878_v18, 0.0  ;;  %v1923_v11 = vperm.slane %v3007_v8, 4 }
 0xfaf   :  { %1883 = vadd.xlane.f32.xlu0 %v1882_v36 }
 0xfb0   :  { %v1793_v25 = vmax.f32 %v1790_v20, 0.0 }
 0xfb2   :  { %v1795_v21 = vmin.f32 %v1793_v25, 6.0 }
 0xfb4   :  { %v1799_v19 = vsel %vm53_vm0, %v1795_v21, 0.0 }
 0xfb5   :  { %1800 = vadd.xlane.f32.xlu2 %v1799_v19 }
0x1015   :  { %v1881_v41 = vpop.xlane.xlu2 %1880 }
0x1016   :  { %v1885_v23 = vmul.f32 %v1881_v41, %v2580_v61 }
0x1018   :  { %v1887_v24 = vsub.f32 %v1877_v13, %v1885_v23 }
0x101a   :  { %v1889_v26 = vmul.f32 %v1887_v24, %v1887_v24 }
0x101b   :  { %v1798_v28 = vpop.xlane.xlu1 %1797 }
0x101c   :  { %v1802_v29 = vmul.f32 %v1798_v28, %v2580_v61  ;;  %v1891_v30 = vsel %vm53_vm0, %v1889_v26, 0.0 }
0x101d   :  { %1892 = vadd.xlane.f32.xlu0 %v1891_v30 }
0x101e   :  { %v3018_v48 = vsub.f32 %v1794_v52, %v1802_v29  ;;  %v1926_v52 = vperm.slane %v3007_v8, 5 }
0x1020   :  { %v1806_v31 = vmul.f32 %v3018_v48, %v3018_v48 }
0x1022   :  { %v1884_v62 = vpop.xlane.xlu0 %1883  ;;  %v1808_v32 = vsel %vm53_vm0, %v1806_v31, 0.0 }
0x1023   :  { %v1886_v50 = vmul.f32 %v1884_v62, %v2580_v61  ;;  %1809 = vadd.xlane.f32.xlu2 %v1808_v32 }
0x1025   :  { %v3024_v27 = vsub.f32 %v1878_v18, %v1886_v50  ;;  %v1948_v50 = vld [vmem:[%s3115_s10] sm:$0xff] }
0x1026   :  { %1983 = vmatpush.msra.mxu1 %v1948_v50 }
0x1027   :  { %v1890_v33 = vmul.f32 %v3024_v27, %v3024_v27 }
0x1028   :  { %v1801_v34 = vpop.xlane.xlu2 %1800 }
0x1029   :  { %v1803_v35 = vmul.f32 %v1801_v34, %v2580_v61  ;;  %v1894_v37 = vsel %vm53_vm0, %v1890_v33, 0.0 }
0x102a   :  { %1895 = vadd.xlane.f32.xlu1 %v1894_v37 }
0x102b   :  { %v3030_v38 = vsub.f32 %v1795_v21, %v1803_v35 }
0x102d   :  { %v1807_v39 = vmul.f32 %v3030_v38, %v3030_v38 }
0x102f   :  { %v1811_v42 = vsel %vm53_vm0, %v1807_v39, 0.0 }
0x1030   :  { %1812 = vadd.xlane.f32.xlu0 %v1811_v42 }
0x103b   :  { %1937 = vrot.lane.b32.xlu2 %v2991_v1, %s2298_s25 }
0x1090   :  { %v1893_v44 = vpop.xlane.xlu0 %1892 }
0x1091   :  { %v1897_v47 = vmul.f32 %v1893_v44, %v2580_v61 }
0x1093   :  { %v1899_v17 = vadd.f32 1e-05, %v1897_v47 }
0x1095   :  { %2278 = vrsqrt.f32 %v1899_v17  ;;  %vm1907_vm10 = vweird.f32 %v1899_v17 }
0x1096   :  { %v1810_v23 = vpop.xlane.xlu2 %1809 }
0x109b   :  { %v2279_v6 = vpop.eup %2278 }
0x109c   :  { %v1902_v63 = vmul.f32 %v2279_v6, %v1899_v17  ;;  %vm1908_vm8 = vweird.f32 %v2279_v6  ;;  %v1840_v17 = vperm.slane %v3007_v8, 1 }
0x109d   :  { %v1896_v46 = vpop.xlane.xlu1 %1895  ;;  %vm1909_vm11 = vmor %vm1907_vm10, %vm1908_vm8  ;;  %vm2013_vm10 = vcmask 351232  }
0x109e   :  { %v1898_v58 = vmul.f32 %v1896_v46, %v2580_v61  ;;  %v1903_v3 = vmul.f32 %v2279_v6, %v1902_v63 }
0x10a0   :  { %v1900_v7 = vadd.f32 1e-05, %v1898_v58  ;;  %v1904_v51 = vmul.f32 0.5, %v1903_v3  ;;  %v1938_v58 = vpop.permute.xlu2 %1937 }
0x10a2   :  { %2280 = vrsqrt.f32 %v1900_v7  ;;  %v1905_v22 = vsub.f32 1.5, %v1904_v51  ;;  %vm1917_vm13 = vweird.f32 %v1900_v7 }
0x10a3   :  { %v1813_v28 = vpop.xlane.xlu0 %1812 }
0x10a4   :  { %v1906_v56 = vmul.f32 %v2279_v6, %v1905_v22  ;;  %v1815_v29 = vmul.f32 %v1813_v28, %v2580_v61 }
0x10a6   :  { %v1910_v2 = vsel %vm1909_vm11, %v2279_v6, %v1906_v56  ;;  %v1817_v62 = vadd.f32 1e-05, %v1815_v29  ;;  %v1991_v56 = vlaneseq }
0x10a7   :  { %v1921_v55 = vmul.f32 %v1910_v2, %v1887_v24  ;;  %v1814_v24 = vmul.f32 %v1810_v23, %v2580_v61 }
0x10a8   :  { %v2281_v13 = vpop.eup %2280  ;;  %vm1834_vm9 = vweird.f32 %v1817_v62 }
0x10a9   :  { %v1912_v57 = vmul.f32 %v2281_v13, %v1900_v7  ;;  %v1924_v0 = vmul.f32 %v1923_v11, %v1921_v55  ;;  %vm1918_vm12 = vweird.f32 %v2281_v13  ;;  %v1816_v26 = vadd.f32 1e-05, %v1814_v24 }
0x10aa   :  { %vm1919_vm14 = vmor %vm1917_vm13, %vm1918_vm12 }
0x10ab   :  { %v1913_v10 = vmul.f32 %v2281_v13, %v1912_v57  ;;  %v1927_v40 = vadd.f32 %v1926_v52, %v1924_v0  ;;  %2282 = vrsqrt.f32 %v1816_v26  ;;  %vm1824_vm3 = vweird.f32 %v1816_v26 }
0x10ac   :  { %2284 = vrsqrt.f32 %v1817_v62 }
0x10ad   :  { %v1914_v18 = vmul.f32 0.5, %v1913_v10  ;;  %1931 = vrot.lane.b32.xlu1 %v1927_v40, %s2307_s21 }
0x10af   :  { %v1915_v20 = vsub.f32 1.5, %v1914_v18 }
0x10b1   :  { %v1916_v36 = vmul.f32 %v2281_v13, %v1915_v20  ;;  %v2283_v30 = vpop.eup %2282 }
0x10b2   :  { %v1819_v31 = vmul.f32 %v2283_v30, %v1816_v26  ;;  %vm1825_vm15 = vweird.f32 %v2283_v30 }
0x10b3   :  { %v1920_v25 = vsel %vm1919_vm14, %v2281_v13, %v1916_v36  ;;  %vm1826_vm1 = vmor %vm1824_vm3, %vm1825_vm15 }
0x10b4   :  { %v1922_v21 = vmul.f32 %v1920_v25, %v3024_v27  ;;  %v1820_v32 = vmul.f32 %v2283_v30, %v1819_v31  ;;  %v2285_v27 = vpop.eup %2284 }
0x10b5   :  { %1939 = vrot.lane.b32.xlu1 %v2998_v43, %s2298_s25  ;;  %v1829_v34 = vmul.f32 %v2285_v27, %v1817_v62  ;;  %vm1835_vm2 = vweird.f32 %v2285_v27 }
0x10b6   :  { %v1925_v19 = vmul.f32 %v1923_v11, %v1922_v21  ;;  %v1821_v33 = vmul.f32 0.5, %v1820_v32  ;;  %vm1836_vm4 = vmor %vm1834_vm9, %vm1835_vm2  ;;  %v1992_v11 = vand.u32 127, %v1991_v56 }
0x10b7   :  { %v1830_v37 = vmul.f32 %v2285_v27, %v1829_v34 }
0x10b8   :  { %v1928_v41 = vadd.f32 %v1926_v52, %v1925_v19  ;;  %v1822_v35 = vsub.f32 1.5, %v1821_v33  ;;  %vm1993_vm7 = vcmp.eq.s32.totalorder %v1992_v11, 0  ;;  %vm1998_vm8 = vcmp.lt.s32.totalorder %v1992_v11, 6 }
0x10b9   :  { %v1831_v61 = vmul.f32 0.5, %v1830_v37 }
0x10ba   :  { %1933 = vrot.lane.b32.xlu0 %v1928_v41, %s2307_s21  ;;  %v1823_v39 = vmul.f32 %v2283_v30, %v1822_v35 }
0x10bb   :  { %v1832_v47 = vsub.f32 1.5, %v1831_v61 }
0x10bc   :  { %v1827_v42 = vsel %vm1826_vm1, %v2283_v30, %v1823_v39 }
0x10bd   :  { %v1838_v44 = vmul.f32 %v1827_v42, %v3018_v48  ;;  %v1833_v53 = vmul.f32 %v2285_v27, %v1832_v47 }
0x10bf   :  { %v1841_v54 = vmul.f32 %v1840_v17, %v1838_v44  ;;  %v1837_v6 = vsel %vm1836_vm4, %v2285_v27, %v1833_v53 }
0x10c0   :  { %v1839_v48 = vmul.f32 %v1837_v6, %v3030_v38 }
0x10c1   :  { %v1844_v46 = vadd.f32 %v1843_v59, %v1841_v54 }
0x10c2   :  { %v1842_v7 = vmul.f32 %v1840_v17, %v1839_v48 }
0x10c4   :  { %v1845_v4 = vadd.f32 %v1843_v59, %v1842_v7 }
0x111f   :  { %v1932_v63 = vpop.permute.xlu1 %1931 }
0x1120   :  { %v1943_v60 = vsel %vm53_vm0, %v1844_v46, %v1932_v63 }
0x1121   :  { %v1946_v3 = vsel %vm1945_vm5, %v1943_v60, %v1938_v58 }
0x1122   :  { %2113 = vmatmul.msk.f32.vlgmr.msra.gmra.mxu1 %vm1961_vm6, %v1946_v3 }
0x1127   :  { %v1940_v5 = vpop.permute.xlu1 %1939 }
0x112c   :  { %v1934_v51 = vpop.permute.xlu0 %1933 }
0x112d   :  { %v1944_v22 = vsel %vm53_vm0, %v1845_v4, %v1934_v51 }
0x112e   :  { %v1947_v9 = vsel %vm1945_vm5, %v1944_v22, %v1940_v5 }
0x112f   :  { %2114 = vmatmul.msk.f32.gmra.mxu1 %vm1961_vm6, %v1947_v9 }
0x119f   :  { %v1985_v13 = vpop.f32.mrf.mxu1 }
0x11a0   :  { %v1986_v2 = vadd.f32 %v1985_v13, %v1960_v49 }
0x11a2   :  { %v1994_v14 = vmax.f32 %v1986_v2, 0.0 }
0x11a4   :  { %v1996_v57 = vsel %vm1993_vm7, %v1994_v14, %v1986_v2 }
0x11a5   :  { %v1999_v38 = vmul.f32 %v1996_v57, %v2608_v12 }
0x11a7   :  { %v2001_v55 = vsel %vm1998_vm8, %v1999_v38, %v1996_v57 }
0x11a8   :  { %2005 = vrot.lane.b32.xlu2 %v2001_v55, %s2307_s21 }
0x11ac   :  { %v1988_v52 = vpop.f32.mrf.mxu1 }
0x11ad   :  { %v1989_v15 = vadd.f32 %v1988_v52, %v1960_v49 }
0x11af   :  { %v1995_v10 = vmax.f32 %v1989_v15, 0.0 }
0x11b1   :  { %v1997_v0 = vsel %vm1993_vm7, %v1995_v10, %v1989_v15 }
0x11b2   :  { %v2000_v16 = vmul.f32 %v1997_v0, %v2615_v45 }
0x11b4   :  { %v2002_v18 = vsel %vm1998_vm8, %v2000_v16, %v1997_v0 }
0x11b5   :  { %2007 = vrot.lane.b32.xlu0 %v2002_v18, %s2307_s21 }
0x1202   :  { %v2006_v8 = vpop.permute.xlu2 %2005 }
0x1203   :  { %v2011_v40 = vsel %vm53_vm0, %v2991_v1, %v2006_v8 }
0x1204   :  { %2014 = vst.msk [vmem:[%s3116_s11] sm:$0xff] %vm2013_vm10, %v2011_v40 }
0x1227   :  { %v2008_v12 = vpop.permute.xlu0 %2007 }
0x1228   :  { %v2012_v20 = vsel %vm53_vm0, %v2998_v43, %v2008_v12 }
0x1229   :  { %2015 = vst.msk [vmem:[%s3116_s11 + $0x8] sm:$0xff] %vm2013_vm10, %v2012_v20 }

</bundles_post_ra>
